<compile_context>
chip_gen: v5e
topology: v5e:2x2
jax: 0.10.0
libtpu: 0.0.40
codegen_flags: <defaults>
</compile_context>

<pallas_src>
import functools

import numpy as np
import jax
import jax.numpy as jnp
from jax import lax
from jax.experimental import pallas as pl
from jax.experimental.pallas import tpu as pltpu


def _pair(x):
    if isinstance(x, (tuple, list)):
        return int(x[0]), int(x[1])
    return int(x), int(x)


def _roi_pool_kernel(pooled_h, pooled_w,
                     b_ref, ws_ref, we_ref, hs_ref, he_ref,
                     feat_ref, out_ref, col_ref):
    """One (channel-tile, ROI) pair per grid step.

    b_ref            : (R,)     int32 SMEM  -- batch index (used only by index_map)
    ws_ref / we_ref  : (R*PW,)  int32 SMEM  -- clipped [start, end) column per w-bin
    hs_ref / he_ref  : (R*PH,)  int32 SMEM  -- clipped [start, end) row    per h-bin
    feat_ref         : (1, H, W, C_BLK) VMEM  channels-last slab of this ROI's image
    out_ref          : (1, PH, PW, C_BLK) VMEM
    col_ref          : (PW, H, C_BLK) VMEM scratch (per-w-bin column maxes)
    """
    del b_ref  # only consumed by the index_map
    r = pl.program_id(1)
    _, H, W, C = feat_ref.shape

    feat = feat_ref[0]                                     # (H, W, C), native dtype
    neg_inf = jnp.array(-jnp.inf, dtype=feat_ref.dtype)
    zero = jnp.array(0.0, dtype=feat_ref.dtype)

    # ---- Stage A: masked max over W for each w-bin -> col_ref[pw] ----------
    w_idx = lax.broadcasted_iota(jnp.int32, (1, W, 1), 1)  # absolute column index
    for pw in range(pooled_w):
        ws = ws_ref[r * pooled_w + pw]                     # scalar SMEM reads
        we = we_ref[r * pooled_w + pw]
        mw = (w_idx >= ws) & (w_idx < we)                  # (1, W, 1)
        cmax = jnp.max(jnp.where(mw, feat, neg_inf), axis=1)      # (H, C)
        col_ref[pw] = jnp.where(we > ws, cmax, zero)       # empty bin -> 0

    # ---- Stage B: masked max over H for each h-bin -> out row ---------------
    h_idx = lax.broadcasted_iota(jnp.int32, (1, H, 1), 1)  # absolute row index
    for ph in range(pooled_h):
        hs = hs_ref[r * pooled_h + ph]
        he = he_ref[r * pooled_h + ph]
        mh = (h_idx >= hs) & (h_idx < he)                  # (1, H, 1)
        omax = jnp.max(jnp.where(mh, col_ref[...], neg_inf), axis=1)  # (PW, C)
        out_ref[0, ph] = jnp.where(he > hs, omax, zero).astype(out_ref.dtype)


def roi_pool(features, rois, out_size, spatial_scale, c_block=None):
    """features: (N, C, H, W); rois: (R, 5) [batch, x1, y1, x2, y2]
    -> (R, C, out_h, out_w), identical to mmdet.ops.roi_pool forward."""
    out_h, out_w = _pair(out_size)
    N, C, H, W = features.shape
    R = rois.shape[0]

    rois = rois.astype(jnp.float32)
    scale = jnp.float32(spatial_scale)

    def _round(v):  # round-half-away-from-zero, like CUDA round()
        x = v * scale
        return jnp.where(x >= 0, jnp.floor(x + 0.5),
                         jnp.ceil(x - 0.5)).astype(jnp.int32)

    batch_idx = rois[:, 0].astype(jnp.int32)
    start_w = _round(rois[:, 1])
    start_h = _round(rois[:, 2])
    end_w = _round(rois[:, 3])
    end_h = _round(rois[:, 4])
    roi_w = jnp.maximum(end_w - start_w + 1, 1)
    roi_h = jnp.maximum(end_h - start_h + 1, 1)

    # Sort ROIs by image so consecutive grid steps keep the same feature block
    # index -> Pallas skips the per-step HBM->VMEM slab DMA for repeats.
    order = jnp.argsort(batch_idx)
    inv = jnp.argsort(order)
    b_s = batch_idx[order]
    sw_s, sh_s = start_w[order], start_h[order]
    rw_s, rh_s = roi_w[order], roi_h[order]

    # Exact integer bin boundaries, clipped to [0, W]/[0, H]; flat 1-D int32
    # arrays (a 2-D (R, 7) SMEM table would pad its last dim to 128).
    pw_idx = jnp.arange(out_w, dtype=jnp.int32)
    ph_idx = jnp.arange(out_h, dtype=jnp.int32)
    ws = jnp.clip((pw_idx[None, :] * rw_s[:, None]) // out_w + sw_s[:, None], 0, W)
    we = jnp.clip(((pw_idx[None, :] + 1) * rw_s[:, None] + out_w - 1) // out_w
                  + sw_s[:, None], 0, W)
    hs = jnp.clip((ph_idx[None, :] * rh_s[:, None]) // out_h + sh_s[:, None], 0, H)
    he = jnp.clip(((ph_idx[None, :] + 1) * rh_s[:, None] + out_h - 1) // out_h
                  + sh_s[:, None], 0, H)
    ws_flat = ws.reshape(-1).astype(jnp.int32)     # (R*PW,)
    we_flat = we.reshape(-1).astype(jnp.int32)
    hs_flat = hs.reshape(-1).astype(jnp.int32)     # (R*PH,)
    he_flat = he.reshape(-1).astype(jnp.int32)

    # ---- channel tiling so the double-buffered slab fits VMEM (v7x: 64 MiB) --
    itemsize = jnp.dtype(features.dtype).itemsize
    per_chan_bytes = H * W * itemsize
    slab_budget = 40 * 1024 * 1024      # for 2x (H, W, C_BLK) feature buffers
    if c_block is not None:
        c_blk = int(c_block)
    elif C <= 128 or 2 * per_chan_bytes * C <= slab_budget:
        c_blk = C
    else:
        c_blk = (slab_budget // (2 * per_chan_bytes)) // 128 * 128
        c_blk = int(max(128, min(c_blk, (C // 128) * 128)))
    num_c = -(-C // c_blk)

    # VMEM limit from the actual working set (+ headroom), not physical size.
    feat_block = H * W * c_blk * itemsize
    out_block = out_h * out_w * c_blk * itemsize
    scratch_block = out_w * H * c_blk * itemsize
    vmem_limit = int(max(2 * feat_block + 2 * out_block + scratch_block
                         + (4 << 20), 16 << 20))

    # Channels-last so C fills the 128-lane axis inside the kernel.
    # (If the producer can emit NHWC directly, hoist this transpose out.)
    feats_nhwc = jnp.transpose(features, (0, 2, 3, 1))             # (N, H, W, C)

    kernel = functools.partial(_roi_pool_kernel, out_h, out_w)

    # Grid = (channel tile, ROI); channel axis OUTERMOST so the per-image slab
    # is reused across consecutive sorted ROIs (one total pass over features).
    grid_spec = pltpu.PrefetchScalarGridSpec(
        num_scalar_prefetch=5,
        grid=(num_c, R),
        in_specs=[
            pl.BlockSpec((1, H, W, c_blk),
                         lambda c, r, b, ws, we, hs, he: (b[r], 0, 0, c)),
        ],
        out_specs=pl.BlockSpec((1, out_h, out_w, c_blk),
                               lambda c, r, b, ws, we, hs, he: (r, 0, 0, c)),
        scratch_shapes=[pltpu.VMEM((out_w, H, c_blk), features.dtype)],
    )

    out_nhwc = pl.pallas_call(
        kernel,
        grid_spec=grid_spec,
        out_shape=jax.ShapeDtypeStruct((R, out_h, out_w, C), features.dtype),
        compiler_params=pltpu.CompilerParams(
            # disjoint output blocks along both axes
            dimension_semantics=("parallel", "parallel"),
            vmem_limit_bytes=vmem_limit,
        ),
    )(b_s, ws_flat, we_flat, hs_flat, he_flat, feats_nhwc)

    out = jnp.transpose(out_nhwc, (0, 3, 1, 2))                    # (R, C, PH, PW)
    return jnp.take(out, inv, axis=0)                              # undo the sort


class RoIPool:
    """JAX/Pallas equivalent of mmdet.ops.RoIPool (forward only)."""

    def __init__(self, out_size, spatial_scale, use_torchvision=False):
        self.out_size = out_size
        self.spatial_scale = float(spatial_scale)
        # use_torchvision only selects a CUDA backend in PyTorch; semantics identical.
        self.use_torchvision = use_torchvision

    def __call__(self, features, rois):
        return roi_pool(features, rois, self.out_size, self.spatial_scale)


def _roi_pool_ref(features, rois, out_size, spatial_scale):
    """Pure numpy reference (exact integer bin boundaries, CUDA-style rounding)."""
    feats = np.asarray(features, dtype=np.float32)
    rois_np = np.asarray(rois, dtype=np.float32)
    out_h, out_w = out_size
    _, C, H, W = feats.shape
    R = rois_np.shape[0]
    out = np.zeros((R, C, out_h, out_w), dtype=np.float32)
    scale = np.float32(spatial_scale)

    def rnd(v):  # round-half-away-from-zero
        x = np.float32(v) * scale
        if x >= 0:
            return int(np.floor(x + np.float32(0.5)))
        return int(np.ceil(x - np.float32(0.5)))

    for r in range(R):
        b = int(rois_np[r, 0])
        sw, sh = rnd(rois_np[r, 1]), rnd(rois_np[r, 2])
        ew, eh = rnd(rois_np[r, 3]), rnd(rois_np[r, 4])
        rw = max(ew - sw + 1, 1)
        rh = max(eh - sh + 1, 1)
        for ph in range(out_h):
            h0 = min(max((ph * rh) // out_h + sh, 0), H)
            h1 = min(max(((ph + 1) * rh + out_h - 1) // out_h + sh, 0), H)
            for pw in range(out_w):
                w0 = min(max((pw * rw) // out_w + sw, 0), W)
                w1 = min(max(((pw + 1) * rw + out_w - 1) // out_w + sw, 0), W)
                if h1 <= h0 or w1 <= w0:
                    out[r, :, ph, pw] = 0.0
                else:
                    out[r, :, ph, pw] = feats[b, :, h0:h1, w0:w1].max(axis=(1, 2))
    return out


if __name__ == "__main__":
    key = jax.random.PRNGKey(0)

    # --- test 1: module-sized example (single channel tile) -----------------
    k_feat, k_batch, k_xy, k_wh, k2_feat, k2_xy, k2_wh = jax.random.split(key, 7)

    N, C, H, W = 2, 4, 16, 16
    R = 5
    out_size = 7
    spatial_scale = 0.5

    features = jax.random.normal(k_feat, (N, C, H, W), dtype=jnp.float32)
    batch = jax.random.randint(k_batch, (R, 1), 0, N).astype(jnp.float32)
    xy1 = jax.random.uniform(k_xy, (R, 2), minval=0.0, maxval=20.0, dtype=jnp.float32)
    wh = jax.random.uniform(k_wh, (R, 2), minval=2.0, maxval=12.0, dtype=jnp.float32)
    rois = jnp.concatenate([batch, xy1, xy1 + wh], axis=1).astype(jnp.float32)

    pool = RoIPool(out_size=out_size, spatial_scale=spatial_scale)
    out = jax.block_until_ready(pool(features, rois))
    ref = _roi_pool_ref(np.asarray(features), np.asarray(rois),
                        (out_size, out_size), spatial_scale)
    np.testing.assert_allclose(np.asarray(out), ref, rtol=1e-5, atol=1e-5)

    # --- test 2: exercise the channel-tiling path (2 channel tiles) ---------
    N2, C2, H2, W2, R2 = 1, 256, 8, 8, 3
    features2 = jax.random.normal(k2_feat, (N2, C2, H2, W2), dtype=jnp.float32)
    batch2 = jnp.zeros((R2, 1), dtype=jnp.float32)
    xy1_2 = jax.random.uniform(k2_xy, (R2, 2), minval=0.0, maxval=4.0, dtype=jnp.float32)
    wh2 = jax.random.uniform(k2_wh, (R2, 2), minval=1.0, maxval=4.0, dtype=jnp.float32)
    rois2 = jnp.concatenate([batch2, xy1_2, xy1_2 + wh2], axis=1).astype(jnp.float32)

    out2 = jax.block_until_ready(
        roi_pool(features2, rois2, out_size, 1.0, c_block=128))
    ref2 = _roi_pool_ref(np.asarray(features2), np.asarray(rois2),
                         (out_size, out_size), 1.0)
    np.testing.assert_allclose(np.asarray(out2), ref2, rtol=1e-5, atol=1e-5)

    print("KERNEL_OK")
</pallas_src>

<mosaic_0001>
module attributes {stable_mosaic.version = 11 : i64} {
  func.func @_roi_pool_kernel(%arg0: i32, %arg1: i32, %arg2: memref<5xi32, #tpu.memory_space<smem>>, %arg3: memref<35xi32, #tpu.memory_space<smem>>, %arg4: memref<35xi32, #tpu.memory_space<smem>>, %arg5: memref<35xi32, #tpu.memory_space<smem>>, %arg6: memref<35xi32, #tpu.memory_space<smem>>, %arg7: memref<1x16x16x4xf32, #tpu.memory_space<vmem>>, %arg8: memref<1x7x7x4xf32, #tpu.memory_space<vmem>>, %arg9: memref<7x16x4xf32, #tpu.memory_space<vmem>>) attributes {dimension_semantics = [#tpu.dimension_semantics<parallel>, #tpu.dimension_semantics<parallel>], iteration_bounds = array<i64: 1, 5>, scalar_prefetch = 5 : i64, scratch_operands = 1 : i64, tpu.core_type = #tpu.core_type<tc>, window_params = [{transform_indices = @transform_0, window_bounds = array<i64: 1, 16, 16, 4>}, {transform_indices = @transform_1, window_bounds = array<i64: 1, 7, 7, 4>}]} {
    %c0 = arith.constant 0 : index
    %c0_0 = arith.constant 0 : index
    %c0_1 = arith.constant 0 : index
    %c0_2 = arith.constant 0 : index
    %0 = vector.load %arg7[%c0, %c0_0, %c0_1, %c0_2] : memref<1x16x16x4xf32, #tpu.memory_space<vmem>>, vector<1x16x16x4xf32>
    %1 = vector.shape_cast %0 : vector<1x16x16x4xf32> to vector<16x16x4xf32>
    %2 = tpu.iota {dimensions = array<i32: 1>} : vector<1x16x1xi32>
    %c7_i32 = arith.constant 7 : i32
    %3 = arith.muli %arg1, %c7_i32 : i32
    %c0_i32 = arith.constant 0 : i32
    %4 = arith.addi %3, %c0_i32 : i32
    %5 = arith.index_cast %4 : i32 to index
    %6 = memref.load %arg3[%5] : memref<35xi32, #tpu.memory_space<smem>>
    %c7_i32_3 = arith.constant 7 : i32
    %7 = arith.muli %arg1, %c7_i32_3 : i32
    %c0_i32_4 = arith.constant 0 : i32
    %8 = arith.addi %7, %c0_i32_4 : i32
    %9 = arith.index_cast %8 : i32 to index
    %10 = memref.load %arg4[%9] : memref<35xi32, #tpu.memory_space<smem>>
    %11 = vector.broadcast %6 : i32 to vector<1x16x1xi32>
    %12 = arith.cmpi sge, %2, %11 : vector<1x16x1xi32>
    %13 = vector.broadcast %10 : i32 to vector<1x16x1xi32>
    %14 = arith.cmpi slt, %2, %13 : vector<1x16x1xi32>
    %15 = arith.andi %12, %14 : vector<1x16x1xi1>
    %cst = arith.constant 0xFF800000 : f32
    %16 = vector.shape_cast %15 : vector<1x16x1xi1> to vector<1x16x1xi1>
    %17 = vector.broadcast %16 : vector<1x16x1xi1> to vector<16x16x4xi1>
    %18 = vector.broadcast %cst : f32 to vector<16x16x4xf32>
    %19 = arith.select %17, %1, %18 : vector<16x16x4xi1>, vector<16x16x4xf32>
    %cst_5 = arith.constant dense<0xFF800000> : vector<16x4xf32>
    %20 = vector.multi_reduction <maximumf>, %19, %cst_5 [1] : vector<16x16x4xf32> to vector<16x4xf32>
    %21 = arith.cmpi sgt, %10, %6 : i32
    %cst_6 = arith.constant 0.000000e+00 : f32
    %22 = vector.broadcast %cst_6 : f32 to vector<16x4xf32>
    %23 = arith.select %21, %20, %22 : vector<16x4xf32>
    %c0_7 = arith.constant 0 : index
    %c0_8 = arith.constant 0 : index
    %c0_9 = arith.constant 0 : index
    %24 = vector.load %arg9[%c0_7, %c0_8, %c0_9] : memref<7x16x4xf32, #tpu.memory_space<vmem>>, vector<1x16x4xf32>
    %25 = vector.shape_cast %24 : vector<1x16x4xf32> to vector<16x4xf32>
    %26 = vector.shape_cast %23 : vector<16x4xf32> to vector<1x16x4xf32>
    tpu.vector_store %arg9[%c0_7, %c0_8, %c0_9], %26 {strides = array<i32>} : memref<7x16x4xf32, #tpu.memory_space<vmem>>, vector<1x16x4xf32>,
    %c7_i32_10 = arith.constant 7 : i32
    %27 = arith.muli %arg1, %c7_i32_10 : i32
    %c1_i32 = arith.constant 1 : i32
    %28 = arith.addi %27, %c1_i32 : i32
    %29 = arith.index_cast %28 : i32 to index
    %30 = memref.load %arg3[%29] : memref<35xi32, #tpu.memory_space<smem>>
    %c7_i32_11 = arith.constant 7 : i32
    %31 = arith.muli %arg1, %c7_i32_11 : i32
    %c1_i32_12 = arith.constant 1 : i32
    %32 = arith.addi %31, %c1_i32_12 : i32
    %33 = arith.index_cast %32 : i32 to index
    %34 = memref.load %arg4[%33] : memref<35xi32, #tpu.memory_space<smem>>
    %35 = vector.broadcast %30 : i32 to vector<1x16x1xi32>
    %36 = arith.cmpi sge, %2, %35 : vector<1x16x1xi32>
    %37 = vector.broadcast %34 : i32 to vector<1x16x1xi32>
    %38 = arith.cmpi slt, %2, %37 : vector<1x16x1xi32>
    %39 = arith.andi %36, %38 : vector<1x16x1xi1>
    %cst_13 = arith.constant 0xFF800000 : f32
    %40 = vector.shape_cast %39 : vector<1x16x1xi1> to vector<1x16x1xi1>
    %41 = vector.broadcast %40 : vector<1x16x1xi1> to vector<16x16x4xi1>
    %42 = vector.broadcast %cst_13 : f32 to vector<16x16x4xf32>
    %43 = arith.select %41, %1, %42 : vector<16x16x4xi1>, vector<16x16x4xf32>
    %cst_14 = arith.constant dense<0xFF800000> : vector<16x4xf32>
    %44 = vector.multi_reduction <maximumf>, %43, %cst_14 [1] : vector<16x16x4xf32> to vector<16x4xf32>
    %45 = arith.cmpi sgt, %34, %30 : i32
    %cst_15 = arith.constant 0.000000e+00 : f32
    %46 = vector.broadcast %cst_15 : f32 to vector<16x4xf32>
    %47 = arith.select %45, %44, %46 : vector<16x4xf32>
    %c1 = arith.constant 1 : index
    %c0_16 = arith.constant 0 : index
    %c0_17 = arith.constant 0 : index
    %48 = vector.load %arg9[%c1, %c0_16, %c0_17] : memref<7x16x4xf32, #tpu.memory_space<vmem>>, vector<1x16x4xf32>
    %49 = vector.shape_cast %48 : vector<1x16x4xf32> to vector<16x4xf32>
    %50 = vector.shape_cast %47 : vector<16x4xf32> to vector<1x16x4xf32>
    tpu.vector_store %arg9[%c1, %c0_16, %c0_17], %50 {strides = array<i32>} : memref<7x16x4xf32, #tpu.memory_space<vmem>>, vector<1x16x4xf32>,
    %c7_i32_18 = arith.constant 7 : i32
    %51 = arith.muli %arg1, %c7_i32_18 : i32
    %c2_i32 = arith.constant 2 : i32
    %52 = arith.addi %51, %c2_i32 : i32
    %53 = arith.index_cast %52 : i32 to index
    %54 = memref.load %arg3[%53] : memref<35xi32, #tpu.memory_space<smem>>
    %c7_i32_19 = arith.constant 7 : i32
    %55 = arith.muli %arg1, %c7_i32_19 : i32
    %c2_i32_20 = arith.constant 2 : i32
    %56 = arith.addi %55, %c2_i32_20 : i32
    %57 = arith.index_cast %56 : i32 to index
    %58 = memref.load %arg4[%57] : memref<35xi32, #tpu.memory_space<smem>>
    %59 = vector.broadcast %54 : i32 to vector<1x16x1xi32>
    %60 = arith.cmpi sge, %2, %59 : vector<1x16x1xi32>
    %61 = vector.broadcast %58 : i32 to vector<1x16x1xi32>
    %62 = arith.cmpi slt, %2, %61 : vector<1x16x1xi32>
    %63 = arith.andi %60, %62 : vector<1x16x1xi1>
    %cst_21 = arith.constant 0xFF800000 : f32
    %64 = vector.shape_cast %63 : vector<1x16x1xi1> to vector<1x16x1xi1>
    %65 = vector.broadcast %64 : vector<1x16x1xi1> to vector<16x16x4xi1>
    %66 = vector.broadcast %cst_21 : f32 to vector<16x16x4xf32>
    %67 = arith.select %65, %1, %66 : vector<16x16x4xi1>, vector<16x16x4xf32>
    %cst_22 = arith.constant dense<0xFF800000> : vector<16x4xf32>
    %68 = vector.multi_reduction <maximumf>, %67, %cst_22 [1] : vector<16x16x4xf32> to vector<16x4xf32>
    %69 = arith.cmpi sgt, %58, %54 : i32
    %cst_23 = arith.constant 0.000000e+00 : f32
    %70 = vector.broadcast %cst_23 : f32 to vector<16x4xf32>
    %71 = arith.select %69, %68, %70 : vector<16x4xf32>
    %c2 = arith.constant 2 : index
    %c0_24 = arith.constant 0 : index
    %c0_25 = arith.constant 0 : index
    %72 = vector.load %arg9[%c2, %c0_24, %c0_25] : memref<7x16x4xf32, #tpu.memory_space<vmem>>, vector<1x16x4xf32>
    %73 = vector.shape_cast %72 : vector<1x16x4xf32> to vector<16x4xf32>
    %74 = vector.shape_cast %71 : vector<16x4xf32> to vector<1x16x4xf32>
    tpu.vector_store %arg9[%c2, %c0_24, %c0_25], %74 {strides = array<i32>} : memref<7x16x4xf32, #tpu.memory_space<vmem>>, vector<1x16x4xf32>,
    %c7_i32_26 = arith.constant 7 : i32
    %75 = arith.muli %arg1, %c7_i32_26 : i32
    %c3_i32 = arith.constant 3 : i32
    %76 = arith.addi %75, %c3_i32 : i32
    %77 = arith.index_cast %76 : i32 to index
    %78 = memref.load %arg3[%77] : memref<35xi32, #tpu.memory_space<smem>>
    %c7_i32_27 = arith.constant 7 : i32
    %79 = arith.muli %arg1, %c7_i32_27 : i32
    %c3_i32_28 = arith.constant 3 : i32
    %80 = arith.addi %79, %c3_i32_28 : i32
    %81 = arith.index_cast %80 : i32 to index
    %82 = memref.load %arg4[%81] : memref<35xi32, #tpu.memory_space<smem>>
    %83 = vector.broadcast %78 : i32 to vector<1x16x1xi32>
    %84 = arith.cmpi sge, %2, %83 : vector<1x16x1xi32>
    %85 = vector.broadcast %82 : i32 to vector<1x16x1xi32>
    %86 = arith.cmpi slt, %2, %85 : vector<1x16x1xi32>
    %87 = arith.andi %84, %86 : vector<1x16x1xi1>
    %cst_29 = arith.constant 0xFF800000 : f32
    %88 = vector.shape_cast %87 : vector<1x16x1xi1> to vector<1x16x1xi1>
    %89 = vector.broadcast %88 : vector<1x16x1xi1> to vector<16x16x4xi1>
    %90 = vector.broadcast %cst_29 : f32 to vector<16x16x4xf32>
    %91 = arith.select %89, %1, %90 : vector<16x16x4xi1>, vector<16x16x4xf32>
    %cst_30 = arith.constant dense<0xFF800000> : vector<16x4xf32>
    %92 = vector.multi_reduction <maximumf>, %91, %cst_30 [1] : vector<16x16x4xf32> to vector<16x4xf32>
    %93 = arith.cmpi sgt, %82, %78 : i32
    %cst_31 = arith.constant 0.000000e+00 : f32
    %94 = vector.broadcast %cst_31 : f32 to vector<16x4xf32>
    %95 = arith.select %93, %92, %94 : vector<16x4xf32>
    %c3 = arith.constant 3 : index
    %c0_32 = arith.constant 0 : index
    %c0_33 = arith.constant 0 : index
    %96 = vector.load %arg9[%c3, %c0_32, %c0_33] : memref<7x16x4xf32, #tpu.memory_space<vmem>>, vector<1x16x4xf32>
    %97 = vector.shape_cast %96 : vector<1x16x4xf32> to vector<16x4xf32>
    %98 = vector.shape_cast %95 : vector<16x4xf32> to vector<1x16x4xf32>
    tpu.vector_store %arg9[%c3, %c0_32, %c0_33], %98 {strides = array<i32>} : memref<7x16x4xf32, #tpu.memory_space<vmem>>, vector<1x16x4xf32>,
    %c7_i32_34 = arith.constant 7 : i32
    %99 = arith.muli %arg1, %c7_i32_34 : i32
    %c4_i32 = arith.constant 4 : i32
    %100 = arith.addi %99, %c4_i32 : i32
    %101 = arith.index_cast %100 : i32 to index
    %102 = memref.load %arg3[%101] : memref<35xi32, #tpu.memory_space<smem>>
    %c7_i32_35 = arith.constant 7 : i32
    %103 = arith.muli %arg1, %c7_i32_35 : i32
    %c4_i32_36 = arith.constant 4 : i32
    %104 = arith.addi %103, %c4_i32_36 : i32
    %105 = arith.index_cast %104 : i32 to index
    %106 = memref.load %arg4[%105] : memref<35xi32, #tpu.memory_space<smem>>
    %107 = vector.broadcast %102 : i32 to vector<1x16x1xi32>
    %108 = arith.cmpi sge, %2, %107 : vector<1x16x1xi32>
    %109 = vector.broadcast %106 : i32 to vector<1x16x1xi32>
    %110 = arith.cmpi slt, %2, %109 : vector<1x16x1xi32>
    %111 = arith.andi %108, %110 : vector<1x16x1xi1>
    %cst_37 = arith.constant 0xFF800000 : f32
    %112 = vector.shape_cast %111 : vector<1x16x1xi1> to vector<1x16x1xi1>
    %113 = vector.broadcast %112 : vector<1x16x1xi1> to vector<16x16x4xi1>
    %114 = vector.broadcast %cst_37 : f32 to vector<16x16x4xf32>
    %115 = arith.select %113, %1, %114 : vector<16x16x4xi1>, vector<16x16x4xf32>
    %cst_38 = arith.constant dense<0xFF800000> : vector<16x4xf32>
    %116 = vector.multi_reduction <maximumf>, %115, %cst_38 [1] : vector<16x16x4xf32> to vector<16x4xf32>
    %117 = arith.cmpi sgt, %106, %102 : i32
    %cst_39 = arith.constant 0.000000e+00 : f32
    %118 = vector.broadcast %cst_39 : f32 to vector<16x4xf32>
    %119 = arith.select %117, %116, %118 : vector<16x4xf32>
    %c4 = arith.constant 4 : index
    %c0_40 = arith.constant 0 : index
    %c0_41 = arith.constant 0 : index
    %120 = vector.load %arg9[%c4, %c0_40, %c0_41] : memref<7x16x4xf32, #tpu.memory_space<vmem>>, vector<1x16x4xf32>
    %121 = vector.shape_cast %120 : vector<1x16x4xf32> to vector<16x4xf32>
    %122 = vector.shape_cast %119 : vector<16x4xf32> to vector<1x16x4xf32>
    tpu.vector_store %arg9[%c4, %c0_40, %c0_41], %122 {strides = array<i32>} : memref<7x16x4xf32, #tpu.memory_space<vmem>>, vector<1x16x4xf32>,
    %c7_i32_42 = arith.constant 7 : i32
    %123 = arith.muli %arg1, %c7_i32_42 : i32
    %c5_i32 = arith.constant 5 : i32
    %124 = arith.addi %123, %c5_i32 : i32
    %125 = arith.index_cast %124 : i32 to index
    %126 = memref.load %arg3[%125] : memref<35xi32, #tpu.memory_space<smem>>
    %c7_i32_43 = arith.constant 7 : i32
    %127 = arith.muli %arg1, %c7_i32_43 : i32
    %c5_i32_44 = arith.constant 5 : i32
    %128 = arith.addi %127, %c5_i32_44 : i32
    %129 = arith.index_cast %128 : i32 to index
    %130 = memref.load %arg4[%129] : memref<35xi32, #tpu.memory_space<smem>>
    %131 = vector.broadcast %126 : i32 to vector<1x16x1xi32>
    %132 = arith.cmpi sge, %2, %131 : vector<1x16x1xi32>
    %133 = vector.broadcast %130 : i32 to vector<1x16x1xi32>
    %134 = arith.cmpi slt, %2, %133 : vector<1x16x1xi32>
    %135 = arith.andi %132, %134 : vector<1x16x1xi1>
    %cst_45 = arith.constant 0xFF800000 : f32
    %136 = vector.shape_cast %135 : vector<1x16x1xi1> to vector<1x16x1xi1>
    %137 = vector.broadcast %136 : vector<1x16x1xi1> to vector<16x16x4xi1>
    %138 = vector.broadcast %cst_45 : f32 to vector<16x16x4xf32>
    %139 = arith.select %137, %1, %138 : vector<16x16x4xi1>, vector<16x16x4xf32>
    %cst_46 = arith.constant dense<0xFF800000> : vector<16x4xf32>
    %140 = vector.multi_reduction <maximumf>, %139, %cst_46 [1] : vector<16x16x4xf32> to vector<16x4xf32>
    %141 = arith.cmpi sgt, %130, %126 : i32
    %cst_47 = arith.constant 0.000000e+00 : f32
    %142 = vector.broadcast %cst_47 : f32 to vector<16x4xf32>
    %143 = arith.select %141, %140, %142 : vector<16x4xf32>
    %c5 = arith.constant 5 : index
    %c0_48 = arith.constant 0 : index
    %c0_49 = arith.constant 0 : index
    %144 = vector.load %arg9[%c5, %c0_48, %c0_49] : memref<7x16x4xf32, #tpu.memory_space<vmem>>, vector<1x16x4xf32>
    %145 = vector.shape_cast %144 : vector<1x16x4xf32> to vector<16x4xf32>
    %146 = vector.shape_cast %143 : vector<16x4xf32> to vector<1x16x4xf32>
    tpu.vector_store %arg9[%c5, %c0_48, %c0_49], %146 {strides = array<i32>} : memref<7x16x4xf32, #tpu.memory_space<vmem>>, vector<1x16x4xf32>,
    %c7_i32_50 = arith.constant 7 : i32
    %147 = arith.muli %arg1, %c7_i32_50 : i32
    %c6_i32 = arith.constant 6 : i32
    %148 = arith.addi %147, %c6_i32 : i32
    %149 = arith.index_cast %148 : i32 to index
    %150 = memref.load %arg3[%149] : memref<35xi32, #tpu.memory_space<smem>>
    %c7_i32_51 = arith.constant 7 : i32
    %151 = arith.muli %arg1, %c7_i32_51 : i32
    %c6_i32_52 = arith.constant 6 : i32
    %152 = arith.addi %151, %c6_i32_52 : i32
    %153 = arith.index_cast %152 : i32 to index
    %154 = memref.load %arg4[%153] : memref<35xi32, #tpu.memory_space<smem>>
    %155 = vector.broadcast %150 : i32 to vector<1x16x1xi32>
    %156 = arith.cmpi sge, %2, %155 : vector<1x16x1xi32>
    %157 = vector.broadcast %154 : i32 to vector<1x16x1xi32>
    %158 = arith.cmpi slt, %2, %157 : vector<1x16x1xi32>
    %159 = arith.andi %156, %158 : vector<1x16x1xi1>
    %cst_53 = arith.constant 0xFF800000 : f32
    %160 = vector.shape_cast %159 : vector<1x16x1xi1> to vector<1x16x1xi1>
    %161 = vector.broadcast %160 : vector<1x16x1xi1> to vector<16x16x4xi1>
    %162 = vector.broadcast %cst_53 : f32 to vector<16x16x4xf32>
    %163 = arith.select %161, %1, %162 : vector<16x16x4xi1>, vector<16x16x4xf32>
    %cst_54 = arith.constant dense<0xFF800000> : vector<16x4xf32>
    %164 = vector.multi_reduction <maximumf>, %163, %cst_54 [1] : vector<16x16x4xf32> to vector<16x4xf32>
    %165 = arith.cmpi sgt, %154, %150 : i32
    %cst_55 = arith.constant 0.000000e+00 : f32
    %166 = vector.broadcast %cst_55 : f32 to vector<16x4xf32>
    %167 = arith.select %165, %164, %166 : vector<16x4xf32>
    %c6 = arith.constant 6 : index
    %c0_56 = arith.constant 0 : index
    %c0_57 = arith.constant 0 : index
    %168 = vector.load %arg9[%c6, %c0_56, %c0_57] : memref<7x16x4xf32, #tpu.memory_space<vmem>>, vector<1x16x4xf32>
    %169 = vector.shape_cast %168 : vector<1x16x4xf32> to vector<16x4xf32>
    %170 = vector.shape_cast %167 : vector<16x4xf32> to vector<1x16x4xf32>
    tpu.vector_store %arg9[%c6, %c0_56, %c0_57], %170 {strides = array<i32>} : memref<7x16x4xf32, #tpu.memory_space<vmem>>, vector<1x16x4xf32>,
    %171 = tpu.iota {dimensions = array<i32: 1>} : vector<1x16x1xi32>
    %c7_i32_58 = arith.constant 7 : i32
    %172 = arith.muli %arg1, %c7_i32_58 : i32
    %c0_i32_59 = arith.constant 0 : i32
    %173 = arith.addi %172, %c0_i32_59 : i32
    %174 = arith.index_cast %173 : i32 to index
    %175 = memref.load %arg5[%174] : memref<35xi32, #tpu.memory_space<smem>>
    %c7_i32_60 = arith.constant 7 : i32
    %176 = arith.muli %arg1, %c7_i32_60 : i32
    %c0_i32_61 = arith.constant 0 : i32
    %177 = arith.addi %176, %c0_i32_61 : i32
    %178 = arith.index_cast %177 : i32 to index
    %179 = memref.load %arg6[%178] : memref<35xi32, #tpu.memory_space<smem>>
    %180 = vector.broadcast %175 : i32 to vector<1x16x1xi32>
    %181 = arith.cmpi sge, %171, %180 : vector<1x16x1xi32>
    %182 = vector.broadcast %179 : i32 to vector<1x16x1xi32>
    %183 = arith.cmpi slt, %171, %182 : vector<1x16x1xi32>
    %184 = arith.andi %181, %183 : vector<1x16x1xi1>
    %c0_62 = arith.constant 0 : index
    %c0_63 = arith.constant 0 : index
    %c0_64 = arith.constant 0 : index
    %185 = vector.load %arg9[%c0_62, %c0_63, %c0_64] : memref<7x16x4xf32, #tpu.memory_space<vmem>>, vector<7x16x4xf32>
    %cst_65 = arith.constant 0xFF800000 : f32
    %186 = vector.shape_cast %184 : vector<1x16x1xi1> to vector<1x16x1xi1>
    %187 = vector.broadcast %186 : vector<1x16x1xi1> to vector<7x16x4xi1>
    %188 = vector.broadcast %cst_65 : f32 to vector<7x16x4xf32>
    %189 = arith.select %187, %185, %188 : vector<7x16x4xi1>, vector<7x16x4xf32>
    %cst_66 = arith.constant dense<0xFF800000> : vector<7x4xf32>
    %190 = vector.multi_reduction <maximumf>, %189, %cst_66 [1] : vector<7x16x4xf32> to vector<7x4xf32>
    %191 = arith.cmpi sgt, %179, %175 : i32
    %cst_67 = arith.constant 0.000000e+00 : f32
    %192 = vector.broadcast %cst_67 : f32 to vector<7x4xf32>
    %193 = arith.select %191, %190, %192 : vector<7x4xf32>
    %c0_68 = arith.constant 0 : index
    %c0_69 = arith.constant 0 : index
    %c0_70 = arith.constant 0 : index
    %c0_71 = arith.constant 0 : index
    %194 = vector.load %arg8[%c0_68, %c0_69, %c0_70, %c0_71] : memref<1x7x7x4xf32, #tpu.memory_space<vmem>>, vector<1x1x7x4xf32>
    %195 = vector.shape_cast %194 : vector<1x1x7x4xf32> to vector<7x4xf32>
    %196 = vector.shape_cast %193 : vector<7x4xf32> to vector<1x1x7x4xf32>
    tpu.vector_store %arg8[%c0_68, %c0_69, %c0_70, %c0_71], %196 {strides = array<i32>} : memref<1x7x7x4xf32, #tpu.memory_space<vmem>>, vector<1x1x7x4xf32>,
    %c7_i32_72 = arith.constant 7 : i32
    %197 = arith.muli %arg1, %c7_i32_72 : i32
    %c1_i32_73 = arith.constant 1 : i32
    %198 = arith.addi %197, %c1_i32_73 : i32
    %199 = arith.index_cast %198 : i32 to index
    %200 = memref.load %arg5[%199] : memref<35xi32, #tpu.memory_space<smem>>
    %c7_i32_74 = arith.constant 7 : i32
    %201 = arith.muli %arg1, %c7_i32_74 : i32
    %c1_i32_75 = arith.constant 1 : i32
    %202 = arith.addi %201, %c1_i32_75 : i32
    %203 = arith.index_cast %202 : i32 to index
    %204 = memref.load %arg6[%203] : memref<35xi32, #tpu.memory_space<smem>>
    %205 = vector.broadcast %200 : i32 to vector<1x16x1xi32>
    %206 = arith.cmpi sge, %171, %205 : vector<1x16x1xi32>
    %207 = vector.broadcast %204 : i32 to vector<1x16x1xi32>
    %208 = arith.cmpi slt, %171, %207 : vector<1x16x1xi32>
    %209 = arith.andi %206, %208 : vector<1x16x1xi1>
    %c0_76 = arith.constant 0 : index
    %c0_77 = arith.constant 0 : index
    %c0_78 = arith.constant 0 : index
    %210 = vector.load %arg9[%c0_76, %c0_77, %c0_78] : memref<7x16x4xf32, #tpu.memory_space<vmem>>, vector<7x16x4xf32>
    %cst_79 = arith.constant 0xFF800000 : f32
    %211 = vector.shape_cast %209 : vector<1x16x1xi1> to vector<1x16x1xi1>
    %212 = vector.broadcast %211 : vector<1x16x1xi1> to vector<7x16x4xi1>
    %213 = vector.broadcast %cst_79 : f32 to vector<7x16x4xf32>
    %214 = arith.select %212, %210, %213 : vector<7x16x4xi1>, vector<7x16x4xf32>
    %cst_80 = arith.constant dense<0xFF800000> : vector<7x4xf32>
    %215 = vector.multi_reduction <maximumf>, %214, %cst_80 [1] : vector<7x16x4xf32> to vector<7x4xf32>
    %216 = arith.cmpi sgt, %204, %200 : i32
    %cst_81 = arith.constant 0.000000e+00 : f32
    %217 = vector.broadcast %cst_81 : f32 to vector<7x4xf32>
    %218 = arith.select %216, %215, %217 : vector<7x4xf32>
    %c0_82 = arith.constant 0 : index
    %c1_83 = arith.constant 1 : index
    %c0_84 = arith.constant 0 : index
    %c0_85 = arith.constant 0 : index
    %219 = vector.load %arg8[%c0_82, %c1_83, %c0_84, %c0_85] : memref<1x7x7x4xf32, #tpu.memory_space<vmem>>, vector<1x1x7x4xf32>
    %220 = vector.shape_cast %219 : vector<1x1x7x4xf32> to vector<7x4xf32>
    %221 = vector.shape_cast %218 : vector<7x4xf32> to vector<1x1x7x4xf32>
    tpu.vector_store %arg8[%c0_82, %c1_83, %c0_84, %c0_85], %221 {strides = array<i32>} : memref<1x7x7x4xf32, #tpu.memory_space<vmem>>, vector<1x1x7x4xf32>,
    %c7_i32_86 = arith.constant 7 : i32
    %222 = arith.muli %arg1, %c7_i32_86 : i32
    %c2_i32_87 = arith.constant 2 : i32
    %223 = arith.addi %222, %c2_i32_87 : i32
    %224 = arith.index_cast %223 : i32 to index
    %225 = memref.load %arg5[%224] : memref<35xi32, #tpu.memory_space<smem>>
    %c7_i32_88 = arith.constant 7 : i32
    %226 = arith.muli %arg1, %c7_i32_88 : i32
    %c2_i32_89 = arith.constant 2 : i32
    %227 = arith.addi %226, %c2_i32_89 : i32
    %228 = arith.index_cast %227 : i32 to index
    %229 = memref.load %arg6[%228] : memref<35xi32, #tpu.memory_space<smem>>
    %230 = vector.broadcast %225 : i32 to vector<1x16x1xi32>
    %231 = arith.cmpi sge, %171, %230 : vector<1x16x1xi32>
    %232 = vector.broadcast %229 : i32 to vector<1x16x1xi32>
    %233 = arith.cmpi slt, %171, %232 : vector<1x16x1xi32>
    %234 = arith.andi %231, %233 : vector<1x16x1xi1>
    %c0_90 = arith.constant 0 : index
    %c0_91 = arith.constant 0 : index
    %c0_92 = arith.constant 0 : index
    %235 = vector.load %arg9[%c0_90, %c0_91, %c0_92] : memref<7x16x4xf32, #tpu.memory_space<vmem>>, vector<7x16x4xf32>
    %cst_93 = arith.constant 0xFF800000 : f32
    %236 = vector.shape_cast %234 : vector<1x16x1xi1> to vector<1x16x1xi1>
    %237 = vector.broadcast %236 : vector<1x16x1xi1> to vector<7x16x4xi1>
    %238 = vector.broadcast %cst_93 : f32 to vector<7x16x4xf32>
    %239 = arith.select %237, %235, %238 : vector<7x16x4xi1>, vector<7x16x4xf32>
    %cst_94 = arith.constant dense<0xFF800000> : vector<7x4xf32>
    %240 = vector.multi_reduction <maximumf>, %239, %cst_94 [1] : vector<7x16x4xf32> to vector<7x4xf32>
    %241 = arith.cmpi sgt, %229, %225 : i32
    %cst_95 = arith.constant 0.000000e+00 : f32
    %242 = vector.broadcast %cst_95 : f32 to vector<7x4xf32>
    %243 = arith.select %241, %240, %242 : vector<7x4xf32>
    %c0_96 = arith.constant 0 : index
    %c2_97 = arith.constant 2 : index
    %c0_98 = arith.constant 0 : index
    %c0_99 = arith.constant 0 : index
    %244 = vector.load %arg8[%c0_96, %c2_97, %c0_98, %c0_99] : memref<1x7x7x4xf32, #tpu.memory_space<vmem>>, vector<1x1x7x4xf32>
    %245 = vector.shape_cast %244 : vector<1x1x7x4xf32> to vector<7x4xf32>
    %246 = vector.shape_cast %243 : vector<7x4xf32> to vector<1x1x7x4xf32>
    tpu.vector_store %arg8[%c0_96, %c2_97, %c0_98, %c0_99], %246 {strides = array<i32>} : memref<1x7x7x4xf32, #tpu.memory_space<vmem>>, vector<1x1x7x4xf32>,
    %c7_i32_100 = arith.constant 7 : i32
    %247 = arith.muli %arg1, %c7_i32_100 : i32
    %c3_i32_101 = arith.constant 3 : i32
    %248 = arith.addi %247, %c3_i32_101 : i32
    %249 = arith.index_cast %248 : i32 to index
    %250 = memref.load %arg5[%249] : memref<35xi32, #tpu.memory_space<smem>>
    %c7_i32_102 = arith.constant 7 : i32
    %251 = arith.muli %arg1, %c7_i32_102 : i32
    %c3_i32_103 = arith.constant 3 : i32
    %252 = arith.addi %251, %c3_i32_103 : i32
    %253 = arith.index_cast %252 : i32 to index
    %254 = memref.load %arg6[%253] : memref<35xi32, #tpu.memory_space<smem>>
    %255 = vector.broadcast %250 : i32 to vector<1x16x1xi32>
    %256 = arith.cmpi sge, %171, %255 : vector<1x16x1xi32>
    %257 = vector.broadcast %254 : i32 to vector<1x16x1xi32>
    %258 = arith.cmpi slt, %171, %257 : vector<1x16x1xi32>
    %259 = arith.andi %256, %258 : vector<1x16x1xi1>
    %c0_104 = arith.constant 0 : index
    %c0_105 = arith.constant 0 : index
    %c0_106 = arith.constant 0 : index
    %260 = vector.load %arg9[%c0_104, %c0_105, %c0_106] : memref<7x16x4xf32, #tpu.memory_space<vmem>>, vector<7x16x4xf32>
    %cst_107 = arith.constant 0xFF800000 : f32
    %261 = vector.shape_cast %259 : vector<1x16x1xi1> to vector<1x16x1xi1>
    %262 = vector.broadcast %261 : vector<1x16x1xi1> to vector<7x16x4xi1>
    %263 = vector.broadcast %cst_107 : f32 to vector<7x16x4xf32>
    %264 = arith.select %262, %260, %263 : vector<7x16x4xi1>, vector<7x16x4xf32>
    %cst_108 = arith.constant dense<0xFF800000> : vector<7x4xf32>
    %265 = vector.multi_reduction <maximumf>, %264, %cst_108 [1] : vector<7x16x4xf32> to vector<7x4xf32>
    %266 = arith.cmpi sgt, %254, %250 : i32
    %cst_109 = arith.constant 0.000000e+00 : f32
    %267 = vector.broadcast %cst_109 : f32 to vector<7x4xf32>
    %268 = arith.select %266, %265, %267 : vector<7x4xf32>
    %c0_110 = arith.constant 0 : index
    %c3_111 = arith.constant 3 : index
    %c0_112 = arith.constant 0 : index
    %c0_113 = arith.constant 0 : index
    %269 = vector.load %arg8[%c0_110, %c3_111, %c0_112, %c0_113] : memref<1x7x7x4xf32, #tpu.memory_space<vmem>>, vector<1x1x7x4xf32>
    %270 = vector.shape_cast %269 : vector<1x1x7x4xf32> to vector<7x4xf32>
    %271 = vector.shape_cast %268 : vector<7x4xf32> to vector<1x1x7x4xf32>
    tpu.vector_store %arg8[%c0_110, %c3_111, %c0_112, %c0_113], %271 {strides = array<i32>} : memref<1x7x7x4xf32, #tpu.memory_space<vmem>>, vector<1x1x7x4xf32>,
    %c7_i32_114 = arith.constant 7 : i32
    %272 = arith.muli %arg1, %c7_i32_114 : i32
    %c4_i32_115 = arith.constant 4 : i32
    %273 = arith.addi %272, %c4_i32_115 : i32
    %274 = arith.index_cast %273 : i32 to index
    %275 = memref.load %arg5[%274] : memref<35xi32, #tpu.memory_space<smem>>
    %c7_i32_116 = arith.constant 7 : i32
    %276 = arith.muli %arg1, %c7_i32_116 : i32
    %c4_i32_117 = arith.constant 4 : i32
    %277 = arith.addi %276, %c4_i32_117 : i32
    %278 = arith.index_cast %277 : i32 to index
    %279 = memref.load %arg6[%278] : memref<35xi32, #tpu.memory_space<smem>>
    %280 = vector.broadcast %275 : i32 to vector<1x16x1xi32>
    %281 = arith.cmpi sge, %171, %280 : vector<1x16x1xi32>
    %282 = vector.broadcast %279 : i32 to vector<1x16x1xi32>
    %283 = arith.cmpi slt, %171, %282 : vector<1x16x1xi32>
    %284 = arith.andi %281, %283 : vector<1x16x1xi1>
    %c0_118 = arith.constant 0 : index
    %c0_119 = arith.constant 0 : index
    %c0_120 = arith.constant 0 : index
    %285 = vector.load %arg9[%c0_118, %c0_119, %c0_120] : memref<7x16x4xf32, #tpu.memory_space<vmem>>, vector<7x16x4xf32>
    %cst_121 = arith.constant 0xFF800000 : f32
    %286 = vector.shape_cast %284 : vector<1x16x1xi1> to vector<1x16x1xi1>
    %287 = vector.broadcast %286 : vector<1x16x1xi1> to vector<7x16x4xi1>
    %288 = vector.broadcast %cst_121 : f32 to vector<7x16x4xf32>
    %289 = arith.select %287, %285, %288 : vector<7x16x4xi1>, vector<7x16x4xf32>
    %cst_122 = arith.constant dense<0xFF800000> : vector<7x4xf32>
    %290 = vector.multi_reduction <maximumf>, %289, %cst_122 [1] : vector<7x16x4xf32> to vector<7x4xf32>
    %291 = arith.cmpi sgt, %279, %275 : i32
    %cst_123 = arith.constant 0.000000e+00 : f32
    %292 = vector.broadcast %cst_123 : f32 to vector<7x4xf32>
    %293 = arith.select %291, %290, %292 : vector<7x4xf32>
    %c0_124 = arith.constant 0 : index
    %c4_125 = arith.constant 4 : index
    %c0_126 = arith.constant 0 : index
    %c0_127 = arith.constant 0 : index
    %294 = vector.load %arg8[%c0_124, %c4_125, %c0_126, %c0_127] : memref<1x7x7x4xf32, #tpu.memory_space<vmem>>, vector<1x1x7x4xf32>
    %295 = vector.shape_cast %294 : vector<1x1x7x4xf32> to vector<7x4xf32>
    %296 = vector.shape_cast %293 : vector<7x4xf32> to vector<1x1x7x4xf32>
    tpu.vector_store %arg8[%c0_124, %c4_125, %c0_126, %c0_127], %296 {strides = array<i32>} : memref<1x7x7x4xf32, #tpu.memory_space<vmem>>, vector<1x1x7x4xf32>,
    %c7_i32_128 = arith.constant 7 : i32
    %297 = arith.muli %arg1, %c7_i32_128 : i32
    %c5_i32_129 = arith.constant 5 : i32
    %298 = arith.addi %297, %c5_i32_129 : i32
    %299 = arith.index_cast %298 : i32 to index
    %300 = memref.load %arg5[%299] : memref<35xi32, #tpu.memory_space<smem>>
    %c7_i32_130 = arith.constant 7 : i32
    %301 = arith.muli %arg1, %c7_i32_130 : i32
    %c5_i32_131 = arith.constant 5 : i32
    %302 = arith.addi %301, %c5_i32_131 : i32
    %303 = arith.index_cast %302 : i32 to index
    %304 = memref.load %arg6[%303] : memref<35xi32, #tpu.memory_space<smem>>
    %305 = vector.broadcast %300 : i32 to vector<1x16x1xi32>
    %306 = arith.cmpi sge, %171, %305 : vector<1x16x1xi32>
    %307 = vector.broadcast %304 : i32 to vector<1x16x1xi32>
    %308 = arith.cmpi slt, %171, %307 : vector<1x16x1xi32>
    %309 = arith.andi %306, %308 : vector<1x16x1xi1>
    %c0_132 = arith.constant 0 : index
    %c0_133 = arith.constant 0 : index
    %c0_134 = arith.constant 0 : index
    %310 = vector.load %arg9[%c0_132, %c0_133, %c0_134] : memref<7x16x4xf32, #tpu.memory_space<vmem>>, vector<7x16x4xf32>
    %cst_135 = arith.constant 0xFF800000 : f32
    %311 = vector.shape_cast %309 : vector<1x16x1xi1> to vector<1x16x1xi1>
    %312 = vector.broadcast %311 : vector<1x16x1xi1> to vector<7x16x4xi1>
    %313 = vector.broadcast %cst_135 : f32 to vector<7x16x4xf32>
    %314 = arith.select %312, %310, %313 : vector<7x16x4xi1>, vector<7x16x4xf32>
    %cst_136 = arith.constant dense<0xFF800000> : vector<7x4xf32>
    %315 = vector.multi_reduction <maximumf>, %314, %cst_136 [1] : vector<7x16x4xf32> to vector<7x4xf32>
    %316 = arith.cmpi sgt, %304, %300 : i32
    %cst_137 = arith.constant 0.000000e+00 : f32
    %317 = vector.broadcast %cst_137 : f32 to vector<7x4xf32>
    %318 = arith.select %316, %315, %317 : vector<7x4xf32>
    %c0_138 = arith.constant 0 : index
    %c5_139 = arith.constant 5 : index
    %c0_140 = arith.constant 0 : index
    %c0_141 = arith.constant 0 : index
    %319 = vector.load %arg8[%c0_138, %c5_139, %c0_140, %c0_141] : memref<1x7x7x4xf32, #tpu.memory_space<vmem>>, vector<1x1x7x4xf32>
    %320 = vector.shape_cast %319 : vector<1x1x7x4xf32> to vector<7x4xf32>
    %321 = vector.shape_cast %318 : vector<7x4xf32> to vector<1x1x7x4xf32>
    tpu.vector_store %arg8[%c0_138, %c5_139, %c0_140, %c0_141], %321 {strides = array<i32>} : memref<1x7x7x4xf32, #tpu.memory_space<vmem>>, vector<1x1x7x4xf32>,
    %c7_i32_142 = arith.constant 7 : i32
    %322 = arith.muli %arg1, %c7_i32_142 : i32
    %c6_i32_143 = arith.constant 6 : i32
    %323 = arith.addi %322, %c6_i32_143 : i32
    %324 = arith.index_cast %323 : i32 to index
    %325 = memref.load %arg5[%324] : memref<35xi32, #tpu.memory_space<smem>>
    %c7_i32_144 = arith.constant 7 : i32
    %326 = arith.muli %arg1, %c7_i32_144 : i32
    %c6_i32_145 = arith.constant 6 : i32
    %327 = arith.addi %326, %c6_i32_145 : i32
    %328 = arith.index_cast %327 : i32 to index
    %329 = memref.load %arg6[%328] : memref<35xi32, #tpu.memory_space<smem>>
    %330 = vector.broadcast %325 : i32 to vector<1x16x1xi32>
    %331 = arith.cmpi sge, %171, %330 : vector<1x16x1xi32>
    %332 = vector.broadcast %329 : i32 to vector<1x16x1xi32>
    %333 = arith.cmpi slt, %171, %332 : vector<1x16x1xi32>
    %334 = arith.andi %331, %333 : vector<1x16x1xi1>
    %c0_146 = arith.constant 0 : index
    %c0_147 = arith.constant 0 : index
    %c0_148 = arith.constant 0 : index
    %335 = vector.load %arg9[%c0_146, %c0_147, %c0_148] : memref<7x16x4xf32, #tpu.memory_space<vmem>>, vector<7x16x4xf32>
    %cst_149 = arith.constant 0xFF800000 : f32
    %336 = vector.shape_cast %334 : vector<1x16x1xi1> to vector<1x16x1xi1>
    %337 = vector.broadcast %336 : vector<1x16x1xi1> to vector<7x16x4xi1>
    %338 = vector.broadcast %cst_149 : f32 to vector<7x16x4xf32>
    %339 = arith.select %337, %335, %338 : vector<7x16x4xi1>, vector<7x16x4xf32>
    %cst_150 = arith.constant dense<0xFF800000> : vector<7x4xf32>
    %340 = vector.multi_reduction <maximumf>, %339, %cst_150 [1] : vector<7x16x4xf32> to vector<7x4xf32>
    %341 = arith.cmpi sgt, %329, %325 : i32
    %cst_151 = arith.constant 0.000000e+00 : f32
    %342 = vector.broadcast %cst_151 : f32 to vector<7x4xf32>
    %343 = arith.select %341, %340, %342 : vector<7x4xf32>
    %c0_152 = arith.constant 0 : index
    %c6_153 = arith.constant 6 : index
    %c0_154 = arith.constant 0 : index
    %c0_155 = arith.constant 0 : index
    %344 = vector.load %arg8[%c0_152, %c6_153, %c0_154, %c0_155] : memref<1x7x7x4xf32, #tpu.memory_space<vmem>>, vector<1x1x7x4xf32>
    %345 = vector.shape_cast %344 : vector<1x1x7x4xf32> to vector<7x4xf32>
    %346 = vector.shape_cast %343 : vector<7x4xf32> to vector<1x1x7x4xf32>
    tpu.vector_store %arg8[%c0_152, %c6_153, %c0_154, %c0_155], %346 {strides = array<i32>} : memref<1x7x7x4xf32, #tpu.memory_space<vmem>>, vector<1x1x7x4xf32>,
    return
  }
  func.func @transform_0(%arg0: i32, %arg1: i32, %arg2: memref<5xi32, #tpu.memory_space<smem>>, %arg3: memref<35xi32, #tpu.memory_space<smem>>, %arg4: memref<35xi32, #tpu.memory_space<smem>>, %arg5: memref<35xi32, #tpu.memory_space<smem>>, %arg6: memref<35xi32, #tpu.memory_space<smem>>) -> (i32, i32, i32, i32) {
    %0 = arith.index_cast %arg1 : i32 to index
    %1 = memref.load %arg2[%0] : memref<5xi32, #tpu.memory_space<smem>>
    %c0_i32 = arith.constant 0 : i32
    %c0_i32_0 = arith.constant 0 : i32
    %c0_i32_1 = arith.constant 0 : i32
    return %1, %c0_i32, %c0_i32_0, %arg0 : i32, i32, i32, i32
  }
  func.func @transform_1(%arg0: i32, %arg1: i32, %arg2: memref<5xi32, #tpu.memory_space<smem>>, %arg3: memref<35xi32, #tpu.memory_space<smem>>, %arg4: memref<35xi32, #tpu.memory_space<smem>>, %arg5: memref<35xi32, #tpu.memory_space<smem>>, %arg6: memref<35xi32, #tpu.memory_space<smem>>) -> (i32, i32, i32, i32) {
    %c0_i32 = arith.constant 0 : i32
    %c0_i32_0 = arith.constant 0 : i32
    %c0_i32_1 = arith.constant 0 : i32
    return %arg1, %c0_i32, %c0_i32_0, %arg0 : i32, i32, i32, i32
  }
}

</mosaic_0001>

<bundles_post_ra>
// kernel: tpu_custom_call.1
= control target key start
LH: loop header
LB: loop body
LE: loop exit
PB: predicated region body
PF: predicated region fallthrough
CT: control target
= control target key end

     0   :  { %s3156_s27 = smov [#allocation4]   ;;  %s3157_s28 = smov [#allocation5]   ;;  %s6683_s0 = inlined_call_operand.vmem [shape: s32[5], index: 0, kind: input, shape index: {}]   ;;  %s6684_s5 = inlined_call_operand.vmem [shape: f32[2,16,16,4], index: 5, kind: input, shape index: {}]   ;;  %s6685_s6 = inlined_call_operand.vmem [shape: f32[5,7,7,4], index: 6, kind: output, shape index: {}]   ;;  %s6686_s1 = inlined_call_operand.vmem [shape: s32[35], index: 1, kind: input, shape index: {}]   ;;  %s6687_s2 = inlined_call_operand.vmem [shape: s32[35], index: 2, kind: input, shape index: {}]   ;;  %s6688_s3 = inlined_call_operand.vmem [shape: s32[35], index: 3, kind: input, shape index: {}]   ;;  %s6689_s4 = inlined_call_operand.vmem [shape: s32[35], index: 4, kind: input, shape index: {}]  }
   0x1   :  { %s12_s23 = sshll.u32 %s6683_s0, 4  ;;  %s17_s26 = sshll.u32 %s6686_s1, 4  ;;  %s13_s23 = int_to_ptr.vmem [resolvable:$true] %s12_s23  ;;  %s18_s26 = int_to_ptr.vmem [resolvable:$true] %s17_s26 }
   0x2   :  { %15 = dma.vmem_to_smem %s13_s23, 16, %s3156_s27, [#allocation3] }
   0x3   :  { %20 = dma.vmem_to_smem %s18_s26, 16, %s3157_s28, [#allocation3] }
   0x4   :  { %s22_s7 = sshll.u32 %s6687_s2, 4  ;;  %s27_s10 = sshll.u32 %s6688_s3, 4  ;;  %s23_s7 = int_to_ptr.vmem [resolvable:$true] %s22_s7  ;;  %s28_s10 = int_to_ptr.vmem [resolvable:$true] %s27_s10 }
   0x5   :  { %s3158_s0 = smov [#allocation6]   ;;  %s3159_s11 = smov [#allocation7]  }
   0x6   :  { %25 = dma.vmem_to_smem %s23_s7, 16, %s3158_s0, [#allocation3] }
   0x7   :  { %30 = dma.vmem_to_smem %s28_s10, 16, %s3159_s11, [#allocation3] }
   0x8   :  { %s32_s13 = sshll.u32 %s6689_s4, 4  ;;  %s3160_s14 = smov [#allocation8]   ;;  %s33_s13 = int_to_ptr.vmem [resolvable:$true] %s32_s13 }
   0x9   :  { %35 = dma.vmem_to_smem %s33_s13, 16, %s3160_s14, [#allocation3] }
   0xa   :  { %3142 = dma.done.wait [#allocation3], 80 }
   0xb   :  { %3143 = vsyncadd [#allocation3], 4294967216 }
   0xc   :  { %38 = sfence }
   0xd   :  { %s3211_s2 = smov 0   ;;  %s3213_s15 = smov 0  }
   0xe   :  { %s3215_s3 = smov 0  }
   0xf LB: > { %s53_s4 = sadd.s32 1, %s3150_s15  ;;  %p2963_p0 = scmp.ge.s32.totalorder %s3154_s3, 1  ;;  %s3154_s3 = sphi %s3215_s3, %s44_s3   ;;  %s3150_s15 = sphi %s3213_s15, %s6986_s15   ;;  %s3146_s2 = sphi %s3211_s2, %s6985_s2  }
  0x10   : > { %p54_p1 = scmp.ge.s32.totalorder %s53_s4, 5  ;;  %p143_p2 = scmp.lt.s32.totalorder %s3154_s3, 6 }
  0x12   : > { %s6988_s4 = smov (%p54_p1, %s53_s4), 0  ;;  %p144_p3 = pnand %p2963_p0, %p143_p2 }
  0x14   : > { %147 = sbr.rel (%p144_p3) target bundleno = 597 (0x255), region = 24 }
  0x19   : > { %s170_s16 = sld [smem:[#allocation4 + %s3146_s2]]  ;;  %s3233_s17 = smul.u32 7, %s3146_s2  ;;  %v220_v0 = vlaneseq  ;;  %vm270_vm5 = vcmask 31744   ;;  %vm451_vm10 = vcmask 1041409   ;;  %vm453_vm11 = vcmask 1042434  }
  0x1a   : > { %vm455_vm12 = vcmask 1043459   ;;  %vm457_vm13 = vcmask 1044484   ;;  %vm459_vm14 = vcmask 1045509   ;;  %vm461_vm15 = vcmask 1046534   ;;  %p180_p13 = scmp.lt.s32.totalorder %s3146_s2, 4 }
  0x1b   : > { %s3236_s18 = sld [smem:[#allocation5 + %s3233_s17]]  ;;  %s3242_s20 = sadd.s32 1, %s3233_s17  ;;  %v3244_v1 = vshrl.u32 %v220_v0, 7 }
  0x1c   : > { %s3239_s19 = sld [smem:[#allocation6 + %s3233_s17]]  ;;  %s3626_s28 = sadd.s32 2, %s3233_s17 }
  0x1d   : > { %s3247_s22 = sld [smem:[#allocation5 + %s3242_s20]]  ;;  %v3258_v2 = vadd.s32 8, %v3244_v1  ;;  %s3935_s8 = sadd.s32 3, %s3233_s17 }
  0x1e   : > { %s3250_s23 = sld [smem:[#allocation6 + %s3242_s20]]  ;;  %s4244_s0 = sadd.s32 4, %s3233_s17 }
  0x1f   : > { %p171_p4 = scmp.lt.s32.totalorder %s170_s16, 1  ;;  %s3654_s29 = sld [smem:[#allocation5 + %s3626_s28]] }
  0x20   : > { %s3912_s30 = sld [smem:[#allocation6 + %s3626_s28]]  ;;  %s4669_s14 = sadd.s32 5, %s3233_s17 }
  0x21   : > { %s6990_s16 = smov (!%p171_p4, %s170_s16), 1  ;;  %v226_v3 = vstv %s3236_s18  ;;  %s3950_s9 = sld [smem:[#allocation5 + %s3935_s8]] }
  0x22   : > { %s2975_s21 = sshll.u32 %s6990_s16, 8  ;;  %v229_v4 = vstv %s3239_s19  ;;  %vm3287_vm0 = vcmp.ge.s32.totalorder %v3244_v1, %v226_v3  ;;  %vm3309_vm2 = vcmp.ge.s32.totalorder %v3258_v2, %v226_v3  ;;  %p415_p5 = scmp.gt.s32.totalorder %s3239_s19, %s3236_s18 }
  0x23   : > { %s3255_s26 = scalar_lea.vmem %s6684_s5, %s2975_s21  ;;  %vm3292_vm1 = vcmp.lt.s32.totalorder %v3244_v1, %v229_v4  ;;  %vm3314_vm3 = vcmp.lt.s32.totalorder %v3258_v2, %v229_v4  ;;  %s4250_s11 = sld [smem:[#allocation6 + %s3935_s8]] }
  0x24   : > { %v3263_v5 = vld [vmem:[%s3255_s26] sm:$0xff]  ;;  %v3266_v6 = vld [vmem:[%s3255_s26 + $0x10] sm:$0xff]  ;;  %v3272_v8 = vld [vmem:[%s3255_s26 + $0x8] sm:$0xff]  ;;  %s416_s27 = scalar_select %p415_p5, 1, 0 }
  0x25   : > { %v3269_v7 = vld [vmem:[%s3255_s26 + $0x20] sm:$0xff]  ;;  %v3275_v9 = vld [vmem:[%s3255_s26 + $0x18] sm:$0xff]  ;;  %v3278_v10 = vld [vmem:[%s3255_s26 + $0x28] sm:$0xff]  ;;  %p667_p6 = scmp.gt.s32.totalorder %s3250_s23, %s3247_s22  ;;  %s4268_s1 = sld [smem:[#allocation5 + %s4244_s0]] }
  0x26   : > { %v3281_v11 = vld [vmem:[%s3255_s26 + $0x30] sm:$0xff]  ;;  %v3284_v12 = vld [vmem:[%s3255_s26 + $0x38] sm:$0xff]  ;;  %v3297_v15 = vld [vmem:[%s3255_s26 + $0x40] sm:$0xff]  ;;  %p913_p7 = scmp.gt.s32.totalorder %s3912_s30, %s3654_s29  ;;  %s4646_s12 = sld [smem:[#allocation6 + %s4244_s0]] }
  0x27   : > { %v3300_v16 = vld [vmem:[%s3255_s26 + $0x48] sm:$0xff]  ;;  %v3303_v17 = vld [vmem:[%s3255_s26 + $0x50] sm:$0xff]  ;;  %v3306_v18 = vld [vmem:[%s3255_s26 + $0x58] sm:$0xff]  ;;  %s668_s7 = scalar_select %p667_p6, 1, 0 }
  0x28   : > { %6723 = vst [vmem:[#allocation10_spill] sm:$0xff] %v3306_v18  ;;  %v3319_v21 = vld [vmem:[%s3255_s26 + $0x60] sm:$0xff]  ;;  %v3322_v22 = vld [vmem:[%s3255_s26 + $0x68] sm:$0xff]  ;;  %v3325_v23 = vld [vmem:[%s3255_s26 + $0x70] sm:$0xff]  ;;  %s914_s10 = scalar_select %p913_p7, 1, 0 }
  0x29   : > { %6728 = vst [vmem:[#allocation11_spill] sm:$0xff] %v3319_v21  ;;  %v3328_v24 = vld [vmem:[%s3255_s26 + $0x78] sm:$0xff]  ;;  %v3331_v25 = vld [vmem:[%s3255_s26 + $0x80] sm:$0xff]  ;;  %v3334_v26 = vld [vmem:[%s3255_s26 + $0x88] sm:$0xff]  ;;  %p1159_p8 = scmp.gt.s32.totalorder %s4250_s11, %s3950_s9  ;;  %s4684_s16 = sld [smem:[#allocation5 + %s4669_s14]] }
  0x2a   : > { %6729 = vst [vmem:[#allocation12_spill] sm:$0xff] %v3322_v22  ;;  %v3337_v27 = vld [vmem:[%s3255_s26 + $0x90] sm:$0xff]  ;;  %v3340_v28 = vld [vmem:[%s3255_s26 + $0x98] sm:$0xff]  ;;  %vm3346_vm4 = vmand %vm3287_vm0, %vm3292_vm1  ;;  %vm463_vm0 = vcmask 1047559   ;;  %s4981_s19 = sld [smem:[#allocation6 + %s4669_s14]]  ;;  %s4984_s21 = sadd.s32 6, %s3233_s17 }
  0x2b   : > { %6730 = vst [vmem:[#allocation13_spill] sm:$0xff] %v3325_v23  ;;  %v3353_v32 = vld [vmem:[%s3255_s26 + $0xa0] sm:$0xff]  ;;  %v3356_v33 = vld [vmem:[%s3255_s26 + $0xa8] sm:$0xff]  ;;  %v3359_v34 = vld [vmem:[%s3255_s26 + $0xb0] sm:$0xff]  ;;  %v238_v37 = vsel %vm3346_vm4, %v3263_v5, -inf  ;;  %v240_v38 = vsel %vm3346_vm4, %v3266_v6, -inf }
  0x2c   : > { %6731 = vst [vmem:[#allocation14_spill] sm:$0xff] %v3328_v24  ;;  %v3362_v35 = vld [vmem:[%s3255_s26 + $0xb8] sm:$0xff]  ;;  %vm3368_vm6 = vmand %vm3309_vm2, %vm3314_vm3  ;;  %v242_v39 = vsel %vm3346_vm4, %v3269_v7, -inf  ;;  %v244_v40 = vsel %vm3346_vm4, %v3281_v11, -inf  ;;  %v3385_v41 = vld [vmem:[%s3255_s26 + $0xc0] sm:$0xff]  ;;  %v246_v49 = vsel %vm3346_vm4, %v3297_v15, -inf  ;;  %p1405_p9 = scmp.gt.s32.totalorder %s4646_s12, %s4268_s1 }
  0x2d   : > { %v3388_v42 = vld [vmem:[%s3255_s26 + $0xc8] sm:$0xff]  ;;  %v239_v43 = vsel %vm3368_vm6, %v3272_v8, -inf  ;;  %v241_v44 = vsel %vm3368_vm6, %v3275_v9, -inf  ;;  %v243_v45 = vsel %vm3368_vm6, %v3278_v10, -inf  ;;  %v245_v46 = vsel %vm3368_vm6, %v3284_v12, -inf  ;;  %v3403_v47 = vld [vmem:[%s3255_s26 + $0xd0] sm:$0xff] }
  0x2e   : > { %v3406_v48 = vld [vmem:[%s3255_s26 + $0xd8] sm:$0xff]  ;;  %v247_v50 = vsel %vm3368_vm6, %v3300_v16, -inf  ;;  %v248_v51 = vsel %vm3346_vm4, %v3303_v17, -inf  ;;  %v249_v52 = vsel %vm3368_vm6, %v3306_v18, -inf  ;;  %v3421_v53 = vld [vmem:[%s3255_s26 + $0xe0] sm:$0xff]  ;;  %v3424_v54 = vld [vmem:[%s3255_s26 + $0xe8] sm:$0xff] }
  0x2f   : > { %6736 = vst [vmem:[#allocation15_spill] sm:$0xff] %v3421_v53  ;;  %v250_v55 = vsel %vm3346_vm4, %v3319_v21, -inf  ;;  %v251_v56 = vsel %vm3368_vm6, %v3322_v22, -inf  ;;  %v252_v57 = vsel %vm3346_vm4, %v3325_v23, -inf  ;;  %v253_v58 = vsel %vm3368_vm6, %v3328_v24, -inf  ;;  %v3439_v59 = vld [vmem:[%s3255_s26 + $0xf0] sm:$0xff] }
  0x30   : > { %6737 = vst [vmem:[#allocation16_spill] sm:$0xff] %v3439_v59  ;;  %v3442_v60 = vld [vmem:[%s3255_s26 + $0xf8] sm:$0xff]  ;;  %v271_v13 = vsel %vm270_vm5, %v238_v37, -inf  ;;  %v272_v30 = vsel %vm270_vm5, %v239_v43, -inf  ;;  %v280_v4 = vsel %vm270_vm5, %v240_v38, -inf  ;;  %v281_v14 = vsel %vm270_vm5, %v241_v44, -inf  ;;  %p1651_p10 = scmp.gt.s32.totalorder %s4981_s19, %s4684_s16 }
  0x31   : > { %v273_v3 = vmax.f32 %v271_v13, %v272_v30  ;;  %v282_v0 = vmax.f32 %v280_v4, %v281_v14  ;;  %v289_v19 = vsel %vm270_vm5, %v242_v39, -inf  ;;  %v290_v63 = vsel %vm270_vm5, %v243_v45, -inf  ;;  %s1160_s13 = scalar_select %p1159_p8, 1, 0 }
  0x32   : > { %v291_v62 = vmax.f32 %v289_v19, %v290_v63  ;;  %v298_v20 = vsel %vm270_vm5, %v244_v40, -inf  ;;  %v299_v61 = vsel %vm270_vm5, %v245_v46, -inf  ;;  %v307_v31 = vsel %vm270_vm5, %v246_v49, -inf  ;;  %s1406_s18 = scalar_select %p1405_p9, 1, 0 }
  0x33   : > { %v274_v37 = vrot.slane %v273_v3, 4  ;;  %v283_v24 = vrot.slane %v282_v0, 4  ;;  %v300_v43 = vmax.f32 %v298_v20, %v299_v61  ;;  %v308_v38 = vsel %vm270_vm5, %v247_v50, -inf  ;;  %s1652_s24 = scalar_select %p1651_p10, 1, 0 }
  0x34   : > { %v292_v23 = vrot.slane %v291_v62, 4  ;;  %v309_v44 = vmax.f32 %v307_v31, %v308_v38  ;;  %v316_v30 = vsel %vm270_vm5, %v248_v51, -inf  ;;  %v317_v39 = vsel %vm270_vm5, %v249_v52, -inf  ;;  %s6992_s2 = smov (!%p180_p13, %s3146_s2), 4 }
  0x35   : > { %v275_v4 = vmax.f32 %v273_v3, %v274_v37  ;;  %v284_v45 = vmax.f32 %v282_v0, %v283_v24  ;;  %v301_v63 = vrot.slane %v300_v43, 4  ;;  %v318_v13 = vmax.f32 %v316_v30, %v317_v39 }
  0x36   : > { %v293_v40 = vmax.f32 %v291_v62, %v292_v23  ;;  %v310_v14 = vrot.slane %v309_v44, 4  ;;  %v325_v46 = vsel %vm270_vm5, %v250_v55, -inf  ;;  %v326_v49 = vsel %vm270_vm5, %v251_v56, -inf }
  0x37   : > { %v276_v19 = vrot.slane %v275_v4, 2  ;;  %v285_v61 = vrot.slane %v284_v45, 2  ;;  %v302_v20 = vmax.f32 %v300_v43, %v301_v63  ;;  %v319_v50 = vrot.slane %v318_v13, 4 }
  0x38   : > { %v294_v22 = vrot.slane %v293_v40, 2  ;;  %v311_v31 = vmax.f32 %v309_v44, %v310_v14  ;;  %v327_v38 = vmax.f32 %v325_v46, %v326_v49  ;;  %v334_v51 = vsel %vm270_vm5, %v252_v57, -inf }
  0x39   : > { %v277_v52 = vmax.f32 %v275_v4, %v276_v19  ;;  %v286_v3 = vmax.f32 %v284_v45, %v285_v61  ;;  %v303_v24 = vrot.slane %v302_v20, 2  ;;  %v320_v0 = vmax.f32 %v318_v13, %v319_v50 }
  0x3a   : > { %v295_v37 = vmax.f32 %v293_v40, %v294_v22  ;;  %v312_v23 = vrot.slane %v311_v31, 2  ;;  %v328_v62 = vrot.slane %v327_v38, 4  ;;  %v335_v55 = vsel %vm270_vm5, %v253_v58, -inf }
  0x3b   : > { %v278_v30 = vrot.slane %v277_v52, 1  ;;  %v287_v56 = vrot.slane %v286_v3, 1  ;;  %v304_v39 = vmax.f32 %v302_v20, %v303_v24  ;;  %v321_v21 = vrot.slane %v320_v0, 2 }
  0x3c   : > { %v296_v43 = vrot.slane %v295_v37, 1  ;;  %v313_v63 = vmax.f32 %v311_v31, %v312_v23  ;;  %v329_v18 = vmax.f32 %v327_v38, %v328_v62  ;;  %v336_v44 = vmax.f32 %v334_v51, %v335_v55 }
  0x3d   : > { %v3508_v14 = vmax.f32 %v277_v52, %v278_v30  ;;  %v3510_v57 = vmax.f32 %v286_v3, %v287_v56  ;;  %v305_v4 = vrot.slane %v304_v39, 1  ;;  %v322_v45 = vmax.f32 %v320_v0, %v321_v21 }
  0x3e   : > { %v3512_v13 = vmax.f32 %v295_v37, %v296_v43  ;;  %v314_v22 = vrot.slane %v313_v63, 1  ;;  %v330_v40 = vrot.slane %v329_v18, 2  ;;  %v337_v46 = vrot.slane %v336_v44, 4 }
  0x3f   : > { %v3514_v58 = vmax.f32 %v304_v39, %v305_v4  ;;  %v323_v49 = vrot.slane %v322_v45, 1  ;;  %v6738_v19 = vsel %vm3346_vm4, %v3331_v25, -inf  ;;  %v6739_v20 = vsel %vm3368_vm6, %v3334_v26, -inf }
  0x40   : > { %v343_v61 = vsel %vm270_vm5, %v6738_v19, -inf  ;;  %v344_v21 = vsel %vm270_vm5, %v6739_v20, -inf  ;;  %v3526_v50 = vmax.f32 %v313_v63, %v314_v22  ;;  %v331_v31 = vmax.f32 %v329_v18, %v330_v40 }
  0x41   : > { %v338_v38 = vmax.f32 %v336_v44, %v337_v46  ;;  %v345_v51 = vmax.f32 %v343_v61, %v344_v21  ;;  %v3528_v52 = vmax.f32 %v322_v45, %v323_v49  ;;  %v6740_v3 = vsel %vm3346_vm4, %v3337_v27, -inf }
  0x42   : > { %v352_v24 = vsel %vm270_vm5, %v6740_v3, -inf  ;;  %v6741_v0 = vsel %vm3368_vm6, %v3340_v28, -inf  ;;  %v6742_v18 = vsel %vm3346_vm4, %v3353_v32, -inf  ;;  %v332_v62 = vrot.slane %v331_v31, 1 }
  0x43   : > { %v353_v37 = vsel %vm270_vm5, %v6741_v0, -inf  ;;  %v361_v23 = vsel %vm270_vm5, %v6742_v18, -inf  ;;  %v339_v55 = vrot.slane %v338_v38, 2  ;;  %v346_v30 = vrot.slane %v345_v51, 4 }
  0x44   : > { %v354_v56 = vmax.f32 %v352_v24, %v353_v37  ;;  %v6743_v39 = vsel %vm3368_vm6, %v3356_v33, -inf  ;;  %v6744_v63 = vsel %vm3346_vm4, %v3359_v34, -inf  ;;  %v6745_v4 = vsel %vm3368_vm6, %v3362_v35, -inf }
  0x45   : > { %v362_v43 = vsel %vm270_vm5, %v6743_v39, -inf  ;;  %v370_v44 = vsel %vm270_vm5, %v6744_v63, -inf  ;;  %v371_v45 = vsel %vm270_vm5, %v6745_v4, -inf  ;;  %v6746_v22 = vsel %vm3346_vm4, %v3385_v41, -inf }
  0x46   : > { %v379_v40 = vsel %vm270_vm5, %v6746_v22, -inf  ;;  %v3565_v46 = vmax.f32 %v331_v31, %v332_v62  ;;  %v340_v49 = vmax.f32 %v338_v38, %v339_v55  ;;  %v347_v19 = vmax.f32 %v345_v51, %v346_v30 }
  0x47   : > { %v355_v61 = vrot.slane %v354_v56, 4  ;;  %v363_v20 = vmax.f32 %v361_v23, %v362_v43  ;;  %v372_v21 = vmax.f32 %v370_v44, %v371_v45  ;;  %v6747_v3 = vsel %vm3368_vm6, %v3388_v42, -inf }
  0x48   : > { %v380_v24 = vsel %vm270_vm5, %v6747_v3, -inf  ;;  %v6748_v0 = vsel %vm3346_vm4, %v3403_v47, -inf  ;;  %v341_v37 = vrot.slane %v340_v49, 1  ;;  %v348_v18 = vrot.slane %v347_v19, 2 }
  0x49   : > { %v388_v31 = vsel %vm270_vm5, %v6748_v0, -inf  ;;  %v356_v62 = vmax.f32 %v354_v56, %v355_v61  ;;  %v381_v38 = vmax.f32 %v379_v40, %v380_v24  ;;  %v364_v51 = vrot.slane %v363_v20, 4 }
  0x4a   : > { %v373_v55 = vrot.slane %v372_v21, 4  ;;  %v6749_v23 = vsel %vm3368_vm6, %v3406_v48, -inf  ;;  %v6750_v39 = vsel %vm3346_vm4, %v3421_v53, -inf  ;;  %v3589_v63 = vmax.f32 %v340_v49, %v341_v37 }
  0x4b   : > { %v389_v30 = vsel %vm270_vm5, %v6749_v23, -inf  ;;  %v397_v43 = vsel %vm270_vm5, %v6750_v39, -inf  ;;  %v349_v56 = vmax.f32 %v347_v19, %v348_v18  ;;  %v357_v44 = vrot.slane %v356_v62, 2 }
  0x4c   : > { %v382_v4 = vrot.slane %v381_v38, 4  ;;  %v365_v45 = vmax.f32 %v363_v20, %v364_v51  ;;  %v374_v22 = vmax.f32 %v372_v21, %v373_v55  ;;  %v390_v40 = vmax.f32 %v388_v31, %v389_v30 }
  0x4d   : > { %v6751_v61 = vsel %vm3368_vm6, %v3424_v54, -inf  ;;  %v350_v24 = vrot.slane %v349_v56, 1  ;;  %v358_v0 = vmax.f32 %v356_v62, %v357_v44  ;;  %v6752_v19 = vsel %vm3346_vm4, %v3439_v59, -inf }
  0x4e   : > { %v398_v3 = vsel %vm270_vm5, %v6751_v61, -inf  ;;  %v383_v23 = vmax.f32 %v381_v38, %v382_v4  ;;  %v366_v49 = vrot.slane %v365_v45, 2  ;;  %v375_v37 = vrot.slane %v374_v22, 2 }
  0x4f   : > { %v399_v39 = vmax.f32 %v397_v43, %v398_v3  ;;  %v391_v53 = vrot.slane %v390_v40, 4  ;;  %v406_v20 = vsel %vm270_vm5, %v6752_v19, -inf  ;;  %v3604_v21 = vmax.f32 %v349_v56, %v350_v24 }
  0x50   : > { %v359_v31 = vrot.slane %v358_v0, 1  ;;  %v384_v18 = vrot.slane %v383_v23, 2  ;;  %v367_v55 = vmax.f32 %v365_v45, %v366_v49  ;;  %v376_v62 = vmax.f32 %v374_v22, %v375_v37 }
  0x51   : > { %v400_v51 = vrot.slane %v399_v39, 4  ;;  %v392_v38 = vmax.f32 %v390_v40, %v391_v53  ;;  %v6753_v30 = vsel %vm3368_vm6, %v3442_v60, -inf  ;;  %v417_v19 = vstv %s416_s27  ;;  %s5712_s27 = sld [smem:[#allocation8 + %s3233_s17]] }
  0x52   : > { %v407_v29 = vsel %vm270_vm5, %v6753_v30, -inf  ;;  %v360_v43 = vmax.f32 %v358_v0, %v359_v31  ;;  %v385_v44 = vmax.f32 %v383_v23, %v384_v18  ;;  %v368_v56 = vrot.slane %v367_v55, 1 }
  0x53   : > { %v401_v4 = vmax.f32 %v399_v39, %v400_v51  ;;  %v408_v61 = vmax.f32 %v406_v20, %v407_v29  ;;  %v377_v3 = vrot.slane %v376_v62, 1  ;;  %v393_v24 = vrot.slane %v392_v38, 2 }
  0x54   : > { %v386_v45 = vrot.slane %v385_v44, 1  ;;  %vm3611_vm7 = vcmp.eq.s32.totalorder %v417_v19, 1  ;;  %v369_v40 = vmax.f32 %v367_v55, %v368_v56  ;;  %v6756_v39 = vstv %s3247_s22  ;;  %s5009_s22 = sld [smem:[#allocation5 + %s4984_s21]] }
  0x55   : > { %v402_v22 = vrot.slane %v401_v4, 2  ;;  %v409_v53 = vrot.slane %v408_v61, 4  ;;  %v378_v49 = vmax.f32 %v376_v62, %v377_v3  ;;  %v394_v0 = vmax.f32 %v392_v38, %v393_v24 }
  0x56   : > { %v419_v23 = vsel %vm3611_vm7, %v3508_v14, 0.0  ;;  %vm3621_vm8 = vcmp.ge.s32.totalorder %v3244_v1, %v6756_v39  ;;  %v387_v20 = vmax.f32 %v385_v44, %v386_v45  ;;  %v420_v51 = vsel %vm3611_vm7, %v3510_v57, 0.0 }
  0x57   : > { %v403_v31 = vmax.f32 %v401_v4, %v402_v22  ;;  %v410_v18 = vmax.f32 %v408_v61, %v409_v53  ;;  %v6759_v55 = vmov %v6756_v39  ;;  %v395_v62 = vrot.slane %v394_v0, 1 }
  0x58   : > { %vm3634_vm9 = vcmp.ge.s32.totalorder %v3258_v2, %v6759_v55  ;;  %v421_v38 = vsel %vm3611_vm7, %v3512_v13, 0.0  ;;  %v422_v30 = vsel %vm3611_vm7, %v3514_v58, 0.0  ;;  %v423_v29 = vsel %vm3611_vm7, %v3526_v50, 0.0 }
  0x59   : > { %v404_v57 = vrot.slane %v403_v31, 1  ;;  %v411_v44 = vrot.slane %v410_v18, 2  ;;  %v424_v4 = vsel %vm3611_vm7, %v3528_v52, 0.0  ;;  %v425_v61 = vsel %vm3611_vm7, %v3565_v46, 0.0 }
  0x5a   : > { %v396_v13 = vmax.f32 %v394_v0, %v395_v62  ;;  %v426_v58 = vsel %vm3611_vm7, %v3589_v63, 0.0  ;;  %v427_v50 = vsel %vm3611_vm7, %v3604_v21, 0.0  ;;  %v428_v56 = vsel %vm3611_vm7, %v360_v43, 0.0  ;;  %v6773_v62 = vld [vmem:[#allocation15_spill] sm:$0xff] }
  0x5b   : > { %v405_v3 = vmax.f32 %v403_v31, %v404_v57  ;;  %v412_v52 = vmax.f32 %v410_v18, %v411_v44  ;;  %v429_v24 = vsel %vm3611_vm7, %v369_v40, 0.0  ;;  %v430_v46 = vsel %vm3611_vm7, %v378_v49, 0.0 }
  0x5c   : > { %v431_v19 = vsel %vm3611_vm7, %v387_v20, 0.0  ;;  %v432_v63 = vsel %vm3611_vm7, %v396_v13, 0.0  ;;  %v452_v45 = vsel %vm451_vm10, %v420_v51, %v419_v23  ;;  %v465_v49 = vsel %vm451_vm10, %v428_v56, %v427_v50 }
  0x5d   : > { %v413_v21 = vrot.slane %v412_v52, 1  ;;  %v433_v43 = vsel %vm3611_vm7, %v405_v3, 0.0  ;;  %v454_v22 = vsel %vm453_vm11, %v421_v38, %v452_v45  ;;  %v466_v39 = vsel %vm453_vm11, %v429_v24, %v465_v49  ;;  %v6770_v45 = vld [vmem:[#allocation12_spill] sm:$0xff]  ;;  %v6772_v49 = vld [vmem:[#allocation14_spill] sm:$0xff] }
  0x5e   : > { %v456_v40 = vsel %vm455_vm12, %v422_v30, %v454_v22  ;;  %v6762_v20 = vstv %s3250_s23  ;;  %v467_v51 = vsel %vm455_vm12, %v430_v46, %v466_v39  ;;  %s5262_s23 = sld [smem:[#allocation6 + %s4984_s21]] }
  0x5f   : > { %v414_v53 = vmax.f32 %v412_v52, %v413_v21  ;;  %v458_v0 = vsel %vm457_vm13, %v423_v29, %v456_v40  ;;  %vm483_vm1 = vcmp.lt.s32.totalorder %v3244_v1, %v6762_v20  ;;  %v6763_v23 = vmov %v6762_v20  ;;  %v6769_v21 = vld [vmem:[#allocation11_spill] sm:$0xff] }
  0x60   : > { %vm484_vm2 = vcmp.lt.s32.totalorder %v3258_v2, %v6763_v23  ;;  %v460_v18 = vsel %vm459_vm14, %v424_v4, %v458_v0  ;;  %vm3692_vm3 = vmand %vm3621_vm8, %vm483_vm1  ;;  %v468_v30 = vsel %vm457_vm13, %v431_v19, %v467_v51  ;;  %v6768_v19 = vld [vmem:[#allocation10_spill] sm:$0xff] }
  0x61   : > { %v434_v31 = vsel %vm3611_vm7, %v414_v53, 0.0  ;;  %v462_v38 = vsel %vm461_vm15, %v425_v61, %v460_v18  ;;  %vm3701_vm4 = vmand %vm3634_vm9, %vm484_vm2  ;;  %v491_v29 = vsel %vm3692_vm3, %v3263_v5, -inf  ;;  %v493_v37 = vsel %vm3692_vm3, %v3266_v6, -inf  ;;  %v6771_v53 = vld [vmem:[#allocation13_spill] sm:$0xff] }
  0x62   : > { %v464_v57 = vsel %vm463_vm0, %v426_v58, %v462_v38  ;;  %v469_v44 = vsel %vm459_vm14, %v432_v63, %v468_v30  ;;  %v492_v14 = vsel %vm3701_vm4, %v3272_v8, -inf  ;;  %v494_v4 = vsel %vm3701_vm4, %v3275_v9, -inf }
  0x63   : > { %v470_v61 = vsel %vm461_vm15, %v433_v43, %v469_v44  ;;  %474 = vst.msk [vmem:[#allocation2] sm:$0xff] %vm270_vm5, %v464_v57  ;;  %v495_v13 = vsel %vm3692_vm3, %v3269_v7, -inf  ;;  %v496_v58 = vsel %vm3701_vm4, %v3278_v10, -inf  ;;  %v497_v50 = vsel %vm3692_vm3, %v3281_v11, -inf }
  0x64   : > { %v471_v56 = vsel %vm463_vm0, %v434_v31, %v470_v61  ;;  %v498_v3 = vsel %vm3701_vm4, %v3284_v12, -inf  ;;  %v499_v52 = vsel %vm3692_vm3, %v3297_v15, -inf  ;;  %v500_v24 = vsel %vm3701_vm4, %v3300_v16, -inf  ;;  %p1897_p11 = scmp.gt.s32.totalorder %s5262_s23, %s5009_s22 }
  0x65   : > { %475 = vst.msk [vmem:[#allocation2 + $0x8] sm:$0xff] %vm270_vm5, %v471_v56  ;;  %v501_v46 = vsel %vm3692_vm3, %v3303_v17, -inf  ;;  %v502_v63 = vsel %vm3701_vm4, %v6768_v19, -inf  ;;  %v503_v43 = vsel %vm3692_vm3, %v6769_v21, -inf  ;;  %v504_v22 = vsel %vm3701_vm4, %v6770_v45, -inf }
  0x66   : > { %v505_v40 = vsel %vm3692_vm3, %v6771_v53, -inf  ;;  %v506_v0 = vsel %vm3701_vm4, %v6772_v49, -inf  ;;  %v523_v38 = vsel %vm270_vm5, %v491_v29, -inf  ;;  %v524_v56 = vsel %vm270_vm5, %v492_v14, -inf  ;;  %s1898_s25 = scalar_select %p1897_p11, 1, 0 }
  0x67   : > { %v525_v51 = vmax.f32 %v523_v38, %v524_v56  ;;  %v532_v18 = vsel %vm270_vm5, %v493_v37, -inf  ;;  %v533_v30 = vsel %vm270_vm5, %v494_v4, -inf  ;;  %v541_v31 = vsel %vm270_vm5, %v495_v13, -inf }
  0x68   : > { %v534_v57 = vmax.f32 %v532_v18, %v533_v30  ;;  %v542_v23 = vsel %vm270_vm5, %v496_v58, -inf  ;;  %v550_v44 = vsel %vm270_vm5, %v497_v50, -inf  ;;  %v551_v20 = vsel %vm270_vm5, %v498_v3, -inf }
  0x69   : > { %v526_v39 = vrot.slane %v525_v51, 4  ;;  %v543_v61 = vmax.f32 %v541_v31, %v542_v23  ;;  %v552_v49 = vmax.f32 %v550_v44, %v551_v20  ;;  %v559_v29 = vsel %vm270_vm5, %v499_v52, -inf }
  0x6a   : > { %v535_v14 = vrot.slane %v534_v57, 4  ;;  %v560_v38 = vsel %vm270_vm5, %v500_v24, -inf  ;;  %v568_v37 = vsel %vm270_vm5, %v501_v46, -inf  ;;  %v569_v4 = vsel %vm270_vm5, %v502_v63, -inf }
  0x6b   : > { %v527_v13 = vmax.f32 %v525_v51, %v526_v39  ;;  %v544_v18 = vrot.slane %v543_v61, 4  ;;  %v553_v30 = vrot.slane %v552_v49, 4  ;;  %v561_v58 = vmax.f32 %v559_v29, %v560_v38 }
  0x6c   : > { %v536_v56 = vmax.f32 %v534_v57, %v535_v14  ;;  %v570_v50 = vmax.f32 %v568_v37, %v569_v4  ;;  %v577_v3 = vsel %vm270_vm5, %v503_v43, -inf  ;;  %v578_v23 = vsel %vm270_vm5, %v504_v22, -inf }
  0x6d   : > { %v528_v20 = vrot.slane %v527_v13, 2  ;;  %v545_v31 = vmax.f32 %v543_v61, %v544_v18  ;;  %v554_v52 = vmax.f32 %v552_v49, %v553_v30  ;;  %v562_v44 = vrot.slane %v561_v58, 4 }
  0x6e   : > { %v537_v53 = vrot.slane %v536_v56, 2  ;;  %v571_v24 = vrot.slane %v570_v50, 4  ;;  %v579_v45 = vmax.f32 %v577_v3, %v578_v23  ;;  %v586_v46 = vsel %vm270_vm5, %v505_v40, -inf }
  0x6f   : > { %v529_v63 = vmax.f32 %v527_v13, %v528_v20  ;;  %v546_v39 = vrot.slane %v545_v31, 2  ;;  %v555_v51 = vrot.slane %v554_v52, 2  ;;  %v563_v21 = vmax.f32 %v561_v58, %v562_v44 }
  0x70   : > { %v538_v29 = vmax.f32 %v536_v56, %v537_v53  ;;  %v572_v57 = vmax.f32 %v570_v50, %v571_v24  ;;  %v580_v14 = vrot.slane %v579_v45, 4  ;;  %v587_v43 = vsel %vm270_vm5, %v506_v0, -inf }
  0x71   : > { %v530_v38 = vrot.slane %v529_v63, 1  ;;  %v547_v22 = vmax.f32 %v545_v31, %v546_v39  ;;  %v556_v37 = vmax.f32 %v554_v52, %v555_v51  ;;  %v564_v61 = vrot.slane %v563_v21, 2 }
  0x72   : > { %v539_v49 = vrot.slane %v538_v29, 1  ;;  %v573_v4 = vrot.slane %v572_v57, 2  ;;  %v581_v18 = vmax.f32 %v579_v45, %v580_v14  ;;  %v588_v30 = vmax.f32 %v586_v46, %v587_v43 }
  0x73   : > { %v3823_v3 = vmax.f32 %v529_v63, %v530_v38  ;;  %v548_v40 = vrot.slane %v547_v22, 1  ;;  %v557_v13 = vrot.slane %v556_v37, 1  ;;  %v565_v23 = vmax.f32 %v563_v21, %v564_v61 }
  0x74   : > { %v3825_v20 = vmax.f32 %v538_v29, %v539_v49  ;;  %v574_v53 = vmax.f32 %v572_v57, %v573_v4  ;;  %v582_v58 = vrot.slane %v581_v18, 2  ;;  %v589_v56 = vrot.slane %v588_v30, 4 }
  0x75   : > { %v3827_v50 = vmax.f32 %v547_v22, %v548_v40  ;;  %v3829_v0 = vmax.f32 %v556_v37, %v557_v13  ;;  %v566_v31 = vrot.slane %v565_v23, 1  ;;  %v6774_v45 = vsel %vm3692_vm3, %v3331_v25, -inf }
  0x76   : > { %v595_v52 = vsel %vm270_vm5, %v6774_v45, -inf  ;;  %v575_v44 = vrot.slane %v574_v53, 1  ;;  %v583_v24 = vmax.f32 %v581_v18, %v582_v58  ;;  %v590_v46 = vmax.f32 %v588_v30, %v589_v56 }
  0x77   : > { %v6775_v21 = vsel %vm3701_vm4, %v3334_v26, -inf  ;;  %v3841_v39 = vmax.f32 %v565_v23, %v566_v31  ;;  %v6776_v29 = vsel %vm3692_vm3, %v3337_v27, -inf  ;;  %v6777_v14 = vsel %vm3701_vm4, %v3340_v28, -inf }
  0x78   : > { %v596_v63 = vsel %vm270_vm5, %v6775_v21, -inf  ;;  %v604_v57 = vsel %vm270_vm5, %v6776_v29, -inf  ;;  %v605_v43 = vsel %vm270_vm5, %v6777_v14, -inf  ;;  %v3853_v38 = vmax.f32 %v574_v53, %v575_v44 }
  0x79   : > { %v597_v51 = vmax.f32 %v595_v52, %v596_v63  ;;  %v584_v22 = vrot.slane %v583_v24, 1  ;;  %v591_v37 = vrot.slane %v590_v46, 2  ;;  %v606_v61 = vmax.f32 %v604_v57, %v605_v43 }
  0x7a   : > { %v6778_v4 = vsel %vm3692_vm3, %v3353_v32, -inf  ;;  %v6779_v30 = vsel %vm3701_vm4, %v3356_v33, -inf  ;;  %v6780_v13 = vsel %vm3692_vm3, %v3359_v34, -inf  ;;  %v6781_v52 = vsel %vm3701_vm4, %v3362_v35, -inf }
  0x7b   : > { %v598_v49 = vrot.slane %v597_v51, 4  ;;  %v613_v18 = vsel %vm270_vm5, %v6778_v4, -inf  ;;  %v614_v40 = vsel %vm270_vm5, %v6779_v30, -inf  ;;  %v622_v23 = vsel %vm270_vm5, %v6780_v13, -inf }
  0x7c   : > { %v3870_v53 = vmax.f32 %v583_v24, %v584_v22  ;;  %v592_v58 = vmax.f32 %v590_v46, %v591_v37  ;;  %v607_v56 = vrot.slane %v606_v61, 4  ;;  %v615_v31 = vmax.f32 %v613_v18, %v614_v40 }
  0x7d   : > { %v599_v45 = vmax.f32 %v597_v51, %v598_v49  ;;  %v623_v44 = vsel %vm270_vm5, %v6781_v52, -inf  ;;  %v6782_v21 = vsel %vm3692_vm3, %v3385_v41, -inf  ;;  %v6783_v24 = vsel %vm3701_vm4, %v3388_v42, -inf }
  0x7e   : > { %v631_v63 = vsel %vm270_vm5, %v6782_v21, -inf  ;;  %v632_v46 = vsel %vm270_vm5, %v6783_v24, -inf  ;;  %v593_v51 = vrot.slane %v592_v58, 1  ;;  %v608_v29 = vmax.f32 %v606_v61, %v607_v56 }
  0x7f   : > { %v616_v57 = vrot.slane %v615_v31, 4  ;;  %v624_v14 = vmax.f32 %v622_v23, %v623_v44  ;;  %v600_v43 = vrot.slane %v599_v45, 2  ;;  %v633_v22 = vmax.f32 %v631_v63, %v632_v46 }
  0x80   : > { %v6784_v37 = vsel %vm3692_vm3, %v3403_v47, -inf  ;;  %v6785_v4 = vsel %vm3701_vm4, %v3406_v48, -inf  ;;  %v3897_v30 = vmax.f32 %v592_v58, %v593_v51  ;;  %v609_v61 = vrot.slane %v608_v29, 2 }
  0x81   : > { %v640_v49 = vsel %vm270_vm5, %v6784_v37, -inf  ;;  %v641_v18 = vsel %vm270_vm5, %v6785_v4, -inf  ;;  %v617_v40 = vmax.f32 %v615_v31, %v616_v57  ;;  %v625_v13 = vrot.slane %v624_v14, 4 }
  0x82   : > { %v601_v23 = vmax.f32 %v599_v45, %v600_v43  ;;  %v634_v56 = vrot.slane %v633_v22, 4  ;;  %v642_v52 = vmax.f32 %v640_v49, %v641_v18  ;;  %v6786_v44 = vsel %vm3692_vm3, %v6773_v62, -inf }
  0x83   : > { %v649_v21 = vsel %vm270_vm5, %v6786_v44, -inf  ;;  %v610_v63 = vmax.f32 %v608_v29, %v609_v61  ;;  %v618_v24 = vrot.slane %v617_v40, 2  ;;  %v626_v46 = vmax.f32 %v624_v14, %v625_v13 }
  0x84   : > { %v6787_v58 = vsel %vm3701_vm4, %v3424_v54, -inf  ;;  %v602_v45 = vrot.slane %v601_v23, 1  ;;  %v635_v51 = vmax.f32 %v633_v22, %v634_v56  ;;  %v643_v57 = vrot.slane %v642_v52, 4 }
  0x85   : > { %v650_v31 = vsel %vm270_vm5, %v6787_v58, -inf  ;;  %v611_v37 = vrot.slane %v610_v63, 1  ;;  %v619_v49 = vmax.f32 %v617_v40, %v618_v24  ;;  %v627_v4 = vrot.slane %v626_v46, 2 }
  0x86   : > { %v651_v43 = vmax.f32 %v649_v21, %v650_v31  ;;  %v6788_v29 = vsel %vm3692_vm3, %v3439_v59, -inf  ;;  %v603_v18 = vmax.f32 %v601_v23, %v602_v45  ;;  %v636_v61 = vrot.slane %v635_v51, 2 }
  0x87   : > { %v658_v14 = vsel %vm270_vm5, %v6788_v29, -inf  ;;  %v644_v13 = vmax.f32 %v642_v52, %v643_v57  ;;  %v612_v22 = vmax.f32 %v610_v63, %v611_v37  ;;  %v620_v56 = vrot.slane %v619_v49, 1 }
  0x88   : > { %v652_v44 = vrot.slane %v651_v43, 4  ;;  %v628_v21 = vmax.f32 %v626_v46, %v627_v4  ;;  %v6789_v40 = vsel %vm3701_vm4, %v3442_v60, -inf  ;;  %v637_v24 = vmax.f32 %v635_v51, %v636_v61 }
  0x89   : > { %v659_v55 = vsel %vm270_vm5, %v6789_v40, -inf  ;;  %v645_v58 = vrot.slane %v644_v13, 2  ;;  %v621_v23 = vmax.f32 %v619_v49, %v620_v56  ;;  %v669_v59 = vstv %s668_s7 }
  0x8a   : > { %v653_v31 = vmax.f32 %v651_v43, %v652_v44  ;;  %v660_v29 = vmax.f32 %v658_v14, %v659_v55  ;;  %v629_v45 = vrot.slane %v628_v21, 1  ;;  %v6790_v52 = vstv %s3654_s29  ;;  %s5869_s29 = sld [smem:[#allocation7 + %s3242_s20]] }
  0x8b   : > { %vm3930_vm6 = vcmp.ge.s32.totalorder %v3244_v1, %v6790_v52  ;;  %v638_v36 = vrot.slane %v637_v24, 1  ;;  %v646_v46 = vmax.f32 %v644_v13, %v645_v58  ;;  %vm3937_vm7 = vcmp.eq.s32.totalorder %v669_v59, 1 }
  0x8c   : > { %v654_v57 = vrot.slane %v653_v31, 2  ;;  %v661_v51 = vrot.slane %v660_v29, 4  ;;  %v630_v37 = vmax.f32 %v628_v21, %v629_v45  ;;  %v6795_v49 = vmov %v6790_v52 }
  0x8d   : > { %vm3944_vm8 = vcmp.ge.s32.totalorder %v3258_v2, %v6795_v49  ;;  %v728_v14 = vstv %s3912_s30  ;;  %v639_v61 = vmax.f32 %v637_v24, %v638_v36  ;;  %v647_v44 = vrot.slane %v646_v46, 1  ;;  %s5878_s30 = sld [smem:[#allocation8 + %s3242_s20]] }
  0x8e   : > { %v655_v56 = vmax.f32 %v653_v31, %v654_v57  ;;  %v662_v40 = vmax.f32 %v660_v29, %v661_v51  ;;  %v671_v59 = vsel %vm3937_vm7, %v3823_v3, 0.0  ;;  %v672_v13 = vsel %vm3937_vm7, %v3825_v20, 0.0  ;;  %s5893_s20 = sld [smem:[#allocation7 + %s3626_s28]] }
  0x8f   : > { %v673_v21 = vsel %vm3937_vm7, %v3827_v50, 0.0  ;;  %v674_v55 = vsel %vm3937_vm7, %v3829_v0, 0.0  ;;  %v648_v24 = vmax.f32 %v646_v46, %v647_v44  ;;  %v675_v29 = vsel %vm3937_vm7, %v3841_v39, 0.0 }
  0x90   : > { %v656_v58 = vrot.slane %v655_v56, 1  ;;  %v663_v31 = vrot.slane %v662_v40, 2  ;;  %v676_v3 = vsel %vm3937_vm7, %v3853_v38, 0.0  ;;  %v677_v20 = vsel %vm3937_vm7, %v3870_v53, 0.0 }
  0x91   : > { %v678_v50 = vsel %vm3937_vm7, %v3897_v30, 0.0  ;;  %v679_v0 = vsel %vm3937_vm7, %v603_v18, 0.0  ;;  %v680_v39 = vsel %vm3937_vm7, %v612_v22, 0.0  ;;  %v681_v36 = vsel %vm3937_vm7, %v621_v23, 0.0 }
  0x92   : > { %v657_v45 = vmax.f32 %v655_v56, %v656_v58  ;;  %v664_v52 = vmax.f32 %v662_v40, %v663_v31  ;;  %v682_v38 = vsel %vm3937_vm7, %v630_v37, 0.0  ;;  %v683_v53 = vsel %vm3937_vm7, %v639_v61, 0.0 }
  0x93   : > { %v684_v30 = vsel %vm3937_vm7, %v648_v24, 0.0  ;;  %v703_v18 = vsel %vm451_vm10, %v672_v13, %v671_v59  ;;  %v710_v23 = vsel %vm451_vm10, %v680_v39, %v679_v0  ;;  %vm729_vm9 = vcmp.lt.s32.totalorder %v3244_v1, %v728_v14  ;;  %v6803_v0 = vld [vmem:[#allocation12_spill] sm:$0xff]  ;;  %p2189_p0 = scmp.gt.s32.totalorder %s5878_s30, %s5869_s29 }
  0x94   : > { %v665_v46 = vrot.slane %v664_v52, 1  ;;  %v685_v57 = vsel %vm3937_vm7, %v657_v45, 0.0  ;;  %v704_v22 = vsel %vm453_vm11, %v673_v21, %v703_v18  ;;  %v711_v37 = vsel %vm453_vm11, %v681_v36, %v710_v23  ;;  %vm4001_vm2 = vmand %vm3930_vm6, %vm729_vm9  ;;  %v6804_v45 = vld [vmem:[#allocation13_spill] sm:$0xff] }
  0x95   : > { %v705_v51 = vsel %vm455_vm12, %v674_v55, %v704_v22  ;;  %vm730_vm1 = vcmp.lt.s32.totalorder %v3258_v2, %v728_v14  ;;  %v712_v44 = vsel %vm455_vm12, %v682_v38, %v711_v37  ;;  %v737_v21 = vsel %vm4001_vm2, %v3263_v5, -inf  ;;  %s5908_s7 = scalar_select %p2189_p0, 1, 0 }
  0x96   : > { %v666_v49 = vmax.f32 %v664_v52, %v665_v46  ;;  %v706_v61 = vsel %vm457_vm13, %v675_v29, %v705_v51  ;;  %v713_v13 = vsel %vm457_vm13, %v683_v53, %v712_v44  ;;  %vm4010_vm3 = vmand %vm3944_vm8, %vm730_vm1  ;;  %v739_v63 = vsel %vm4001_vm2, %v3266_v6, -inf  ;;  %v6805_v52 = vld [vmem:[#allocation14_spill] sm:$0xff] }
  0x97   : > { %v707_v59 = vsel %vm459_vm14, %v676_v3, %v706_v61  ;;  %v714_v58 = vsel %vm459_vm14, %v684_v30, %v713_v13  ;;  %v738_v4 = vsel %vm4010_vm3, %v3272_v8, -inf  ;;  %v740_v5 = vsel %vm4010_vm3, %v3275_v9, -inf  ;;  %v6806_v61 = vld [vmem:[#allocation16_spill] sm:$0xff] }
  0x98   : > { %v686_v55 = vsel %vm3937_vm7, %v666_v49, 0.0  ;;  %v708_v24 = vsel %vm461_vm15, %v677_v20, %v707_v59  ;;  %v715_v29 = vsel %vm461_vm15, %v685_v57, %v714_v58  ;;  %v741_v6 = vsel %vm4001_vm2, %v3269_v7, -inf }
  0x99   : > { %v709_v31 = vsel %vm463_vm0, %v678_v50, %v708_v24  ;;  %v716_v43 = vsel %vm463_vm0, %v686_v55, %v715_v29  ;;  %v742_v8 = vsel %vm4010_vm3, %v3278_v10, -inf  ;;  %v743_v3 = vsel %vm4001_vm2, %v3281_v11, -inf  ;;  %v6802_v50 = vld [vmem:[#allocation11_spill] sm:$0xff] }
  0x9a   : > { %720 = vst.msk [vmem:[#allocation2 + $0x10] sm:$0xff] %vm270_vm5, %v709_v31  ;;  %v744_v9 = vsel %vm4010_vm3, %v3284_v12, -inf  ;;  %v745_v7 = vsel %vm4001_vm2, %v3297_v15, -inf  ;;  %v746_v20 = vsel %vm4010_vm3, %v3300_v16, -inf  ;;  %v747_v10 = vsel %vm4001_vm2, %v3303_v17, -inf }
  0x9b   : > { %721 = vst.msk [vmem:[#allocation2 + $0x18] sm:$0xff] %vm270_vm5, %v716_v43  ;;  %v748_v11 = vsel %vm4010_vm3, %v6768_v19, -inf  ;;  %v749_v12 = vsel %vm4001_vm2, %v6802_v50, -inf  ;;  %v750_v15 = vsel %vm4010_vm3, %v6803_v0, -inf  ;;  %v751_v16 = vsel %vm4001_vm2, %v6804_v45, -inf }
  0x9c   : > { %v752_v17 = vsel %vm4010_vm3, %v6805_v52, -inf  ;;  %v753_v19 = vsel %vm4001_vm2, %v3331_v25, -inf  ;;  %v754_v39 = vsel %vm4010_vm3, %v3334_v26, -inf  ;;  %v755_v36 = vsel %vm4001_vm2, %v3337_v27, -inf }
  0x9d   : > { %v756_v38 = vsel %vm4010_vm3, %v3340_v28, -inf  ;;  %v757_v53 = vsel %vm4001_vm2, %v3353_v32, -inf  ;;  %v758_v30 = vsel %vm4010_vm3, %v3356_v33, -inf  ;;  %v759_v18 = vsel %vm4001_vm2, %v3359_v34, -inf }
  0x9e   : > { %v760_v46 = vsel %vm4010_vm3, %v3362_v35, -inf  ;;  %v761_v57 = vsel %vm4001_vm2, %v3385_v41, -inf  ;;  %v762_v22 = vsel %vm4010_vm3, %v3388_v42, -inf  ;;  %v763_v23 = vsel %vm4001_vm2, %v3403_v47, -inf }
  0x9f   : > { %v769_v13 = vsel %vm270_vm5, %v737_v21, -inf  ;;  %v770_v55 = vsel %vm270_vm5, %v738_v4, -inf  ;;  %v778_v24 = vsel %vm270_vm5, %v739_v63, -inf  ;;  %v779_v58 = vsel %vm270_vm5, %v740_v5, -inf }
  0xa0   : > { %v771_v31 = vmax.f32 %v769_v13, %v770_v55  ;;  %v780_v29 = vmax.f32 %v778_v24, %v779_v58  ;;  %v787_v43 = vsel %vm270_vm5, %v741_v6, -inf  ;;  %v788_v50 = vsel %vm270_vm5, %v742_v8, -inf }
  0xa1   : > { %v789_v0 = vmax.f32 %v787_v43, %v788_v50  ;;  %v796_v45 = vsel %vm270_vm5, %v743_v3, -inf  ;;  %v797_v52 = vsel %vm270_vm5, %v744_v9, -inf  ;;  %v805_v40 = vsel %vm270_vm5, %v745_v7, -inf }
  0xa2   : > { %v772_v21 = vrot.slane %v771_v31, 4  ;;  %v781_v59 = vrot.slane %v780_v29, 4  ;;  %v798_v4 = vmax.f32 %v796_v45, %v797_v52  ;;  %v806_v63 = vsel %vm270_vm5, %v746_v20, -inf }
  0xa3   : > { %v790_v44 = vrot.slane %v789_v0, 4  ;;  %v807_v5 = vmax.f32 %v805_v40, %v806_v63  ;;  %v814_v13 = vsel %vm270_vm5, %v747_v10, -inf  ;;  %v815_v6 = vsel %vm270_vm5, %v748_v11, -inf }
  0xa4   : > { %v773_v55 = vmax.f32 %v771_v31, %v772_v21  ;;  %v782_v8 = vmax.f32 %v780_v29, %v781_v59  ;;  %v799_v24 = vrot.slane %v798_v4, 4  ;;  %v816_v58 = vmax.f32 %v814_v13, %v815_v6 }
  0xa5   : > { %v791_v3 = vmax.f32 %v789_v0, %v790_v44  ;;  %v808_v43 = vrot.slane %v807_v5, 4  ;;  %v823_v9 = vsel %vm270_vm5, %v749_v12, -inf  ;;  %v824_v7 = vsel %vm270_vm5, %v750_v15, -inf }
  0xa6   : > { %v774_v50 = vrot.slane %v773_v55, 2  ;;  %v783_v45 = vrot.slane %v782_v8, 2  ;;  %v800_v52 = vmax.f32 %v798_v4, %v799_v24  ;;  %v817_v20 = vrot.slane %v816_v58, 4 }
  0xa7   : > { %v792_v49 = vrot.slane %v791_v3, 2  ;;  %v809_v40 = vmax.f32 %v807_v5, %v808_v43  ;;  %v825_v63 = vmax.f32 %v823_v9, %v824_v7  ;;  %v832_v10 = vsel %vm270_vm5, %v751_v16, -inf }
  0xa8   : > { %v775_v11 = vmax.f32 %v773_v55, %v774_v50  ;;  %v784_v31 = vmax.f32 %v782_v8, %v783_v45  ;;  %v801_v59 = vrot.slane %v800_v52, 2  ;;  %v818_v29 = vmax.f32 %v816_v58, %v817_v20 }
  0xa9   : > { %v793_v21 = vmax.f32 %v791_v3, %v792_v49  ;;  %v810_v44 = vrot.slane %v809_v40, 2  ;;  %v826_v0 = vrot.slane %v825_v63, 4  ;;  %v833_v12 = vsel %vm270_vm5, %v752_v17, -inf }
  0xaa   : > { %v776_v13 = vrot.slane %v775_v11, 1  ;;  %v785_v15 = vrot.slane %v784_v31, 1  ;;  %v802_v6 = vmax.f32 %v800_v52, %v801_v59  ;;  %v819_v37 = vrot.slane %v818_v29, 2 }
  0xab   : > { %v794_v4 = vrot.slane %v793_v21, 1  ;;  %v811_v24 = vmax.f32 %v809_v40, %v810_v44  ;;  %v827_v51 = vmax.f32 %v825_v63, %v826_v0  ;;  %v834_v5 = vmax.f32 %v832_v10, %v833_v12 }
  0xac   : > { %v4135_v43 = vmax.f32 %v775_v11, %v776_v13  ;;  %v4137_v16 = vmax.f32 %v784_v31, %v785_v15  ;;  %v803_v55 = vrot.slane %v802_v6, 1  ;;  %v820_v8 = vmax.f32 %v818_v29, %v819_v37 }
  0xad   : > { %v4139_v58 = vmax.f32 %v793_v21, %v794_v4  ;;  %v812_v49 = vrot.slane %v811_v24, 1  ;;  %v828_v3 = vrot.slane %v827_v51, 2  ;;  %v835_v9 = vrot.slane %v834_v5, 4 }
  0xae   : > { %v4141_v17 = vmax.f32 %v802_v6, %v803_v55  ;;  %v821_v7 = vrot.slane %v820_v8, 1  ;;  %v841_v50 = vsel %vm270_vm5, %v753_v19, -inf  ;;  %v842_v37 = vsel %vm270_vm5, %v754_v39, -inf }
  0xaf   : > { %v4153_v45 = vmax.f32 %v811_v24, %v812_v49  ;;  %v829_v52 = vmax.f32 %v827_v51, %v828_v3  ;;  %v836_v20 = vmax.f32 %v834_v5, %v835_v9  ;;  %v843_v40 = vmax.f32 %v841_v50, %v842_v37 }
  0xb0   : > { %v4155_v63 = vmax.f32 %v820_v8, %v821_v7  ;;  %v850_v25 = vsel %vm270_vm5, %v755_v36, -inf  ;;  %v851_v26 = vsel %vm270_vm5, %v756_v38, -inf  ;;  %v859_v19 = vsel %vm270_vm5, %v757_v53, -inf }
  0xb1   : > { %v830_v39 = vrot.slane %v829_v52, 1  ;;  %v837_v51 = vrot.slane %v836_v20, 2  ;;  %v844_v10 = vrot.slane %v843_v40, 4  ;;  %v852_v11 = vmax.f32 %v850_v25, %v851_v26 }
  0xb2   : > { %v860_v27 = vsel %vm270_vm5, %v758_v30, -inf  ;;  %v868_v28 = vsel %vm270_vm5, %v759_v18, -inf  ;;  %v869_v32 = vsel %vm270_vm5, %v760_v46, -inf  ;;  %v877_v33 = vsel %vm270_vm5, %v761_v57, -inf }
  0xb3   : > { %v4192_v36 = vmax.f32 %v829_v52, %v830_v39  ;;  %v838_v38 = vmax.f32 %v836_v20, %v837_v51  ;;  %v845_v34 = vmax.f32 %v843_v40, %v844_v10  ;;  %v853_v53 = vrot.slane %v852_v11, 4 }
  0xb4   : > { %v861_v30 = vmax.f32 %v859_v19, %v860_v27  ;;  %v870_v18 = vmax.f32 %v868_v28, %v869_v32  ;;  %v878_v35 = vsel %vm270_vm5, %v762_v22, -inf  ;;  %v886_v41 = vsel %vm270_vm5, %v763_v23, -inf }
  0xb5   : > { %v839_v46 = vrot.slane %v838_v38, 1  ;;  %v846_v57 = vrot.slane %v845_v34, 2  ;;  %v854_v31 = vmax.f32 %v852_v11, %v853_v53  ;;  %v879_v59 = vmax.f32 %v877_v33, %v878_v35  ;;  %v4359_v53 = vld [vmem:[%s3255_s26 + $0x28] sm:$0xff] }
  0xb6   : > { %v862_v29 = vrot.slane %v861_v30, 4  ;;  %v871_v21 = vrot.slane %v870_v18, 4  ;;  %v6807_v44 = vsel %vm4010_vm3, %v3406_v48, -inf  ;;  %v6808_v22 = vsel %vm4001_vm2, %v6773_v62, -inf }
  0xb7   : > { %v887_v42 = vsel %vm270_vm5, %v6807_v44, -inf  ;;  %v895_v47 = vsel %vm270_vm5, %v6808_v22, -inf  ;;  %v4216_v23 = vmax.f32 %v838_v38, %v839_v46  ;;  %v847_v0 = vmax.f32 %v845_v34, %v846_v57 }
  0xb8   : > { %v855_v12 = vrot.slane %v854_v31, 2  ;;  %v880_v13 = vrot.slane %v879_v59, 4  ;;  %v863_v15 = vmax.f32 %v861_v30, %v862_v29  ;;  %v872_v6 = vmax.f32 %v870_v18, %v871_v21 }
  0xb9   : > { %v888_v4 = vmax.f32 %v886_v41, %v887_v42  ;;  %v6809_v48 = vsel %vm4010_vm3, %v3424_v54, -inf  ;;  %v848_v62 = vrot.slane %v847_v0, 1  ;;  %v6810_v7 = vsel %vm4001_vm2, %v6806_v61, -inf }
  0xba   : > { %v896_v24 = vsel %vm270_vm5, %v6809_v48, -inf  ;;  %v856_v5 = vmax.f32 %v854_v31, %v855_v12  ;;  %v881_v55 = vmax.f32 %v879_v59, %v880_v13  ;;  %v864_v49 = vrot.slane %v863_v15, 2 }
  0xbb   : > { %v897_v8 = vmax.f32 %v895_v47, %v896_v24  ;;  %v873_v3 = vrot.slane %v872_v6, 2  ;;  %v889_v9 = vrot.slane %v888_v4, 4  ;;  %v904_v50 = vsel %vm270_vm5, %v6810_v7, -inf }
  0xbc   : > { %v849_v37 = vmax.f32 %v847_v0, %v848_v62  ;;  %v857_v52 = vrot.slane %v856_v5, 1  ;;  %v882_v54 = vrot.slane %v881_v55, 2  ;;  %v865_v40 = vmax.f32 %v863_v15, %v864_v49 }
  0xbd   : > { %v898_v20 = vrot.slane %v897_v8, 4  ;;  %v874_v25 = vmax.f32 %v872_v6, %v873_v3  ;;  %v890_v26 = vmax.f32 %v888_v4, %v889_v9  ;;  %v6811_v19 = vsel %vm4010_vm3, %v3442_v60, -inf }
  0xbe   : > { %v905_v39 = vsel %vm270_vm5, %v6811_v19, -inf  ;;  %v858_v56 = vmax.f32 %v856_v5, %v857_v52  ;;  %v883_v61 = vmax.f32 %v881_v55, %v882_v54  ;;  %v866_v11 = vrot.slane %v865_v40, 1 }
  0xbf   : > { %v899_v51 = vmax.f32 %v897_v8, %v898_v20  ;;  %v906_v10 = vmax.f32 %v904_v50, %v905_v39  ;;  %v875_v27 = vrot.slane %v874_v25, 1  ;;  %v891_v28 = vrot.slane %v890_v26, 2 }
  0xc0   : > { %v915_v32 = vstv %s914_s10  ;;  %v884_v33 = vrot.slane %v883_v61, 1  ;;  %v867_v60 = vmax.f32 %v865_v40, %v866_v11  ;;  %v6814_v55 = vstv %s3950_s9  ;;  %s2976_s9 = smul.u32 56, %s6992_s2 }
  0xc1   : > { %v900_v38 = vrot.slane %v899_v51, 2  ;;  %v907_v34 = vrot.slane %v906_v10, 4  ;;  %vm4236_vm4 = vcmp.eq.s32.totalorder %v915_v32, 1  ;;  %v876_v14 = vmax.f32 %v874_v25, %v875_v27  ;;  %v4341_v27 = vld [vmem:[%s3255_s26 + $0x8] sm:$0xff]  ;;  %v4347_v32 = vld [vmem:[%s3255_s26 + $0x18] sm:$0xff] }
  0xc2   : > { %v892_v30 = vmax.f32 %v890_v26, %v891_v28  ;;  %v917_v18 = vsel %vm4236_vm4, %v4135_v43, 0.0  ;;  %v885_v35 = vmax.f32 %v883_v61, %v884_v33  ;;  %v918_v57 = vsel %vm4236_vm4, %v4137_v16, 0.0  ;;  %v4328_v61 = vld [vmem:[%s3255_s26] sm:$0xff] }
  0xc3   : > { %v901_v41 = vmax.f32 %v899_v51, %v900_v38  ;;  %v908_v46 = vmax.f32 %v906_v10, %v907_v34  ;;  %v919_v59 = vsel %vm4236_vm4, %v4139_v58, 0.0  ;;  %v920_v43 = vsel %vm4236_vm4, %v4141_v17, 0.0  ;;  %v4334_v10 = vld [vmem:[%s3255_s26 + $0x10] sm:$0xff]  ;;  %v4353_v38 = vld [vmem:[%s3255_s26 + $0x20] sm:$0xff] }
  0xc4   : > { %v893_v31 = vrot.slane %v892_v30, 1  ;;  %v921_v29 = vsel %vm4236_vm4, %v4153_v45, 0.0  ;;  %v922_v16 = vsel %vm4236_vm4, %v4155_v63, 0.0  ;;  %v923_v42 = vsel %vm4236_vm4, %v4192_v36, 0.0 }
  0xc5   : > { %v902_v21 = vrot.slane %v901_v41, 1  ;;  %v909_v44 = vrot.slane %v908_v46, 2  ;;  %v924_v17 = vsel %vm4236_vm4, %v4216_v23, 0.0  ;;  %v925_v45 = vsel %vm4236_vm4, %v849_v37, 0.0 }
  0xc6   : > { %v894_v58 = vmax.f32 %v892_v30, %v893_v31  ;;  %v926_v22 = vsel %vm4236_vm4, %v858_v56, 0.0  ;;  %v927_v36 = vsel %vm4236_vm4, %v867_v60, 0.0  ;;  %v928_v0 = vsel %vm4236_vm4, %v876_v14, 0.0  ;;  %v4366_v14 = vld [vmem:[%s3255_s26 + $0x30] sm:$0xff] }
  0xc7   : > { %v903_v63 = vmax.f32 %v901_v41, %v902_v21  ;;  %v910_v47 = vmax.f32 %v908_v46, %v909_v44  ;;  %v929_v23 = vsel %vm4236_vm4, %v885_v35, 0.0  ;;  %v949_v13 = vsel %vm451_vm10, %v918_v57, %v917_v18  ;;  %v4372_v18 = vld [vmem:[%s3255_s26 + $0x38] sm:$0xff]  ;;  %v4378_v41 = vld [vmem:[%s3255_s26 + $0x40] sm:$0xff]  ;;  %v4384_v57 = vld [vmem:[%s3255_s26 + $0x48] sm:$0xff] }
  0xc8   : > { %v930_v12 = vsel %vm4236_vm4, %v894_v58, 0.0  ;;  %v956_v15 = vsel %vm451_vm10, %v926_v22, %v925_v45  ;;  %v950_v48 = vsel %vm453_vm11, %v919_v59, %v949_v13  ;;  %vm972_vm6 = vcmp.ge.s32.totalorder %v3244_v1, %v6814_v55  ;;  %v4390_v59 = vld [vmem:[%s3255_s26 + $0x50] sm:$0xff]  ;;  %v4402_v44 = vld [vmem:[%s3255_s26 + $0x60] sm:$0xff]  ;;  %v4420_v22 = vld [vmem:[%s3255_s26 + $0x78] sm:$0xff] }
  0xc9   : > { %v911_v6 = vrot.slane %v910_v47, 1  ;;  %v931_v4 = vsel %vm4236_vm4, %v903_v63, 0.0  ;;  %v957_v24 = vsel %vm453_vm11, %v927_v36, %v956_v15  ;;  %v951_v62 = vsel %vm455_vm12, %v920_v43, %v950_v48  ;;  %6823 = vst [vmem:[#allocation15_spill] sm:$0xff] %v4402_v44  ;;  %v4444_v15 = vld [vmem:[%s3255_s26 + $0x98] sm:$0xff] }
  0xca   : > { %v958_v5 = vsel %vm455_vm12, %v928_v0, %v957_v24  ;;  %v6815_v8 = vmov %v6814_v55  ;;  %v952_v9 = vsel %vm457_vm13, %v921_v29, %v951_v62  ;;  %v974_v50 = vstv %s4250_s11  ;;  %v4396_v29 = vld [vmem:[%s3255_s26 + $0x58] sm:$0xff]  ;;  %6826 = vst [vmem:[#allocation13_spill] sm:$0xff] %v4420_v22  ;;  %v4432_v0 = vld [vmem:[%s3255_s26 + $0x88] sm:$0xff]  ;;  %s5954_s11 = scalar_lea.vmem %s6685_s6, %s2976_s9 }
  0xcb   : > { %vm4299_vm7 = vcmp.ge.s32.totalorder %v3258_v2, %v6815_v8  ;;  %v912_v3 = vmax.f32 %v910_v47, %v911_v6  ;;  %v959_v7 = vsel %vm457_vm13, %v929_v23, %v958_v5  ;;  %v953_v37 = vsel %vm459_vm14, %v922_v16, %v952_v9  ;;  %6822 = vst [vmem:[#allocation10_spill] sm:$0xff] %v4396_v29  ;;  %v4426_v47 = vld [vmem:[%s3255_s26 + $0x80] sm:$0xff]  ;;  %v4456_v24 = vld [vmem:[%s3255_s26 + $0xa8] sm:$0xff]  ;;  %v4462_v5 = vld [vmem:[%s3255_s26 + $0xb0] sm:$0xff] }
  0xcc   : > { %v960_v52 = vsel %vm459_vm14, %v930_v12, %v959_v7  ;;  %vm975_vm8 = vcmp.lt.s32.totalorder %v3244_v1, %v974_v50  ;;  %vm976_vm9 = vcmp.lt.s32.totalorder %v3258_v2, %v974_v50  ;;  %v954_v20 = vsel %vm461_vm15, %v923_v42, %v953_v37  ;;  %v4408_v42 = vld [vmem:[%s3255_s26 + $0x68] sm:$0xff]  ;;  %v4438_v12 = vld [vmem:[%s3255_s26 + $0x90] sm:$0xff]  ;;  %v4468_v8 = vld [vmem:[%s3255_s26 + $0xb8] sm:$0xff] }
  0xcd   : > { %v932_v54 = vsel %vm4236_vm4, %v912_v3, 0.0  ;;  %v961_v40 = vsel %vm461_vm15, %v931_v4, %v960_v52  ;;  %vm4314_vm1 = vmand %vm972_vm6, %vm975_vm8  ;;  %v955_v19 = vsel %vm463_vm0, %v924_v17, %v954_v20  ;;  %6824 = vst [vmem:[#allocation11_spill] sm:$0xff] %v4408_v42  ;;  %v4414_v17 = vld [vmem:[%s3255_s26 + $0x70] sm:$0xff]  ;;  %v4450_v4 = vld [vmem:[%s3255_s26 + $0xa0] sm:$0xff] }
  0xce   : > { %v962_v39 = vsel %vm463_vm0, %v932_v54, %v961_v40  ;;  %vm4323_vm2 = vmand %vm4299_vm7, %vm976_vm9  ;;  %v983_v51 = vsel %vm4314_vm1, %v4328_v61, -inf  ;;  %v985_v11 = vsel %vm4314_vm1, %v4334_v10, -inf  ;;  %966 = vst.msk [vmem:[#allocation2 + $0x20] sm:$0xff] %vm270_vm5, %v955_v19  ;;  %v987_v34 = vsel %vm4314_vm1, %v4353_v38, -inf  ;;  %v4474_v3 = vld [vmem:[%s3255_s26 + $0xc0] sm:$0xff]  ;;  %v4480_v7 = vld [vmem:[%s3255_s26 + $0xc8] sm:$0xff] }
  0xcf   : > { %v984_v28 = vsel %vm4323_vm2, %v4341_v27, -inf  ;;  %v986_v33 = vsel %vm4323_vm2, %v4347_v32, -inf  ;;  %v988_v60 = vsel %vm4323_vm2, %v4359_v53, -inf  ;;  %967 = vst.msk [vmem:[#allocation2 + $0x28] sm:$0xff] %vm270_vm5, %v962_v39  ;;  %v989_v30 = vsel %vm4314_vm1, %v4366_v14, -inf  ;;  %v4486_v37 = vld [vmem:[%s3255_s26 + $0xd0] sm:$0xff] }
  0xd0   : > { %v990_v35 = vsel %vm4323_vm2, %v4372_v18, -inf  ;;  %v991_v46 = vsel %vm4314_vm1, %v4378_v41, -inf  ;;  %v992_v31 = vsel %vm4323_vm2, %v4384_v57, -inf  ;;  %v993_v43 = vsel %vm4314_vm1, %v4390_v59, -inf  ;;  %6825 = vst [vmem:[#allocation12_spill] sm:$0xff] %v4414_v17  ;;  %v4492_v54 = vld [vmem:[%s3255_s26 + $0xd8] sm:$0xff] }
  0xd1   : > { %v994_v21 = vsel %vm4323_vm2, %v4396_v29, -inf  ;;  %v995_v16 = vsel %vm4314_vm1, %v4402_v44, -inf  ;;  %v996_v58 = vsel %vm4323_vm2, %v4408_v42, -inf  ;;  %v997_v45 = vsel %vm4314_vm1, %v4414_v17, -inf  ;;  %v4498_v40 = vld [vmem:[%s3255_s26 + $0xe0] sm:$0xff]  ;;  %v4504_v39 = vld [vmem:[%s3255_s26 + $0xe8] sm:$0xff] }
  0xd2   : > { %6827 = vst [vmem:[#allocation14_spill] sm:$0xff] %v4498_v40  ;;  %v4510_v50 = vld [vmem:[%s3255_s26 + $0xf0] sm:$0xff]  ;;  %v4516_v9 = vld [vmem:[%s3255_s26 + $0xf8] sm:$0xff]  ;;  %v1015_v19 = vsel %vm270_vm5, %v983_v51, -inf  ;;  %v1016_v26 = vsel %vm270_vm5, %v984_v28, -inf  ;;  %v1024_v52 = vsel %vm270_vm5, %v985_v11, -inf }
  0xd3   : > { %6828 = vst [vmem:[#allocation16_spill] sm:$0xff] %v4504_v39  ;;  %v1017_v49 = vmax.f32 %v1015_v19, %v1016_v26  ;;  %v1025_v55 = vsel %vm270_vm5, %v986_v33, -inf  ;;  %v1033_v62 = vsel %vm270_vm5, %v987_v34, -inf  ;;  %v1034_v48 = vsel %vm270_vm5, %v988_v60, -inf }
  0xd4   : > { %6829 = vst [vmem:[#allocation17_spill] sm:$0xff] %v4510_v50  ;;  %v1026_v20 = vmax.f32 %v1024_v52, %v1025_v55  ;;  %v1042_v6 = vsel %vm270_vm5, %v989_v30, -inf  ;;  %v1043_v51 = vsel %vm270_vm5, %v990_v35, -inf  ;;  %v1035_v28 = vmax.f32 %v1033_v62, %v1034_v48 }
  0xd5   : > { %v1018_v13 = vrot.slane %v1017_v49, 4  ;;  %v1044_v26 = vmax.f32 %v1042_v6, %v1043_v51  ;;  %v1051_v19 = vsel %vm270_vm5, %v991_v46, -inf  ;;  %v1052_v36 = vsel %vm270_vm5, %v992_v31, -inf }
  0xd6   : > { %v1027_v23 = vrot.slane %v1026_v20, 4  ;;  %v1060_v11 = vsel %vm270_vm5, %v993_v43, -inf  ;;  %v1061_v33 = vsel %vm270_vm5, %v994_v21, -inf  ;;  %v1036_v55 = vrot.slane %v1035_v28, 4 }
  0xd7   : > { %v1019_v34 = vmax.f32 %v1017_v49, %v1018_v13  ;;  %v1045_v52 = vrot.slane %v1044_v26, 4  ;;  %v1053_v60 = vmax.f32 %v1051_v19, %v1052_v36  ;;  %v1062_v30 = vmax.f32 %v1060_v11, %v1061_v33 }
  0xd8   : > { %v1028_v63 = vmax.f32 %v1026_v20, %v1027_v23  ;;  %v1069_v35 = vsel %vm270_vm5, %v995_v16, -inf  ;;  %v1070_v46 = vsel %vm270_vm5, %v996_v58, -inf  ;;  %v1037_v31 = vmax.f32 %v1035_v28, %v1036_v55 }
  0xd9   : > { %v1020_v6 = vrot.slane %v1019_v34, 2  ;;  %v1046_v48 = vmax.f32 %v1044_v26, %v1045_v52  ;;  %v1054_v43 = vrot.slane %v1053_v60, 4  ;;  %v1063_v21 = vrot.slane %v1062_v30, 4 }
  0xda   : > { %v1029_v62 = vrot.slane %v1028_v63, 2  ;;  %v1071_v13 = vmax.f32 %v1069_v35, %v1070_v46  ;;  %v1078_v36 = vsel %vm270_vm5, %v997_v45, -inf  ;;  %v1038_v49 = vrot.slane %v1037_v31, 2 }
  0xdb   : > { %v1021_v23 = vmax.f32 %v1019_v34, %v1020_v6  ;;  %v1047_v20 = vrot.slane %v1046_v48, 2  ;;  %v1055_v51 = vmax.f32 %v1053_v60, %v1054_v43  ;;  %v1064_v19 = vmax.f32 %v1062_v30, %v1063_v21 }
  0xdc   : > { %v1030_v16 = vmax.f32 %v1028_v63, %v1029_v62  ;;  %v1072_v58 = vrot.slane %v1071_v13, 4  ;;  %v6830_v28 = vsel %vm4323_vm2, %v4420_v22, -inf  ;;  %v1039_v33 = vmax.f32 %v1037_v31, %v1038_v49 }
  0xdd   : > { %v1079_v26 = vsel %vm270_vm5, %v6830_v28, -inf  ;;  %v1022_v11 = vrot.slane %v1021_v23, 1  ;;  %v1048_v55 = vmax.f32 %v1046_v48, %v1047_v20  ;;  %v1056_v52 = vrot.slane %v1055_v51, 2 }
  0xde   : > { %v1031_v35 = vrot.slane %v1030_v16, 1  ;;  %v1065_v46 = vrot.slane %v1064_v19, 2  ;;  %v1073_v45 = vmax.f32 %v1071_v13, %v1072_v58  ;;  %v1080_v34 = vmax.f32 %v1078_v36, %v1079_v26 }
  0xdf   : > { %v4557_v6 = vmax.f32 %v1021_v23, %v1022_v11  ;;  %v1040_v60 = vrot.slane %v1039_v33, 1  ;;  %v1049_v63 = vrot.slane %v1048_v55, 1  ;;  %v1057_v30 = vmax.f32 %v1055_v51, %v1056_v52 }
  0xe0   : > { %v4559_v43 = vmax.f32 %v1030_v16, %v1031_v35  ;;  %v1066_v62 = vmax.f32 %v1064_v19, %v1065_v46  ;;  %v1074_v21 = vrot.slane %v1073_v45, 2  ;;  %v1081_v22 = vrot.slane %v1080_v34, 4 }
  0xe1   : > { %v4561_v17 = vmax.f32 %v1039_v33, %v1040_v60  ;;  %v4563_v28 = vmax.f32 %v1048_v55, %v1049_v63  ;;  %v1058_v31 = vrot.slane %v1057_v30, 1  ;;  %v6831_v48 = vsel %vm4314_vm1, %v4426_v47, -inf }
  0xe2   : > { %v1087_v13 = vsel %vm270_vm5, %v6831_v48, -inf  ;;  %v1067_v36 = vrot.slane %v1066_v62, 1  ;;  %v1075_v23 = vmax.f32 %v1073_v45, %v1074_v21  ;;  %v1082_v49 = vmax.f32 %v1080_v34, %v1081_v22 }
  0xe3   : > { %v6832_v20 = vsel %vm4323_vm2, %v4432_v0, -inf  ;;  %v4575_v16 = vmax.f32 %v1057_v30, %v1058_v31  ;;  %v6833_v58 = vsel %vm4314_vm1, %v4438_v12, -inf  ;;  %v6834_v11 = vsel %vm4323_vm2, %v4444_v15, -inf }
  0xe4   : > { %v1088_v51 = vsel %vm270_vm5, %v6832_v20, -inf  ;;  %v1096_v26 = vsel %vm270_vm5, %v6833_v58, -inf  ;;  %v1097_v22 = vsel %vm270_vm5, %v6834_v11, -inf  ;;  %v4587_v33 = vmax.f32 %v1066_v62, %v1067_v36 }
  0xe5   : > { %v1089_v19 = vmax.f32 %v1087_v13, %v1088_v51  ;;  %v1076_v55 = vrot.slane %v1075_v23, 1  ;;  %v1083_v52 = vrot.slane %v1082_v49, 2  ;;  %v1098_v35 = vmax.f32 %v1096_v26, %v1097_v22 }
  0xe6   : > { %v6835_v45 = vsel %vm4314_vm1, %v4450_v4, -inf  ;;  %v6836_v60 = vsel %vm4323_vm2, %v4456_v24, -inf  ;;  %v6837_v30 = vsel %vm4314_vm1, %v4462_v5, -inf  ;;  %v6838_v20 = vsel %vm4323_vm2, %v4468_v8, -inf }
  0xe7   : > { %v1090_v46 = vrot.slane %v1089_v19, 4  ;;  %v1105_v34 = vsel %vm270_vm5, %v6835_v45, -inf  ;;  %v1106_v63 = vsel %vm270_vm5, %v6836_v60, -inf  ;;  %v1114_v62 = vsel %vm270_vm5, %v6837_v30, -inf }
  0xe8   : > { %v4604_v21 = vmax.f32 %v1075_v23, %v1076_v55  ;;  %v1084_v31 = vmax.f32 %v1082_v49, %v1083_v52  ;;  %v1099_v48 = vrot.slane %v1098_v35, 4  ;;  %v1107_v13 = vmax.f32 %v1105_v34, %v1106_v63 }
  0xe9   : > { %v1091_v36 = vmax.f32 %v1089_v19, %v1090_v46  ;;  %v1115_v51 = vsel %vm270_vm5, %v6838_v20, -inf  ;;  %v6839_v58 = vsel %vm4314_vm1, %v4474_v3, -inf  ;;  %v6840_v23 = vsel %vm4323_vm2, %v4480_v7, -inf }
  0xea   : > { %v1123_v26 = vsel %vm270_vm5, %v6839_v58, -inf  ;;  %v1124_v49 = vsel %vm270_vm5, %v6840_v23, -inf  ;;  %v1085_v19 = vrot.slane %v1084_v31, 1  ;;  %v1100_v11 = vmax.f32 %v1098_v35, %v1099_v48 }
  0xeb   : > { %v1108_v22 = vrot.slane %v1107_v13, 4  ;;  %v1116_v55 = vmax.f32 %v1114_v62, %v1115_v51  ;;  %v1092_v52 = vrot.slane %v1091_v36, 2  ;;  %v1125_v46 = vmax.f32 %v1123_v26, %v1124_v49 }
  0xec   : > { %v6841_v45 = vsel %vm4314_vm1, %v4486_v37, -inf  ;;  %v6842_v60 = vsel %vm4323_vm2, %v4492_v54, -inf  ;;  %v4631_v30 = vmax.f32 %v1084_v31, %v1085_v19  ;;  %v1101_v35 = vrot.slane %v1100_v11, 2 }
  0xed   : > { %v1132_v34 = vsel %vm270_vm5, %v6841_v45, -inf  ;;  %v1133_v63 = vsel %vm270_vm5, %v6842_v60, -inf  ;;  %v1109_v48 = vmax.f32 %v1107_v13, %v1108_v22  ;;  %v1117_v62 = vrot.slane %v1116_v55, 4 }
  0xee   : > { %v1093_v20 = vmax.f32 %v1091_v36, %v1092_v52  ;;  %v1126_v51 = vrot.slane %v1125_v46, 4  ;;  %v1134_v58 = vmax.f32 %v1132_v34, %v1133_v63  ;;  %v6843_v26 = vsel %vm4314_vm1, %v4498_v40, -inf }
  0xef   : > { %v1141_v23 = vsel %vm270_vm5, %v6843_v26, -inf  ;;  %v1102_v49 = vmax.f32 %v1100_v11, %v1101_v35  ;;  %v1110_v45 = vrot.slane %v1109_v48, 2  ;;  %v1118_v60 = vmax.f32 %v1116_v55, %v1117_v62 }
  0xf0   : > { %v6844_v31 = vsel %vm4323_vm2, %v4504_v39, -inf  ;;  %v1094_v36 = vrot.slane %v1093_v20, 1  ;;  %v1127_v19 = vmax.f32 %v1125_v46, %v1126_v51  ;;  %v1135_v22 = vrot.slane %v1134_v58, 4 }
  0xf1   : > { %v1142_v13 = vsel %vm270_vm5, %v6844_v31, -inf  ;;  %v1103_v34 = vrot.slane %v1102_v49, 1  ;;  %v1111_v63 = vmax.f32 %v1109_v48, %v1110_v45  ;;  %v1119_v40 = vrot.slane %v1118_v60, 2 }
  0xf2   : > { %v1143_v52 = vmax.f32 %v1141_v23, %v1142_v13  ;;  %v6845_v11 = vsel %vm4314_vm1, %v4510_v50, -inf  ;;  %v1095_v35 = vmax.f32 %v1093_v20, %v1094_v36  ;;  %v1128_v62 = vrot.slane %v1127_v19, 2 }
  0xf3   : > { %v1150_v55 = vsel %vm270_vm5, %v6845_v11, -inf  ;;  %v1136_v26 = vmax.f32 %v1134_v58, %v1135_v22  ;;  %v1104_v46 = vmax.f32 %v1102_v49, %v1103_v34  ;;  %v1112_v51 = vrot.slane %v1111_v63, 1 }
  0xf4   : > { %v1144_v31 = vrot.slane %v1143_v52, 4  ;;  %v1120_v23 = vmax.f32 %v1118_v60, %v1119_v40  ;;  %v6846_v48 = vsel %vm4323_vm2, %v4516_v9, -inf  ;;  %v1129_v45 = vmax.f32 %v1127_v19, %v1128_v62 }
  0xf5   : > { %v1151_v25 = vsel %vm270_vm5, %v6846_v48, -inf  ;;  %v1137_v13 = vrot.slane %v1136_v26, 2  ;;  %v1113_v20 = vmax.f32 %v1111_v63, %v1112_v51  ;;  %v1161_v39 = vstv %s1160_s13  ;;  %s6133_s13 = sld [smem:[#allocation8 + %s3935_s8]] }
  0xf6   : > { %v1145_v11 = vmax.f32 %v1143_v52, %v1144_v31  ;;  %v1152_v50 = vmax.f32 %v1150_v55, %v1151_v25  ;;  %v1121_v36 = vrot.slane %v1120_v23, 1  ;;  %v6847_v58 = vstv %s4268_s1  ;;  %s6014_s1 = sld [smem:[#allocation8 + %s3626_s28]] }
  0xf7   : > { %vm4664_vm3 = vcmp.ge.s32.totalorder %v3244_v1, %v6847_v58  ;;  %v1130_v56 = vrot.slane %v1129_v45, 1  ;;  %v1138_v40 = vmax.f32 %v1136_v26, %v1137_v13  ;;  %vm4671_vm4 = vcmp.eq.s32.totalorder %v1161_v39, 1  ;;  %s6122_s28 = sld [smem:[#allocation7 + %s3935_s8]] }
  0xf8   : > { %v1146_v60 = vrot.slane %v1145_v11, 2  ;;  %v1153_v19 = vrot.slane %v1152_v50, 4  ;;  %v1122_v22 = vmax.f32 %v1120_v23, %v1121_v36  ;;  %v6852_v34 = vmov %v6847_v58 }
  0xf9   : > { %vm4678_vm6 = vcmp.ge.s32.totalorder %v3258_v2, %v6852_v34  ;;  %v1220_v55 = vstv %s4646_s12  ;;  %v1131_v62 = vmax.f32 %v1129_v45, %v1130_v56  ;;  %v1139_v31 = vrot.slane %v1138_v40, 1 }
  0xfa   : > { %v1147_v51 = vmax.f32 %v1145_v11, %v1146_v60  ;;  %v1154_v48 = vmax.f32 %v1152_v50, %v1153_v19  ;;  %v1163_v39 = vsel %vm4671_vm4, %v4557_v6, 0.0  ;;  %v1164_v26 = vsel %vm4671_vm4, %v4559_v43, 0.0 }
  0xfb   : > { %v1165_v23 = vsel %vm4671_vm4, %v4561_v17, 0.0  ;;  %v1166_v25 = vsel %vm4671_vm4, %v4563_v28, 0.0  ;;  %v1140_v45 = vmax.f32 %v1138_v40, %v1139_v31  ;;  %v1167_v11 = vsel %vm4671_vm4, %v4575_v16, 0.0 }
  0xfc   : > { %v1148_v50 = vrot.slane %v1147_v51, 1  ;;  %v1155_v13 = vrot.slane %v1154_v48, 2  ;;  %v1168_v6 = vsel %vm4671_vm4, %v4587_v33, 0.0  ;;  %v1169_v43 = vsel %vm4671_vm4, %v4604_v21, 0.0  ;;  %p2321_p1 = scmp.gt.s32.totalorder %s6014_s1, %s5893_s20 }
  0xfd   : > { %v1170_v17 = vsel %vm4671_vm4, %v4631_v30, 0.0  ;;  %v1171_v28 = vsel %vm4671_vm4, %v1095_v35, 0.0  ;;  %v1172_v16 = vsel %vm4671_vm4, %v1104_v46, 0.0  ;;  %v1173_v56 = vsel %vm4671_vm4, %v1113_v20, 0.0  ;;  %p2453_p2 = scmp.gt.s32.totalorder %s6133_s13, %s6122_s28 }
  0xfe   : > { %v1149_v36 = vmax.f32 %v1147_v51, %v1148_v50  ;;  %v1156_v58 = vmax.f32 %v1154_v48, %v1155_v13  ;;  %v1174_v33 = vsel %vm4671_vm4, %v1122_v22, 0.0  ;;  %v1175_v21 = vsel %vm4671_vm4, %v1131_v62, 0.0  ;;  %v6862_v48 = vld [vmem:[#allocation16_spill] sm:$0xff]  ;;  %s2322_s12 = scalar_select %p2321_p1, 1, 0 }
  0xff   : > { %v1176_v30 = vsel %vm4671_vm4, %v1140_v45, 0.0  ;;  %v1195_v35 = vsel %vm451_vm10, %v1164_v26, %v1163_v39  ;;  %v1202_v20 = vsel %vm451_vm10, %v1172_v16, %v1171_v28  ;;  %vm1221_vm7 = vcmp.lt.s32.totalorder %v3244_v1, %v1220_v55  ;;  %s6158_s8 = scalar_select %p2453_p2, 1, 0 }
 0x100   : > { %v1157_v40 = vrot.slane %v1156_v58, 1  ;;  %v1177_v60 = vsel %vm4671_vm4, %v1149_v36, 0.0  ;;  %v1196_v46 = vsel %vm453_vm11, %v1165_v23, %v1195_v35  ;;  %v1203_v22 = vsel %vm453_vm11, %v1173_v56, %v1202_v20  ;;  %vm4735_vm9 = vmand %vm4664_vm3, %vm1221_vm7  ;;  %v6859_v35 = vld [vmem:[#allocation12_spill] sm:$0xff] }
 0x101   : > { %v1197_v19 = vsel %vm455_vm12, %v1166_v25, %v1196_v46  ;;  %vm1222_vm8 = vcmp.lt.s32.totalorder %v3258_v2, %v1220_v55  ;;  %v1204_v31 = vsel %vm455_vm12, %v1174_v33, %v1203_v22  ;;  %v1229_v23 = vsel %vm4735_vm9, %v4328_v61, -inf }
 0x102   : > { %v1158_v34 = vmax.f32 %v1156_v58, %v1157_v40  ;;  %v1198_v62 = vsel %vm457_vm13, %v1167_v11, %v1197_v19  ;;  %v1205_v26 = vsel %vm457_vm13, %v1175_v21, %v1204_v31  ;;  %vm4744_vm1 = vmand %vm4678_vm6, %vm1222_vm8  ;;  %v1231_v49 = vsel %vm4735_vm9, %v4334_v10, -inf }
 0x103   : > { %v1199_v39 = vsel %vm459_vm14, %v1168_v6, %v1198_v62  ;;  %v1206_v50 = vsel %vm459_vm14, %v1176_v30, %v1205_v26  ;;  %v1230_v63 = vsel %vm4744_vm1, %v4341_v27, -inf  ;;  %v1232_v6 = vsel %vm4744_vm1, %v4347_v32, -inf  ;;  %v6863_v26 = vld [vmem:[#allocation17_spill] sm:$0xff] }
 0x104   : > { %v1178_v25 = vsel %vm4671_vm4, %v1158_v34, 0.0  ;;  %v1200_v45 = vsel %vm461_vm15, %v1169_v43, %v1199_v39  ;;  %v1207_v11 = vsel %vm461_vm15, %v1177_v60, %v1206_v50  ;;  %v1233_v52 = vsel %vm4735_vm9, %v4353_v38, -inf  ;;  %v6860_v60 = vld [vmem:[#allocation13_spill] sm:$0xff] }
 0x105   : > { %v1201_v13 = vsel %vm463_vm0, %v1170_v17, %v1200_v45  ;;  %v1208_v43 = vsel %vm463_vm0, %v1178_v25, %v1207_v11  ;;  %v1234_v28 = vsel %vm4744_vm1, %v4359_v53, -inf  ;;  %v1235_v17 = vsel %vm4735_vm9, %v4366_v14, -inf  ;;  %v6861_v11 = vld [vmem:[#allocation14_spill] sm:$0xff] }
 0x106   : > { %1212 = vst.msk [vmem:[#allocation2 + $0x30] sm:$0xff] %vm270_vm5, %v1201_v13  ;;  %v1236_v36 = vsel %vm4744_vm1, %v4372_v18, -inf  ;;  %v1237_v58 = vsel %vm4735_vm9, %v4378_v41, -inf  ;;  %v1238_v16 = vsel %vm4744_vm1, %v4384_v57, -inf  ;;  %v1239_v56 = vsel %vm4735_vm9, %v4390_v59, -inf }
 0x107   : > { %1213 = vst.msk [vmem:[#allocation2 + $0x38] sm:$0xff] %vm270_vm5, %v1208_v43  ;;  %v1240_v33 = vsel %vm4744_vm1, %v4396_v29, -inf  ;;  %v1241_v21 = vsel %vm4735_vm9, %v4402_v44, -inf  ;;  %v1242_v30 = vsel %vm4744_vm1, %v4408_v42, -inf  ;;  %v1243_v40 = vsel %vm4735_vm9, %v6859_v35, -inf }
 0x108   : > { %v1244_v46 = vsel %vm4744_vm1, %v6860_v60, -inf  ;;  %v1261_v39 = vsel %vm270_vm5, %v1229_v23, -inf  ;;  %v1262_v13 = vsel %vm270_vm5, %v1230_v63, -inf  ;;  %v1270_v31 = vsel %vm270_vm5, %v1231_v49, -inf }
 0x109   : > { %v1271_v43 = vsel %vm270_vm5, %v1232_v6, -inf  ;;  %v1263_v62 = vmax.f32 %v1261_v39, %v1262_v13  ;;  %v1279_v25 = vsel %vm270_vm5, %v1233_v52, -inf  ;;  %v1280_v22 = vsel %vm270_vm5, %v1234_v28, -inf }
 0x10a   : > { %v1272_v34 = vmax.f32 %v1270_v31, %v1271_v43  ;;  %v1281_v19 = vmax.f32 %v1279_v25, %v1280_v22  ;;  %v1288_v45 = vsel %vm270_vm5, %v1235_v17, -inf  ;;  %v1289_v20 = vsel %vm270_vm5, %v1236_v36, -inf }
 0x10b   : > { %v1297_v50 = vsel %vm270_vm5, %v1237_v58, -inf  ;;  %v1264_v23 = vrot.slane %v1263_v62, 4  ;;  %v1290_v63 = vmax.f32 %v1288_v45, %v1289_v20  ;;  %v1298_v49 = vsel %vm270_vm5, %v1238_v16, -inf }
 0x10c   : > { %v1273_v60 = vrot.slane %v1272_v34, 4  ;;  %v1282_v35 = vrot.slane %v1281_v19, 4  ;;  %v1299_v6 = vmax.f32 %v1297_v50, %v1298_v49  ;;  %v1306_v31 = vsel %vm270_vm5, %v1239_v56, -inf }
 0x10d   : > { %v1307_v52 = vsel %vm270_vm5, %v1240_v33, -inf  ;;  %v1265_v39 = vmax.f32 %v1263_v62, %v1264_v23  ;;  %v1291_v22 = vrot.slane %v1290_v63, 4  ;;  %v1315_v36 = vsel %vm270_vm5, %v1241_v21, -inf }
 0x10e   : > { %v1274_v28 = vmax.f32 %v1272_v34, %v1273_v60  ;;  %v1308_v25 = vmax.f32 %v1306_v31, %v1307_v52  ;;  %v1283_v17 = vmax.f32 %v1281_v19, %v1282_v35  ;;  %v1300_v13 = vrot.slane %v1299_v6, 4 }
 0x10f   : > { %v1316_v58 = vsel %vm270_vm5, %v1242_v30, -inf  ;;  %v1266_v43 = vrot.slane %v1265_v39, 2  ;;  %v1292_v45 = vmax.f32 %v1290_v63, %v1291_v22  ;;  %v1324_v56 = vsel %vm270_vm5, %v1243_v40, -inf }
 0x110   : > { %v1275_v20 = vrot.slane %v1274_v28, 2  ;;  %v1309_v16 = vrot.slane %v1308_v25, 4  ;;  %v1284_v42 = vrot.slane %v1283_v17, 2  ;;  %v1301_v50 = vmax.f32 %v1299_v6, %v1300_v13 }
 0x111   : > { %v1317_v49 = vmax.f32 %v1315_v36, %v1316_v58  ;;  %v1267_v33 = vmax.f32 %v1265_v39, %v1266_v43  ;;  %v1293_v60 = vrot.slane %v1292_v45, 2  ;;  %v1325_v21 = vsel %vm270_vm5, %v1244_v46, -inf }
 0x112   : > { %v1276_v62 = vmax.f32 %v1274_v28, %v1275_v20  ;;  %v1310_v34 = vmax.f32 %v1308_v25, %v1309_v16  ;;  %v1285_v23 = vmax.f32 %v1283_v17, %v1284_v42  ;;  %v1302_v35 = vrot.slane %v1301_v50, 2 }
 0x113   : > { %v1318_v19 = vrot.slane %v1317_v49, 4  ;;  %v1268_v31 = vrot.slane %v1267_v33, 1  ;;  %v1294_v52 = vmax.f32 %v1292_v45, %v1293_v60  ;;  %v1326_v6 = vmax.f32 %v1324_v56, %v1325_v21 }
 0x114   : > { %v1277_v30 = vrot.slane %v1276_v62, 1  ;;  %v1311_v44 = vrot.slane %v1310_v34, 2  ;;  %v1286_v63 = vrot.slane %v1285_v23, 1  ;;  %v1303_v22 = vmax.f32 %v1301_v50, %v1302_v35 }
 0x115   : > { %v1319_v29 = vmax.f32 %v1317_v49, %v1318_v19  ;;  %v4869_v13 = vmax.f32 %v1267_v33, %v1268_v31  ;;  %v1295_v39 = vrot.slane %v1294_v52, 1  ;;  %v1327_v36 = vrot.slane %v1326_v6, 4 }
 0x116   : > { %v4871_v40 = vmax.f32 %v1276_v62, %v1277_v30  ;;  %v1312_v28 = vmax.f32 %v1310_v34, %v1311_v44  ;;  %v4873_v25 = vmax.f32 %v1285_v23, %v1286_v63  ;;  %v1304_v42 = vrot.slane %v1303_v22, 1 }
 0x117   : > { %v1320_v17 = vrot.slane %v1319_v29, 2  ;;  %v4875_v46 = vmax.f32 %v1294_v52, %v1295_v39  ;;  %v6864_v43 = vsel %vm4735_vm9, %v4426_v47, -inf  ;;  %v6865_v45 = vsel %vm4744_vm1, %v4432_v0, -inf }
 0x118   : > { %v1313_v58 = vrot.slane %v1312_v28, 1  ;;  %v1333_v20 = vsel %vm270_vm5, %v6864_v43, -inf  ;;  %v1334_v44 = vsel %vm270_vm5, %v6865_v45, -inf  ;;  %v4887_v16 = vmax.f32 %v1303_v22, %v1304_v42 }
 0x119   : > { %v1321_v50 = vmax.f32 %v1319_v29, %v1320_v17  ;;  %v1328_v49 = vmax.f32 %v1326_v6, %v1327_v36  ;;  %v1335_v56 = vmax.f32 %v1333_v20, %v1334_v44  ;;  %v6866_v62 = vsel %vm4735_vm9, %v4438_v12, -inf }
 0x11a   : > { %v4889_v33 = vmax.f32 %v1312_v28, %v1313_v58  ;;  %v1342_v60 = vsel %vm270_vm5, %v6866_v62, -inf  ;;  %v6867_v34 = vsel %vm4744_vm1, %v4444_v15, -inf  ;;  %v6868_v29 = vsel %vm4735_vm9, %v4450_v4, -inf }
 0x11b   : > { %v1343_v23 = vsel %vm270_vm5, %v6867_v34, -inf  ;;  %v1351_v35 = vsel %vm270_vm5, %v6868_v29, -inf  ;;  %v1322_v19 = vrot.slane %v1321_v50, 1  ;;  %v1329_v21 = vrot.slane %v1328_v49, 2 }
 0x11c   : > { %v1336_v31 = vrot.slane %v1335_v56, 4  ;;  %v1344_v30 = vmax.f32 %v1342_v60, %v1343_v23  ;;  %v6869_v52 = vsel %vm4744_vm1, %v4456_v24, -inf  ;;  %v6870_v22 = vsel %vm4735_vm9, %v4462_v5, -inf }
 0x11d   : > { %v1352_v63 = vsel %vm270_vm5, %v6869_v52, -inf  ;;  %v1360_v6 = vsel %vm270_vm5, %v6870_v22, -inf  ;;  %v6871_v39 = vsel %vm4744_vm1, %v4468_v8, -inf  ;;  %v6872_v42 = vsel %vm4735_vm9, %v4474_v3, -inf }
 0x11e   : > { %v1361_v28 = vsel %vm270_vm5, %v6871_v39, -inf  ;;  %v1369_v17 = vsel %vm270_vm5, %v6872_v42, -inf  ;;  %v4926_v36 = vmax.f32 %v1321_v50, %v1322_v19  ;;  %v1330_v58 = vmax.f32 %v1328_v49, %v1329_v21 }
 0x11f   : > { %v1337_v43 = vmax.f32 %v1335_v56, %v1336_v31  ;;  %v1345_v20 = vrot.slane %v1344_v30, 4  ;;  %v1353_v45 = vmax.f32 %v1351_v35, %v1352_v63  ;;  %v1362_v44 = vmax.f32 %v1360_v6, %v1361_v28 }
 0x120   : > { %v6873_v62 = vsel %vm4744_vm1, %v4480_v7, -inf  ;;  %v6874_v34 = vsel %vm4735_vm9, %v4486_v37, -inf  ;;  %v1331_v23 = vrot.slane %v1330_v58, 1  ;;  %v6875_v35 = vsel %vm4744_vm1, %v4492_v54, -inf }
 0x121   : > { %v1370_v60 = vsel %vm270_vm5, %v6873_v62, -inf  ;;  %v1378_v50 = vsel %vm270_vm5, %v6874_v34, -inf  ;;  %v1338_v29 = vrot.slane %v1337_v43, 2  ;;  %v1346_v19 = vmax.f32 %v1344_v30, %v1345_v20 }
 0x122   : > { %v1371_v49 = vmax.f32 %v1369_v17, %v1370_v60  ;;  %v1354_v56 = vrot.slane %v1353_v45, 4  ;;  %v1363_v21 = vrot.slane %v1362_v44, 4  ;;  %v1379_v31 = vsel %vm270_vm5, %v6875_v35, -inf }
 0x123   : > { %v6876_v52 = vsel %vm4735_vm9, %v6861_v11, -inf  ;;  %v4950_v22 = vmax.f32 %v1330_v58, %v1331_v23  ;;  %v1339_v30 = vmax.f32 %v1337_v43, %v1338_v29  ;;  %v1347_v6 = vrot.slane %v1346_v19, 2 }
 0x124   : > { %v1387_v63 = vsel %vm270_vm5, %v6876_v52, -inf  ;;  %v1372_v39 = vrot.slane %v1371_v49, 4  ;;  %v1355_v28 = vmax.f32 %v1353_v45, %v1354_v56  ;;  %v1364_v42 = vmax.f32 %v1362_v44, %v1363_v21 }
 0x125   : > { %v1380_v17 = vmax.f32 %v1378_v50, %v1379_v31  ;;  %v6877_v20 = vsel %vm4744_vm1, %v6862_v48, -inf  ;;  %v1340_v60 = vrot.slane %v1339_v30, 1  ;;  %v1348_v34 = vmax.f32 %v1346_v19, %v1347_v6 }
 0x126   : > { %v1388_v62 = vsel %vm270_vm5, %v6877_v20, -inf  ;;  %v1373_v35 = vmax.f32 %v1371_v49, %v1372_v39  ;;  %v1356_v58 = vrot.slane %v1355_v28, 2  ;;  %v1365_v23 = vrot.slane %v1364_v42, 2 }
 0x127   : > { %v1389_v52 = vmax.f32 %v1387_v63, %v1388_v62  ;;  %v1381_v11 = vrot.slane %v1380_v17, 4  ;;  %v6878_v43 = vsel %vm4735_vm9, %v6863_v26, -inf  ;;  %v1341_v44 = vmax.f32 %v1339_v30, %v1340_v60 }
 0x128   : > { %v1396_v45 = vsel %vm270_vm5, %v6878_v43, -inf  ;;  %v1349_v50 = vrot.slane %v1348_v34, 1  ;;  %v1374_v29 = vrot.slane %v1373_v35, 2  ;;  %v1357_v21 = vmax.f32 %v1355_v28, %v1356_v58 }
 0x129   : > { %v1390_v56 = vrot.slane %v1389_v52, 4  ;;  %v1366_v31 = vmax.f32 %v1364_v42, %v1365_v23  ;;  %v1382_v19 = vmax.f32 %v1380_v17, %v1381_v11  ;;  %v6879_v49 = vsel %vm4744_vm1, %v4516_v9, -inf }
 0x12a   : > { %v1397_v63 = vsel %vm270_vm5, %v6879_v49, -inf  ;;  %v1350_v51 = vmax.f32 %v1348_v34, %v1349_v50  ;;  %v1375_v6 = vmax.f32 %v1373_v35, %v1374_v29  ;;  %v1358_v62 = vrot.slane %v1357_v21, 1 }
 0x12b   : > { %v1391_v39 = vmax.f32 %v1389_v52, %v1390_v56  ;;  %v1398_v20 = vmax.f32 %v1396_v45, %v1397_v63  ;;  %v1367_v43 = vrot.slane %v1366_v31, 1  ;;  %v1383_v30 = vrot.slane %v1382_v19, 2 }
 0x12c   : > { %v1407_v60 = vstv %s1406_s18  ;;  %v1376_v26 = vrot.slane %v1375_v6, 1  ;;  %v1359_v55 = vmax.f32 %v1357_v21, %v1358_v62  ;;  %s6254_s18 = sld [smem:[#allocation8 + %s4244_s0]] }
 0x12d   : > { %v1392_v28 = vrot.slane %v1391_v39, 2  ;;  %v1399_v42 = vrot.slane %v1398_v20, 4  ;;  %vm4970_vm2 = vcmp.eq.s32.totalorder %v1407_v60, 1  ;;  %v1368_v17 = vmax.f32 %v1366_v31, %v1367_v43 }
 0x12e   : > { %v1384_v58 = vmax.f32 %v1382_v19, %v1383_v30  ;;  %v1409_v34 = vsel %vm4970_vm2, %v4869_v13, 0.0  ;;  %v1377_v35 = vmax.f32 %v1375_v6, %v1376_v26  ;;  %v1410_v45 = vsel %vm4970_vm2, %v4871_v40, 0.0 }
 0x12f   : > { %v1393_v52 = vmax.f32 %v1391_v39, %v1392_v28  ;;  %v1400_v23 = vmax.f32 %v1398_v20, %v1399_v42  ;;  %v1411_v29 = vsel %vm4970_vm2, %v4873_v25, 0.0  ;;  %v1412_v26 = vsel %vm4970_vm2, %v4875_v46, 0.0 }
 0x130   : > { %v1385_v50 = vrot.slane %v1384_v58, 1  ;;  %v1413_v13 = vsel %vm4970_vm2, %v4887_v16, 0.0  ;;  %v1414_v21 = vsel %vm4970_vm2, %v4889_v33, 0.0  ;;  %v1415_v31 = vsel %vm4970_vm2, %v4926_v36, 0.0 }
 0x131   : > { %v1394_v56 = vrot.slane %v1393_v52, 1  ;;  %v1401_v40 = vrot.slane %v1400_v23, 2  ;;  %v1416_v25 = vsel %vm4970_vm2, %v4950_v22, 0.0  ;;  %v1417_v46 = vsel %vm4970_vm2, %v1341_v44, 0.0 }
 0x132   : > { %v1386_v19 = vmax.f32 %v1384_v58, %v1385_v50  ;;  %v1418_v16 = vsel %vm4970_vm2, %v1350_v51, 0.0  ;;  %v1419_v36 = vsel %vm4970_vm2, %v1359_v55, 0.0  ;;  %v1420_v63 = vsel %vm4970_vm2, %v1368_v17, 0.0  ;;  %v6895_v55 = vld [vmem:[#allocation14_spill] sm:$0xff] }
 0x133   : > { %v1395_v33 = vmax.f32 %v1393_v52, %v1394_v56  ;;  %v1402_v49 = vmax.f32 %v1400_v23, %v1401_v40  ;;  %v1421_v22 = vsel %vm4970_vm2, %v1377_v35, 0.0  ;;  %v1441_v51 = vsel %vm451_vm10, %v1410_v45, %v1409_v34 }
 0x134   : > { %v1422_v44 = vsel %vm4970_vm2, %v1386_v19, 0.0  ;;  %v1448_v6 = vsel %vm451_vm10, %v1418_v16, %v1417_v46  ;;  %v1442_v62 = vsel %vm453_vm11, %v1411_v29, %v1441_v51  ;;  %v6882_v28 = vstv %s4684_s16  ;;  %v6890_v16 = vld [vmem:[#allocation10_spill] sm:$0xff]  ;;  %s6248_s16 = sld [smem:[#allocation7 + %s4244_s0]] }
 0x135   : > { %v1403_v39 = vrot.slane %v1402_v49, 1  ;;  %v1423_v20 = vsel %vm4970_vm2, %v1395_v33, 0.0  ;;  %v1449_v43 = vsel %vm453_vm11, %v1419_v36, %v1448_v6  ;;  %v1443_v30 = vsel %vm455_vm12, %v1412_v26, %v1442_v62  ;;  %v6891_v33 = vld [vmem:[#allocation15_spill] sm:$0xff]  ;;  %v6893_v36 = vld [vmem:[#allocation12_spill] sm:$0xff] }
 0x136   : > { %v1450_v60 = vsel %vm455_vm12, %v1420_v63, %v1449_v43  ;;  %vm1464_vm3 = vcmp.ge.s32.totalorder %v3244_v1, %v6882_v28  ;;  %v6883_v42 = vmov %v6882_v28  ;;  %v1444_v58 = vsel %vm457_vm13, %v1413_v13, %v1443_v30  ;;  %v6894_v63 = vld [vmem:[#allocation13_spill] sm:$0xff] }
 0x137   : > { %vm5033_vm4 = vcmp.ge.s32.totalorder %v3258_v2, %v6883_v42  ;;  %v1404_v17 = vmax.f32 %v1402_v49, %v1403_v39  ;;  %v1451_v34 = vsel %vm457_vm13, %v1421_v22, %v1450_v60  ;;  %v1466_v35 = vstv %s4981_s19  ;;  %v6892_v49 = vld [vmem:[#allocation11_spill] sm:$0xff]  ;;  %s6369_s19 = sld [smem:[#allocation7 + %s4669_s14]] }
 0x138   : > { %v1445_v52 = vsel %vm459_vm14, %v1414_v21, %v1444_v58  ;;  %v1452_v23 = vsel %vm459_vm14, %v1422_v44, %v1451_v34  ;;  %vm1467_vm6 = vcmp.lt.s32.totalorder %v3244_v1, %v1466_v35  ;;  %vm1468_vm7 = vcmp.lt.s32.totalorder %v3258_v2, %v1466_v35  ;;  %v6896_v34 = vld [vmem:[#allocation17_spill] sm:$0xff] }
 0x139   : > { %v1424_v45 = vsel %vm4970_vm2, %v1404_v17, 0.0  ;;  %v1446_v50 = vsel %vm461_vm15, %v1415_v31, %v1445_v52  ;;  %v1453_v29 = vsel %vm461_vm15, %v1423_v20, %v1452_v23  ;;  %vm5048_vm8 = vmand %vm1464_vm3, %vm1467_vm6 }
 0x13a   : > { %v1447_v13 = vsel %vm463_vm0, %v1416_v25, %v1446_v50  ;;  %v1454_v56 = vsel %vm463_vm0, %v1424_v45, %v1453_v29  ;;  %vm5056_vm9 = vmand %vm5033_vm4, %vm1468_vm7  ;;  %v1475_v11 = vsel %vm5048_vm8, %v4328_v61, -inf  ;;  %v1477_v19 = vsel %vm5048_vm8, %v4334_v10, -inf  ;;  %p2585_p3 = scmp.gt.s32.totalorder %s6254_s18, %s6248_s16 }
 0x13b   : > { %1458 = vst.msk [vmem:[#allocation2 + $0x40] sm:$0xff] %vm270_vm5, %v1447_v13  ;;  %v1476_v31 = vsel %vm5056_vm9, %v4341_v27, -inf  ;;  %v1478_v25 = vsel %vm5056_vm9, %v4347_v32, -inf  ;;  %v1479_v46 = vsel %vm5048_vm8, %v4353_v38, -inf  ;;  %v1480_v61 = vsel %vm5056_vm9, %v4359_v53, -inf }
 0x13c   : > { %1459 = vst.msk [vmem:[#allocation2 + $0x48] sm:$0xff] %vm270_vm5, %v1454_v56  ;;  %v1481_v27 = vsel %vm5048_vm8, %v4366_v14, -inf  ;;  %v1482_v10 = vsel %vm5056_vm9, %v4372_v18, -inf  ;;  %v1483_v32 = vsel %vm5048_vm8, %v4378_v41, -inf  ;;  %v1484_v38 = vsel %vm5056_vm9, %v4384_v57, -inf }
 0x13d   : > { %v1485_v53 = vsel %vm5048_vm8, %v4390_v59, -inf  ;;  %v1486_v14 = vsel %vm5056_vm9, %v6890_v16, -inf  ;;  %v1487_v18 = vsel %vm5048_vm8, %v6891_v33, -inf  ;;  %v1488_v41 = vsel %vm5056_vm9, %v6892_v49, -inf  ;;  %s6282_s0 = scalar_select %p2585_p3, 1, 0 }
 0x13e   : > { %v1489_v57 = vsel %vm5048_vm8, %v6893_v36, -inf  ;;  %v1490_v59 = vsel %vm5056_vm9, %v6894_v63, -inf  ;;  %v1491_v22 = vsel %vm5048_vm8, %v4426_v47, -inf  ;;  %v1492_v44 = vsel %vm5056_vm9, %v4432_v0, -inf }
 0x13f   : > { %v1493_v51 = vsel %vm5048_vm8, %v4438_v12, -inf  ;;  %v1494_v6 = vsel %vm5056_vm9, %v4444_v15, -inf  ;;  %v1495_v39 = vsel %vm5048_vm8, %v4450_v4, -inf  ;;  %v1496_v20 = vsel %vm5056_vm9, %v4456_v24, -inf }
 0x140   : > { %v1497_v62 = vsel %vm5048_vm8, %v4462_v5, -inf  ;;  %v1498_v43 = vsel %vm5056_vm9, %v4468_v8, -inf  ;;  %v1499_v30 = vsel %vm5048_vm8, %v4474_v3, -inf  ;;  %v1500_v60 = vsel %vm5056_vm9, %v4480_v7, -inf }
 0x141   : > { %v1501_v28 = vsel %vm5048_vm8, %v4486_v37, -inf  ;;  %v1502_v42 = vsel %vm5056_vm9, %v4492_v54, -inf  ;;  %v1507_v52 = vsel %vm270_vm5, %v1475_v11, -inf  ;;  %v1508_v23 = vsel %vm270_vm5, %v1476_v31, -inf }
 0x142   : > { %v1509_v45 = vmax.f32 %v1507_v52, %v1508_v23  ;;  %v1516_v50 = vsel %vm270_vm5, %v1477_v19, -inf  ;;  %v1517_v29 = vsel %vm270_vm5, %v1478_v25, -inf  ;;  %v1525_v13 = vsel %vm270_vm5, %v1479_v46, -inf }
 0x143   : > { %v1518_v56 = vmax.f32 %v1516_v50, %v1517_v29  ;;  %v1526_v16 = vsel %vm270_vm5, %v1480_v61, -inf  ;;  %v1534_v33 = vsel %vm270_vm5, %v1481_v27, -inf  ;;  %v1535_v49 = vsel %vm270_vm5, %v1482_v10, -inf }
 0x144   : > { %v1510_v36 = vrot.slane %v1509_v45, 4  ;;  %v1527_v63 = vmax.f32 %v1525_v13, %v1526_v16  ;;  %v1536_v21 = vmax.f32 %v1534_v33, %v1535_v49  ;;  %v1543_v11 = vsel %vm270_vm5, %v1483_v32, -inf }
 0x145   : > { %v1519_v31 = vrot.slane %v1518_v56, 4  ;;  %v1544_v52 = vsel %vm270_vm5, %v1484_v38, -inf  ;;  %v1552_v19 = vsel %vm270_vm5, %v1485_v53, -inf  ;;  %v1553_v25 = vsel %vm270_vm5, %v1486_v14, -inf }
 0x146   : > { %v1511_v46 = vmax.f32 %v1509_v45, %v1510_v36  ;;  %v1528_v23 = vrot.slane %v1527_v63, 4  ;;  %v1537_v50 = vrot.slane %v1536_v21, 4  ;;  %v1545_v61 = vmax.f32 %v1543_v11, %v1544_v52 }
 0x147   : > { %v1520_v29 = vmax.f32 %v1518_v56, %v1519_v31  ;;  %v1554_v27 = vmax.f32 %v1552_v19, %v1553_v25  ;;  %v1561_v10 = vsel %vm270_vm5, %v1487_v18, -inf  ;;  %v1562_v13 = vsel %vm270_vm5, %v1488_v41, -inf }
 0x148   : > { %v1512_v16 = vrot.slane %v1511_v46, 2  ;;  %v1529_v33 = vmax.f32 %v1527_v63, %v1528_v23  ;;  %v1538_v32 = vmax.f32 %v1536_v21, %v1537_v50  ;;  %v1546_v49 = vrot.slane %v1545_v61, 4 }
 0x149   : > { %v1521_v35 = vrot.slane %v1520_v29, 2  ;;  %v1555_v38 = vrot.slane %v1554_v27, 4  ;;  %v1563_v58 = vmax.f32 %v1561_v10, %v1562_v13  ;;  %v1570_v53 = vsel %vm270_vm5, %v1489_v57, -inf }
 0x14a   : > { %v1513_v14 = vmax.f32 %v1511_v46, %v1512_v16  ;;  %v1530_v45 = vrot.slane %v1529_v33, 2  ;;  %v1539_v36 = vrot.slane %v1538_v32, 2  ;;  %v1547_v17 = vmax.f32 %v1545_v61, %v1546_v49 }
 0x14b   : > { %v1522_v11 = vmax.f32 %v1520_v29, %v1521_v35  ;;  %v1556_v56 = vmax.f32 %v1554_v27, %v1555_v38  ;;  %v1564_v31 = vrot.slane %v1563_v58, 4  ;;  %v1571_v18 = vsel %vm270_vm5, %v1490_v59, -inf }
 0x14c   : > { %v1514_v52 = vrot.slane %v1513_v14, 1  ;;  %v1531_v41 = vmax.f32 %v1529_v33, %v1530_v45  ;;  %v1540_v19 = vmax.f32 %v1538_v32, %v1539_v36  ;;  %v1548_v63 = vrot.slane %v1547_v17, 2 }
 0x14d   : > { %v1523_v21 = vrot.slane %v1522_v11, 1  ;;  %v1557_v25 = vrot.slane %v1556_v56, 2  ;;  %v1565_v23 = vmax.f32 %v1563_v58, %v1564_v31  ;;  %v1572_v50 = vmax.f32 %v1570_v53, %v1571_v18 }
 0x14e   : > { %v1506_v57 = vsel %vm5056_vm9, %v4516_v9, -inf  ;;  %v1532_v46 = vrot.slane %v1531_v41, 1  ;;  %v1541_v10 = vrot.slane %v1540_v19, 1  ;;  %v1549_v61 = vmax.f32 %v1547_v17, %v1548_v63 }
 0x14f   : > { %v5175_v35 = vmax.f32 %v1513_v14, %v1514_v52  ;;  %v1558_v29 = vmax.f32 %v1556_v56, %v1557_v25  ;;  %v1566_v27 = vrot.slane %v1565_v23, 2  ;;  %v1573_v59 = vrot.slane %v1572_v50, 4 }
 0x150   : > { %v5177_v13 = vmax.f32 %v1522_v11, %v1523_v21  ;;  %v5179_v16 = vmax.f32 %v1531_v41, %v1532_v46  ;;  %v1550_v33 = vrot.slane %v1549_v61, 1  ;;  %v1579_v58 = vsel %vm270_vm5, %v1491_v22, -inf }
 0x151   : > { %v1559_v32 = vrot.slane %v1558_v29, 1  ;;  %v1567_v49 = vmax.f32 %v1565_v23, %v1566_v27  ;;  %v1574_v38 = vmax.f32 %v1572_v50, %v1573_v59  ;;  %v1580_v17 = vsel %vm270_vm5, %v1492_v44, -inf }
 0x152   : > { %v5191_v53 = vmax.f32 %v1540_v19, %v1541_v10  ;;  %v1581_v14 = vmax.f32 %v1579_v58, %v1580_v17  ;;  %v1588_v47 = vsel %vm270_vm5, %v1493_v51, -inf  ;;  %v1589_v22 = vsel %vm270_vm5, %v1494_v6, -inf }
 0x153   : > { %v5203_v45 = vmax.f32 %v1549_v61, %v1550_v33  ;;  %v1568_v0 = vrot.slane %v1567_v49, 1  ;;  %v1575_v36 = vrot.slane %v1574_v38, 2  ;;  %v1590_v44 = vmax.f32 %v1588_v47, %v1589_v22 }
 0x154   : > { %v1582_v11 = vrot.slane %v1581_v14, 4  ;;  %v1597_v12 = vsel %vm270_vm5, %v1495_v39, -inf  ;;  %v1598_v15 = vsel %vm270_vm5, %v1496_v20, -inf  ;;  %v1606_v51 = vsel %vm270_vm5, %v1497_v62, -inf }
 0x155   : > { %v5220_v6 = vmax.f32 %v1558_v29, %v1559_v32  ;;  %v1576_v56 = vmax.f32 %v1574_v38, %v1575_v36  ;;  %v1591_v31 = vrot.slane %v1590_v44, 4  ;;  %v1599_v18 = vmax.f32 %v1597_v12, %v1598_v15 }
 0x156   : > { %v1583_v4 = vmax.f32 %v1581_v14, %v1582_v11  ;;  %v1607_v24 = vsel %vm270_vm5, %v1498_v43, -inf  ;;  %v1615_v5 = vsel %vm270_vm5, %v1499_v30, -inf  ;;  %v1616_v39 = vsel %vm270_vm5, %v1500_v60, -inf }
 0x157   : > { %v5237_v20 = vmax.f32 %v1567_v49, %v1568_v0  ;;  %v1592_v62 = vmax.f32 %v1590_v44, %v1591_v31  ;;  %v1600_v8 = vrot.slane %v1599_v18, 4  ;;  %v1608_v52 = vmax.f32 %v1606_v51, %v1607_v24 }
 0x158   : > { %v1584_v41 = vrot.slane %v1583_v4, 2  ;;  %v1617_v19 = vmax.f32 %v1615_v5, %v1616_v39  ;;  %v1624_v3 = vsel %vm270_vm5, %v1501_v28, -inf  ;;  %v1625_v7 = vsel %vm270_vm5, %v1502_v42, -inf }
 0x159   : > { %v1577_v43 = vrot.slane %v1576_v56, 1  ;;  %v1593_v30 = vrot.slane %v1592_v62, 2  ;;  %v1601_v60 = vmax.f32 %v1599_v18, %v1600_v8  ;;  %v1609_v63 = vrot.slane %v1608_v52, 4 }
 0x15a   : > { %v1585_v21 = vmax.f32 %v1583_v4, %v1584_v41  ;;  %v1618_v25 = vrot.slane %v1617_v19, 4  ;;  %v1626_v23 = vmax.f32 %v1624_v3, %v1625_v7  ;;  %v6897_v37 = vsel %vm5048_vm8, %v6895_v55, -inf }
 0x15b   : > { %v1633_v28 = vsel %vm270_vm5, %v6897_v37, -inf  ;;  %v1594_v54 = vmax.f32 %v1592_v62, %v1593_v30  ;;  %v1602_v50 = vrot.slane %v1601_v60, 2  ;;  %v1610_v42 = vmax.f32 %v1608_v52, %v1609_v63 }
 0x15c   : > { %v6898_v46 = vsel %vm5056_vm9, %v6862_v48, -inf  ;;  %v1586_v61 = vrot.slane %v1585_v21, 1  ;;  %v1619_v29 = vmax.f32 %v1617_v19, %v1618_v25  ;;  %v1627_v27 = vrot.slane %v1626_v23, 4 }
 0x15d   : > { %v1634_v10 = vsel %vm270_vm5, %v6898_v46, -inf  ;;  %v1595_v33 = vrot.slane %v1594_v54, 1  ;;  %v1603_v58 = vmax.f32 %v1601_v60, %v1602_v50  ;;  %v1611_v55 = vrot.slane %v1610_v42, 2 }
 0x15e   : > { %v1635_v59 = vmax.f32 %v1633_v28, %v1634_v10  ;;  %v6899_v32 = vsel %vm5048_vm8, %v6896_v34, -inf  ;;  %v5272_v48 = vmax.f32 %v1576_v56, %v1577_v43  ;;  %v1620_v38 = vrot.slane %v1619_v29, 2 }
 0x15f   : > { %v1642_v49 = vsel %vm270_vm5, %v6899_v32, -inf  ;;  %v1628_v17 = vmax.f32 %v1626_v23, %v1627_v27  ;;  %v1587_v47 = vmax.f32 %v1585_v21, %v1586_v61  ;;  %v1604_v22 = vrot.slane %v1603_v58, 1 }
 0x160   : > { %v1636_v14 = vrot.slane %v1635_v59, 4  ;;  %v1612_v0 = vmax.f32 %v1610_v42, %v1611_v55  ;;  %v1643_v26 = vsel %vm270_vm5, %v1506_v57, -inf  ;;  %v1621_v34 = vmax.f32 %v1619_v29, %v1620_v38 }
 0x161   : > { %v1629_v36 = vrot.slane %v1628_v17, 2  ;;  %v1644_v11 = vmax.f32 %v1642_v49, %v1643_v26  ;;  %v1596_v12 = vmax.f32 %v1594_v54, %v1595_v33  ;;  %v1605_v15 = vmax.f32 %v1603_v58, %v1604_v22 }
 0x162   : > { %v1637_v44 = vmax.f32 %v1635_v59, %v1636_v14  ;;  %v1613_v51 = vrot.slane %v1612_v0, 1  ;;  %v1653_v56 = vstv %s1652_s24  ;;  %v1622_v31 = vrot.slane %v1621_v34, 1  ;;  %s6534_s24 = sld [smem:[#allocation8 + %s4984_s21]] }
 0x163   : > { %v1630_v18 = vmax.f32 %v1628_v17, %v1629_v36  ;;  %v1645_v24 = vrot.slane %v1644_v11, 4  ;;  %vm5279_vm1 = vcmp.eq.s32.totalorder %v1653_v56, 1  ;;  %v6902_v57 = vstv %s5009_s22  ;;  %v5360_v17 = vld [vmem:[%s3255_s26] sm:$0xff]  ;;  %v5376_v36 = vld [vmem:[%s3255_s26 + $0x8] sm:$0xff]  ;;  %s6376_s22 = sld [smem:[#allocation8 + %s4669_s14]] }
 0x164   : > { %v1638_v4 = vrot.slane %v1637_v44, 2  ;;  %v1614_v40 = vmax.f32 %v1612_v0, %v1613_v51  ;;  %vm5286_vm2 = vcmp.ge.s32.totalorder %v3244_v1, %v6902_v57  ;;  %v6905_v39 = vmov %v6902_v57  ;;  %v5390_v56 = vld [vmem:[%s3255_s26 + $0x20] sm:$0xff]  ;;  %v3045_v57 = vld [vmem:[%s3255_s26 + $0x38] sm:$0xff] }
 0x165   : > { %vm5293_vm3 = vcmp.ge.s32.totalorder %v3258_v2, %v6905_v39  ;;  %v1631_v8 = vrot.slane %v1630_v18, 1  ;;  %v1646_v41 = vmax.f32 %v1644_v11, %v1645_v24  ;;  %v1712_v19 = vstv %s5262_s23  ;;  %v3046_v39 = vld [vmem:[%s3255_s26 + $0x40] sm:$0xff]  ;;  %s6520_s23 = sld [smem:[#allocation7 + %s4984_s21]] }
 0x166   : > { %v1639_v52 = vmax.f32 %v1637_v44, %v1638_v4  ;;  %v1623_v3 = vmax.f32 %v1621_v34, %v1622_v31  ;;  %v1655_v7 = vsel %vm5279_vm1, %v5175_v35, 0.0  ;;  %v1656_v43 = vsel %vm5279_vm1, %v5177_v13, 0.0  ;;  %v5398_v4 = vld [vmem:[%s3255_s26 + $0x28] sm:$0xff] }
 0x167   : > { %v1657_v30 = vsel %vm5279_vm1, %v5179_v16, 0.0  ;;  %v1632_v60 = vmax.f32 %v1630_v18, %v1631_v8  ;;  %v1647_v21 = vrot.slane %v1646_v41, 2  ;;  %v1658_v25 = vsel %vm5279_vm1, %v5191_v53, 0.0  ;;  %v3047_v8 = vld [vmem:[%s3255_s26 + $0x48] sm:$0xff] }
 0x168   : > { %v1640_v63 = vrot.slane %v1639_v52, 1  ;;  %v1659_v23 = vsel %vm5279_vm1, %v5203_v45, 0.0  ;;  %v1660_v35 = vsel %vm5279_vm1, %v5220_v6, 0.0  ;;  %v1661_v13 = vsel %vm5279_vm1, %v5237_v20, 0.0 }
 0x169   : > { %v1663_v16 = vsel %vm5279_vm1, %v1587_v47, 0.0  ;;  %v1648_v28 = vmax.f32 %v1646_v41, %v1647_v21  ;;  %v1664_v53 = vsel %vm5279_vm1, %v1596_v12, 0.0  ;;  %v1665_v54 = vsel %vm5279_vm1, %v1605_v15, 0.0  ;;  %v5366_v47 = vld [vmem:[%s3255_s26 + $0x10] sm:$0xff]  ;;  %v5384_v15 = vld [vmem:[%s3255_s26 + $0x18] sm:$0xff]  ;;  %p2717_p4 = scmp.gt.s32.totalorder %s6376_s22, %s6369_s19 }
 0x16a   : > { %v1641_v37 = vmax.f32 %v1639_v52, %v1640_v63  ;;  %v1662_v45 = vsel %vm5279_vm1, %v5272_v48, 0.0  ;;  %v1666_v6 = vsel %vm5279_vm1, %v1614_v40, 0.0  ;;  %v1667_v20 = vsel %vm5279_vm1, %v1623_v3, 0.0  ;;  %v5404_v40 = vld [vmem:[%s3255_s26 + $0x30] sm:$0xff]  ;;  %v3049_v3 = vld [vmem:[%s3255_s26 + $0x58] sm:$0xff] }
 0x16b   : > { %v1687_v50 = vsel %vm451_vm10, %v1656_v43, %v1655_v7  ;;  %v1649_v42 = vrot.slane %v1648_v28, 1  ;;  %v1668_v46 = vsel %vm5279_vm1, %v1632_v60, 0.0  ;;  %v1694_v61 = vsel %vm451_vm10, %v1664_v53, %v1663_v16  ;;  %v5420_v41 = vld [vmem:[%s3255_s26 + $0x50] sm:$0xff]  ;;  %v5429_v43 = vld [vmem:[%s3255_s26 + $0x60] sm:$0xff]  ;;  %v5435_v60 = vld [vmem:[%s3255_s26 + $0x68] sm:$0xff]  ;;  %p2849_p5 = scmp.gt.s32.totalorder %s6534_s24, %s6520_s23 }
 0x16c   : > { %v1688_v10 = vsel %vm453_vm11, %v1657_v30, %v1687_v50  ;;  %v1695_v27 = vsel %vm453_vm11, %v1665_v54, %v1694_v61  ;;  %vm1713_vm4 = vcmp.lt.s32.totalorder %v3244_v1, %v1712_v19  ;;  %vm1714_vm6 = vcmp.lt.s32.totalorder %v3258_v2, %v1712_v19  ;;  %v5441_v21 = vld [vmem:[%s3255_s26 + $0x70] sm:$0xff]  ;;  %s6402_s14 = scalar_select %p2717_p4, 1, 0 }
 0x16d   : > { %v1689_v29 = vsel %vm455_vm12, %v1658_v25, %v1688_v10  ;;  %v1650_v59 = vmax.f32 %v1648_v28, %v1649_v42  ;;  %v1669_v33 = vsel %vm5279_vm1, %v1641_v37, 0.0  ;;  %v1696_v55 = vsel %vm455_vm12, %v1666_v6, %v1695_v27  ;;  %vm5347_vm7 = vmand %vm5286_vm2, %vm1713_vm4  ;;  %v5459_v37 = vld [vmem:[%s3255_s26 + $0x88] sm:$0xff]  ;;  %v5465_v53 = vld [vmem:[%s3255_s26 + $0x90] sm:$0xff]  ;;  %s6643_s21 = scalar_select %p2849_p5, 1, 0 }
 0x16e   : > { %v1690_v58 = vsel %vm457_vm13, %v1659_v23, %v1689_v29  ;;  %v1697_v48 = vsel %vm457_vm13, %v1667_v20, %v1696_v55  ;;  %vm5355_vm8 = vmand %vm5293_vm3, %vm1714_vm6  ;;  %v1721_v14 = vsel %vm5347_vm7, %v5360_v17, -inf  ;;  %v1723_v22 = vsel %vm5347_vm7, %v5366_v47, -inf  ;;  %v5447_v23 = vld [vmem:[%s3255_s26 + $0x78] sm:$0xff]  ;;  %v5477_v20 = vld [vmem:[%s3255_s26 + $0xa0] sm:$0xff] }
 0x16f   : > { %v1691_v49 = vsel %vm459_vm14, %v1660_v35, %v1690_v58  ;;  %v1670_v0 = vsel %vm5279_vm1, %v1650_v59, 0.0  ;;  %v1698_v34 = vsel %vm459_vm14, %v1668_v46, %v1697_v48  ;;  %v1722_v44 = vsel %vm5355_vm8, %v5376_v36, -inf  ;;  %v5483_v42 = vld [vmem:[%s3255_s26 + $0xa8] sm:$0xff]  ;;  %v5489_v10 = vld [vmem:[%s3255_s26 + $0xb0] sm:$0xff]  ;;  %v5495_v29 = vld [vmem:[%s3255_s26 + $0xb8] sm:$0xff] }
 0x170   : > { %v1692_v26 = vsel %vm461_vm15, %v1661_v13, %v1691_v49  ;;  %v1699_v12 = vsel %vm461_vm15, %v1669_v33, %v1698_v34  ;;  %v1724_v51 = vsel %vm5355_vm8, %v5384_v15, -inf  ;;  %v1725_v31 = vsel %vm5347_vm7, %v5390_v56, -inf  ;;  %v5453_v13 = vld [vmem:[%s3255_s26 + $0x80] sm:$0xff]  ;;  %v5507_v58 = vld [vmem:[%s3255_s26 + $0xc8] sm:$0xff]  ;;  %v5513_v49 = vld [vmem:[%s3255_s26 + $0xd0] sm:$0xff] }
 0x171   : > { %v1693_v11 = vsel %vm463_vm0, %v1662_v45, %v1692_v26  ;;  %v1700_v18 = vsel %vm463_vm0, %v1670_v0, %v1699_v12  ;;  %v1726_v24 = vsel %vm5355_vm8, %v5398_v4, -inf  ;;  %v1727_v9 = vsel %vm5347_vm7, %v5404_v40, -inf  ;;  %v5471_v45 = vld [vmem:[%s3255_s26 + $0x98] sm:$0xff]  ;;  %v5501_v59 = vld [vmem:[%s3255_s26 + $0xc0] sm:$0xff]  ;;  %v5531_v12 = vld [vmem:[%s3255_s26 + $0xe8] sm:$0xff] }
 0x172   : > { %1704 = vst.msk [vmem:[#allocation2 + $0x50] sm:$0xff] %vm270_vm5, %v1693_v11  ;;  %v1728_v5 = vsel %vm5355_vm8, %v3045_v57, -inf  ;;  %v1729_v62 = vsel %vm5347_vm7, %v3046_v39, -inf  ;;  %v1730_v52 = vsel %vm5355_vm8, %v3047_v8, -inf  ;;  %v1731_v19 = vsel %vm5347_vm7, %v5420_v41, -inf  ;;  %v5519_v0 = vld [vmem:[%s3255_s26 + $0xd8] sm:$0xff] }
 0x173   : > { %1705 = vst.msk [vmem:[#allocation2 + $0x58] sm:$0xff] %vm270_vm5, %v1700_v18  ;;  %v1732_v7 = vsel %vm5355_vm8, %v3049_v3, -inf  ;;  %v1733_v30 = vsel %vm5347_vm7, %v5429_v43, -inf  ;;  %v1734_v63 = vsel %vm5355_vm8, %v5435_v60, -inf  ;;  %v1735_v25 = vsel %vm5347_vm7, %v5441_v21, -inf  ;;  %v5525_v34 = vld [vmem:[%s3255_s26 + $0xe0] sm:$0xff] }
 0x174   : > { %v1736_v35 = vsel %vm5355_vm8, %v5447_v23, -inf  ;;  %v1737_v16 = vsel %vm5347_vm7, %v5453_v13, -inf  ;;  %v1738_v28 = vsel %vm5355_vm8, %v5459_v37, -inf  ;;  %v1739_v54 = vsel %vm5347_vm7, %v5465_v53, -inf  ;;  %v5537_v4 = vld [vmem:[%s3255_s26 + $0xf0] sm:$0xff]  ;;  %v5543_v57 = vld [vmem:[%s3255_s26 + $0xf8] sm:$0xff] }
 0x175   : > { %v1740_v6 = vsel %vm5355_vm8, %v5471_v45, -inf  ;;  %v1741_v50 = vsel %vm5347_vm7, %v5477_v20, -inf  ;;  %v1742_v46 = vsel %vm5355_vm8, %v5483_v42, -inf  ;;  %v1743_v61 = vsel %vm5347_vm7, %v5489_v10, -inf  ;;  %s5706_s26 = sld [smem:[#allocation7 + %s3233_s17]] }
 0x176   : > { %v1744_v27 = vsel %vm5355_vm8, %v5495_v29, -inf  ;;  %v1745_v33 = vsel %vm5347_vm7, %v5501_v59, -inf  ;;  %v1746_v55 = vsel %vm5355_vm8, %v5507_v58, -inf  ;;  %v1747_v48 = vsel %vm5347_vm7, %v5513_v49, -inf }
 0x177   : > { %v1753_v8 = vsel %vm270_vm5, %v1721_v14, -inf  ;;  %v1754_v41 = vsel %vm270_vm5, %v1722_v44, -inf  ;;  %v1762_v3 = vsel %vm270_vm5, %v1723_v22, -inf  ;;  %v1763_v17 = vsel %vm270_vm5, %v1724_v51, -inf }
 0x178   : > { %v1755_v39 = vmax.f32 %v1753_v8, %v1754_v41  ;;  %v1764_v14 = vmax.f32 %v1762_v3, %v1763_v17  ;;  %v1771_v36 = vsel %vm270_vm5, %v1725_v31, -inf  ;;  %v1772_v44 = vsel %vm270_vm5, %v1726_v24, -inf }
 0x179   : > { %v1773_v40 = vmax.f32 %v1771_v36, %v1772_v44  ;;  %v1780_v47 = vsel %vm270_vm5, %v1727_v9, -inf  ;;  %v1781_v22 = vsel %vm270_vm5, %v1728_v5, -inf  ;;  %v1789_v18 = vsel %vm270_vm5, %v1729_v62, -inf }
 0x17a   : > { %v1756_v15 = vrot.slane %v1755_v39, 4  ;;  %v1765_v11 = vrot.slane %v1764_v14, 4  ;;  %v1782_v51 = vmax.f32 %v1780_v47, %v1781_v22  ;;  %v1790_v8 = vsel %vm270_vm5, %v1730_v52, -inf }
 0x17b   : > { %v1774_v41 = vrot.slane %v1773_v40, 4  ;;  %v1791_v3 = vmax.f32 %v1789_v18, %v1790_v8  ;;  %v1798_v56 = vsel %vm270_vm5, %v1731_v19, -inf  ;;  %v1799_v31 = vsel %vm270_vm5, %v1732_v7, -inf  ;;  %p2057_p12 = scmp.gt.s32.totalorder %s5712_s27, %s5706_s26 }
 0x17c   : > { %v1757_v17 = vmax.f32 %v1755_v39, %v1756_v15  ;;  %v1766_v24 = vmax.f32 %v1764_v14, %v1765_v11  ;;  %v1783_v36 = vrot.slane %v1782_v51, 4  ;;  %v1800_v44 = vmax.f32 %v1798_v56, %v1799_v31 }
 0x17d   : > { %v1775_v9 = vmax.f32 %v1773_v40, %v1774_v41  ;;  %v1792_v26 = vrot.slane %v1791_v3, 4  ;;  %v1807_v5 = vsel %vm270_vm5, %v1733_v30, -inf  ;;  %v1808_v62 = vsel %vm270_vm5, %v1734_v63, -inf  ;;  %s5860_s17 = scalar_select %p2057_p12, 1, 0 }
 0x17e   : > { %v1758_v52 = vrot.slane %v1757_v17, 2  ;;  %v1767_v19 = vrot.slane %v1766_v24, 2  ;;  %v1784_v7 = vmax.f32 %v1782_v51, %v1783_v36  ;;  %v1801_v11 = vrot.slane %v1800_v44, 4 }
 0x17f   : > { %v1776_v18 = vrot.slane %v1775_v9, 2  ;;  %v1793_v39 = vmax.f32 %v1791_v3, %v1792_v26  ;;  %v1809_v40 = vmax.f32 %v1807_v5, %v1808_v62  ;;  %v1816_v43 = vsel %vm270_vm5, %v1735_v25, -inf }
 0x180   : > { %v1759_v30 = vmax.f32 %v1757_v17, %v1758_v52  ;;  %v1768_v14 = vmax.f32 %v1766_v24, %v1767_v19  ;;  %v1785_v47 = vrot.slane %v1784_v7, 2  ;;  %v1802_v22 = vmax.f32 %v1800_v44, %v1801_v11 }
 0x181   : > { %v1777_v60 = vmax.f32 %v1775_v9, %v1776_v18  ;;  %v1794_v15 = vrot.slane %v1793_v39, 2  ;;  %v1810_v63 = vrot.slane %v1809_v40, 4  ;;  %v1817_v26 = vsel %vm270_vm5, %v1736_v35, -inf }
 0x182   : > { %v1760_v51 = vrot.slane %v1759_v30, 1  ;;  %v1769_v8 = vrot.slane %v1768_v14, 1  ;;  %v1786_v41 = vmax.f32 %v1784_v7, %v1785_v47  ;;  %v1803_v3 = vrot.slane %v1802_v22, 2 }
 0x183   : > { %v1778_v21 = vrot.slane %v1777_v60, 1  ;;  %v1795_v56 = vmax.f32 %v1793_v39, %v1794_v15  ;;  %v1811_v25 = vmax.f32 %v1809_v40, %v1810_v63  ;;  %v1818_v31 = vmax.f32 %v1816_v43, %v1817_v26 }
 0x184   : > { %v5600_v17 = vmax.f32 %v1759_v30, %v1760_v51  ;;  %v5602_v24 = vmax.f32 %v1768_v14, %v1769_v8  ;;  %v1787_v36 = vrot.slane %v1786_v41, 1  ;;  %v1804_v44 = vmax.f32 %v1802_v22, %v1803_v3 }
 0x185   : > { %v5604_v9 = vmax.f32 %v1777_v60, %v1778_v21  ;;  %v1796_v5 = vrot.slane %v1795_v56, 1  ;;  %v1812_v23 = vrot.slane %v1811_v25, 2  ;;  %v1819_v62 = vrot.slane %v1818_v31, 4 }
 0x186   : > { %v5606_v35 = vmax.f32 %v1786_v41, %v1787_v36  ;;  %v1805_v52 = vrot.slane %v1804_v44, 1  ;;  %v1825_v19 = vsel %vm270_vm5, %v1737_v16, -inf  ;;  %v1826_v7 = vsel %vm270_vm5, %v1738_v28, -inf }
 0x187   : > { %v5618_v11 = vmax.f32 %v1795_v56, %v1796_v5  ;;  %v1813_v18 = vmax.f32 %v1811_v25, %v1812_v23  ;;  %v1820_v39 = vmax.f32 %v1818_v31, %v1819_v62  ;;  %v1827_v40 = vmax.f32 %v1825_v19, %v1826_v7 }
 0x188   : > { %v5620_v43 = vmax.f32 %v1804_v44, %v1805_v52  ;;  %v1834_v13 = vsel %vm270_vm5, %v1739_v54, -inf  ;;  %v1835_v16 = vsel %vm270_vm5, %v1740_v6, -inf  ;;  %v1843_v37 = vsel %vm270_vm5, %v1741_v50, -inf }
 0x189   : > { %v1814_v28 = vrot.slane %v1813_v18, 1  ;;  %v1821_v30 = vrot.slane %v1820_v39, 2  ;;  %v1828_v14 = vrot.slane %v1827_v40, 4  ;;  %v1836_v47 = vmax.f32 %v1834_v13, %v1835_v16 }
 0x18a   : > { %v1844_v53 = vsel %vm270_vm5, %v1742_v46, -inf  ;;  %v1852_v54 = vsel %vm270_vm5, %v1743_v61, -inf  ;;  %v1853_v45 = vsel %vm270_vm5, %v1744_v27, -inf  ;;  %v1861_v6 = vsel %vm270_vm5, %v1745_v33, -inf }
 0x18b   : > { %v5657_v20 = vmax.f32 %v1813_v18, %v1814_v28  ;;  %v1822_v50 = vmax.f32 %v1820_v39, %v1821_v30  ;;  %v1829_v42 = vmax.f32 %v1827_v40, %v1828_v14  ;;  %v1837_v46 = vrot.slane %v1836_v47, 4 }
 0x18c   : > { %v1845_v10 = vmax.f32 %v1843_v37, %v1844_v53  ;;  %v1854_v61 = vmax.f32 %v1852_v54, %v1853_v45  ;;  %v1862_v29 = vsel %vm270_vm5, %v1746_v55, -inf  ;;  %v1870_v27 = vsel %vm270_vm5, %v1747_v48, -inf }
 0x18d   : > { %v1823_v59 = vrot.slane %v1822_v50, 1  ;;  %v1830_v33 = vrot.slane %v1829_v42, 2  ;;  %v1838_v22 = vmax.f32 %v1836_v47, %v1837_v46  ;;  %v1863_v60 = vmax.f32 %v1861_v6, %v1862_v29 }
 0x18e   : > { %v1846_v15 = vrot.slane %v1845_v10, 4  ;;  %v1855_v63 = vrot.slane %v1854_v61, 4  ;;  %v6912_v26 = vsel %vm5355_vm8, %v5519_v0, -inf  ;;  %v6913_v55 = vsel %vm5347_vm7, %v5525_v34, -inf }
 0x18f   : > { %v1871_v58 = vsel %vm270_vm5, %v6912_v26, -inf  ;;  %v1879_v49 = vsel %vm270_vm5, %v6913_v55, -inf  ;;  %v5681_v48 = vmax.f32 %v1822_v50, %v1823_v59  ;;  %v1831_v51 = vmax.f32 %v1829_v42, %v1830_v33 }
 0x190   : > { %v1839_v8 = vrot.slane %v1838_v22, 2  ;;  %v1864_v41 = vrot.slane %v1863_v60, 4  ;;  %v1847_v3 = vmax.f32 %v1845_v10, %v1846_v15  ;;  %v1856_v21 = vmax.f32 %v1854_v61, %v1855_v63 }
 0x191   : > { %v1872_v56 = vmax.f32 %v1870_v27, %v1871_v58  ;;  %v6914_v0 = vsel %vm5355_vm8, %v5531_v12, -inf  ;;  %v1832_v34 = vrot.slane %v1831_v51, 1  ;;  %v6915_v52 = vsel %vm5347_vm7, %v5537_v4, -inf }
 0x192   : > { %v1880_v25 = vsel %vm270_vm5, %v6914_v0, -inf  ;;  %v1840_v31 = vmax.f32 %v1838_v22, %v1839_v8  ;;  %v1865_v36 = vmax.f32 %v1863_v60, %v1864_v41  ;;  %v1848_v5 = vrot.slane %v1847_v3, 2 }
 0x193   : > { %v1881_v44 = vmax.f32 %v1879_v49, %v1880_v25  ;;  %v1857_v23 = vrot.slane %v1856_v21, 2  ;;  %v1873_v62 = vrot.slane %v1872_v56, 4  ;;  %v1888_v19 = vsel %vm270_vm5, %v6915_v52, -inf }
 0x194   : > { %v1833_v7 = vmax.f32 %v1831_v51, %v1832_v34  ;;  %v1841_v18 = vrot.slane %v1840_v31, 1  ;;  %v1866_v12 = vrot.slane %v1865_v36, 2  ;;  %v1849_v40 = vmax.f32 %v1847_v3, %v1848_v5  ;;  %v5757_v5 = vld [vmem:[#allocation2] sm:$0xff] }
 0x195   : > { %v1882_v39 = vrot.slane %v1881_v44, 4  ;;  %v1858_v13 = vmax.f32 %v1856_v21, %v1857_v23  ;;  %v1874_v16 = vmax.f32 %v1872_v56, %v1873_v62  ;;  %v6916_v37 = vsel %vm5355_vm8, %v5543_v57, -inf  ;;  %v5759_v23 = vld [vmem:[#allocation2 + $0x8] sm:$0xff] }
 0x196   : > { %v1889_v32 = vsel %vm270_vm5, %v6916_v37, -inf  ;;  %v1842_v28 = vmax.f32 %v1840_v31, %v1841_v18  ;;  %v1867_v4 = vmax.f32 %v1865_v36, %v1866_v12  ;;  %v1850_v47 = vrot.slane %v1849_v40, 1  ;;  %v5768_v18 = vld [vmem:[#allocation2 + $0x10] sm:$0xff]  ;;  %v5770_v12 = vld [vmem:[#allocation2 + $0x18] sm:$0xff] }
 0x197   : > { %v1883_v30 = vmax.f32 %v1881_v44, %v1882_v39  ;;  %v1890_v14 = vmax.f32 %v1888_v19, %v1889_v32  ;;  %v1859_v53 = vrot.slane %v1858_v13, 1  ;;  %v1875_v54 = vrot.slane %v1874_v16, 2  ;;  %v5772_v39 = vld [vmem:[#allocation2 + $0x20] sm:$0xff]  ;;  %v5780_v37 = vld [vmem:[#allocation2 + $0x30] sm:$0xff]  ;;  %v5782_v32 = vld [vmem:[#allocation2 + $0x38] sm:$0xff] }
 0x198   : > { %v1899_v45 = vstv %s1898_s25  ;;  %v1868_v6 = vrot.slane %v1867_v4, 1  ;;  %v1851_v38 = vmax.f32 %v1849_v40, %v1850_v47  ;;  %v1954_v36 = vstv %s5706_s26  ;;  %v5795_v47 = vld [vmem:[#allocation2 + $0x40] sm:$0xff] }
 0x199   : > { %v1884_v50 = vrot.slane %v1883_v30, 2  ;;  %v1891_v42 = vrot.slane %v1890_v14, 4  ;;  %vm5701_vm9 = vcmp.eq.s32.totalorder %v1899_v45, 1  ;;  %v1860_v57 = vmax.f32 %v1858_v13, %v1859_v53  ;;  %v5797_v53 = vld [vmem:[#allocation2 + $0x48] sm:$0xff] }
 0x19a   : > { %v1876_v10 = vmax.f32 %v1874_v16, %v1875_v54  ;;  %v1901_v61 = vsel %vm5701_vm9, %v5600_v17, 0.0  ;;  %v1869_v29 = vmax.f32 %v1867_v4, %v1868_v6  ;;  %v1902_v33 = vsel %vm5701_vm9, %v5602_v24, 0.0  ;;  %v5778_v16 = vld [vmem:[#allocation2 + $0x28] sm:$0xff] }
 0x19b   : > { %v1885_v27 = vmax.f32 %v1883_v30, %v1884_v50  ;;  %v1892_v59 = vmax.f32 %v1890_v14, %v1891_v42  ;;  %v1903_v60 = vsel %vm5701_vm9, %v5604_v9, 0.0  ;;  %v1904_v15 = vsel %vm5701_vm9, %v5606_v35, 0.0  ;;  %v5805_v50 = vld [vmem:[#allocation2 + $0x50] sm:$0xff]  ;;  %v5807_v42 = vld [vmem:[#allocation2 + $0x58] sm:$0xff] }
 0x19c   : > { %v1877_v22 = vrot.slane %v1876_v10, 1  ;;  %v1905_v17 = vsel %vm5701_vm9, %v5618_v11, 0.0  ;;  %v1906_v58 = vsel %vm5701_vm9, %v5620_v43, 0.0  ;;  %v1907_v24 = vsel %vm5701_vm9, %v5657_v20, 0.0 }
 0x19d   : > { %v1886_v63 = vrot.slane %v1885_v27, 1  ;;  %v1893_v26 = vrot.slane %v1892_v59, 2  ;;  %v1908_v9 = vsel %vm5701_vm9, %v5681_v48, 0.0  ;;  %v1909_v35 = vsel %vm5701_vm9, %v1833_v7, 0.0 }
 0x19e   : > { %v1878_v55 = vmax.f32 %v1876_v10, %v1877_v22  ;;  %v1910_v11 = vsel %vm5701_vm9, %v1842_v28, 0.0  ;;  %v1911_v43 = vsel %vm5701_vm9, %v1851_v38, 0.0  ;;  %v1912_v20 = vsel %vm5701_vm9, %v1860_v57, 0.0 }
 0x19f   : > { %v1887_v49 = vmax.f32 %v1885_v27, %v1886_v63  ;;  %v1894_v51 = vmax.f32 %v1892_v59, %v1893_v26  ;;  %v1913_v8 = vsel %vm5701_vm9, %v1869_v29, 0.0  ;;  %v1933_v41 = vsel %vm451_vm10, %v1902_v33, %v1901_v61 }
 0x1a0   : > { %v1914_v48 = vsel %vm5701_vm9, %v1878_v55, 0.0  ;;  %v1940_v3 = vsel %vm451_vm10, %v1910_v11, %v1909_v35  ;;  %v1934_v0 = vsel %vm453_vm11, %v1903_v60, %v1933_v41  ;;  %v1957_v44 = vstv %s5712_s27 }
 0x1a1   : > { %v1895_v21 = vrot.slane %v1894_v51, 1  ;;  %v1915_v56 = vsel %vm5701_vm9, %v1887_v49, 0.0  ;;  %v1941_v25 = vsel %vm453_vm11, %v1911_v43, %v1940_v3  ;;  %v1935_v34 = vsel %vm455_vm12, %v1904_v15, %v1934_v0 }
 0x1a2   : > { %v1942_v31 = vsel %vm455_vm12, %v1912_v20, %v1941_v25  ;;  %v1936_v52 = vsel %vm457_vm13, %v1905_v17, %v1935_v34  ;;  %vm5764_vm1 = vcmp.ge.s32.totalorder %v3244_v1, %v1954_v36  ;;  %vm1956_vm2 = vcmp.ge.s32.totalorder %v3258_v2, %v1954_v36 }
 0x1a3   : > { %v1896_v62 = vmax.f32 %v1894_v51, %v1895_v21  ;;  %v1943_v19 = vsel %vm457_vm13, %v1913_v8, %v1942_v31  ;;  %v1937_v40 = vsel %vm459_vm14, %v1906_v58, %v1936_v52  ;;  %vm1958_vm3 = vcmp.lt.s32.totalorder %v3244_v1, %v1957_v44 }
 0x1a4   : > { %v1944_v13 = vsel %vm459_vm14, %v1914_v48, %v1943_v19  ;;  %v1938_v4 = vsel %vm461_vm15, %v1907_v24, %v1937_v40  ;;  %vm1959_vm4 = vcmp.lt.s32.totalorder %v3258_v2, %v1957_v44  ;;  %vm5791_vm6 = vmand %vm5764_vm1, %vm1958_vm3  ;;  %v2059_v19 = vstv %s5860_s17 }
 0x1a5   : > { %v1916_v28 = vsel %vm5701_vm9, %v1896_v62, 0.0  ;;  %v1945_v30 = vsel %vm461_vm15, %v1915_v56, %v1944_v13  ;;  %v1939_v54 = vsel %vm463_vm0, %v1908_v9, %v1938_v4  ;;  %vm5801_vm7 = vmand %vm1956_vm2, %vm1959_vm4  ;;  %v1980_v46 = vsel %vm5791_vm6, %v5757_v5, -inf }
 0x1a6   : > { %v1946_v45 = vsel %vm463_vm0, %v1916_v28, %v1945_v30  ;;  %v1982_v38 = vsel %vm5791_vm6, %v5768_v18, -inf  ;;  %1950 = vst.msk [vmem:[#allocation2 + $0x60] sm:$0xff] %vm270_vm5, %v1939_v54  ;;  %v1981_v57 = vsel %vm5801_vm7, %v5759_v23, -inf  ;;  %v1983_v10 = vsel %vm5801_vm7, %v5770_v12, -inf }
 0x1a7   : > { %v1984_v61 = vsel %vm5791_vm6, %v5772_v39, -inf  ;;  %v1985_v29 = vsel %vm5801_vm7, %v5778_v16, -inf  ;;  %1951 = vst.msk [vmem:[#allocation2 + $0x68] sm:$0xff] %vm270_vm5, %v1946_v45  ;;  %v1986_v27 = vsel %vm5791_vm6, %v5780_v37, -inf  ;;  %v1987_v59 = vsel %vm5801_vm7, %v5782_v32, -inf }
 0x1a8   : > { %v1988_v33 = vsel %vm5791_vm6, %v5795_v47, -inf  ;;  %v1989_v22 = vsel %vm5801_vm7, %v5797_v53, -inf  ;;  %v1990_v60 = vsel %vm5791_vm6, %v5805_v50, -inf  ;;  %v1991_v15 = vsel %vm5801_vm7, %v5807_v42, -inf }
 0x1a9   : > { %v1994_v17 = vsel %vm270_vm5, %v1980_v46, -inf  ;;  %v1995_v63 = vsel %vm270_vm5, %v1981_v57, -inf  ;;  %v2003_v58 = vsel %vm270_vm5, %v1982_v38, -inf  ;;  %v2004_v24 = vsel %vm270_vm5, %v1983_v10, -inf }
 0x1aa   : > { %v1996_v26 = vmax.f32 %v1994_v17, %v1995_v63  ;;  %v2012_v55 = vsel %vm270_vm5, %v1984_v61, -inf  ;;  %v2005_v9 = vmax.f32 %v2003_v58, %v2004_v24  ;;  %v2013_v35 = vsel %vm270_vm5, %v1985_v29, -inf }
 0x1ab   : > { %v2021_v11 = vsel %vm270_vm5, %v1986_v27, -inf  ;;  %v2022_v49 = vsel %vm270_vm5, %v1987_v59, -inf  ;;  %v2014_v43 = vmax.f32 %v2012_v55, %v2013_v35  ;;  %v2030_v8 = vsel %vm270_vm5, %v1988_v33, -inf }
 0x1ac   : > { %v1997_v51 = vrot.slane %v1996_v26, 4  ;;  %v2023_v20 = vmax.f32 %v2021_v11, %v2022_v49  ;;  %v2006_v48 = vrot.slane %v2005_v9, 4  ;;  %v2031_v41 = vsel %vm270_vm5, %v1989_v22, -inf }
 0x1ad   : > { %v2039_v3 = vsel %vm270_vm5, %v1990_v60, -inf  ;;  %v2040_v21 = vsel %vm270_vm5, %v1991_v15, -inf  ;;  %v5866_v56 = vld [vmem:[#allocation2 + $0x60] sm:$0xff]  ;;  %v2015_v25 = vrot.slane %v2014_v43, 4  ;;  %v2032_v31 = vmax.f32 %v2030_v8, %v2031_v41 }
 0x1ae   : > { %v1998_v0 = vmax.f32 %v1996_v26, %v1997_v51  ;;  %v2024_v34 = vrot.slane %v2023_v20, 4  ;;  %v5871_v36 = vld [vmem:[#allocation2 + $0x68] sm:$0xff]  ;;  %v1992_v44 = vsel %vm5791_vm6, %v5866_v56, -inf  ;;  %v2007_v62 = vmax.f32 %v2005_v9, %v2006_v48 }
 0x1af   : > { %v2041_v52 = vmax.f32 %v2039_v3, %v2040_v21  ;;  %v1993_v7 = vsel %vm5801_vm7, %v5871_v36, -inf  ;;  %v2016_v13 = vmax.f32 %v2014_v43, %v2015_v25  ;;  %v2033_v30 = vrot.slane %v2032_v31, 4 }
 0x1b0   : > { %v1999_v40 = vrot.slane %v1998_v0, 2  ;;  %v2025_v28 = vmax.f32 %v2023_v20, %v2024_v34  ;;  %v2008_v4 = vrot.slane %v2007_v62, 2  ;;  %v2048_v45 = vsel %vm270_vm5, %v1992_v44, -inf }
 0x1b1   : > { %v2042_v54 = vrot.slane %v2041_v52, 4  ;;  %v2017_v46 = vrot.slane %v2016_v13, 2  ;;  %v2049_v57 = vsel %vm270_vm5, %v1993_v7, -inf  ;;  %v2034_v61 = vmax.f32 %v2032_v31, %v2033_v30 }
 0x1b2   : > { %v2000_v14 = vmax.f32 %v1998_v0, %v1999_v40  ;;  %v2026_v38 = vrot.slane %v2025_v28, 2  ;;  %v2009_v10 = vmax.f32 %v2007_v62, %v2008_v4  ;;  %v2050_v29 = vmax.f32 %v2048_v45, %v2049_v57 }
 0x1b3   : > { %v2043_v6 = vmax.f32 %v2041_v52, %v2042_v54  ;;  %v2018_v59 = vmax.f32 %v2016_v13, %v2017_v46  ;;  %vm5886_vm0 = vcmp.eq.s32.totalorder %v2059_v19, 1  ;;  %v2035_v15 = vrot.slane %v2034_v61, 2 }
 0x1b4   : > { %v2001_v27 = vrot.slane %v2000_v14, 1  ;;  %v2027_v33 = vmax.f32 %v2025_v28, %v2026_v38  ;;  %v2010_v60 = vrot.slane %v2009_v10, 1  ;;  %v2051_v63 = vrot.slane %v2050_v29, 4 }
 0x1b5   : > { %v2044_v17 = vrot.slane %v2043_v6, 2  ;;  %v2019_v58 = vrot.slane %v2018_v59, 1  ;;  %v2036_v9 = vmax.f32 %v2034_v61, %v2035_v15  ;;  %v2086_v20 = vstv %s5869_s29 }
 0x1b6   : > { %v2002_v26 = vmax.f32 %v2000_v14, %v2001_v27  ;;  %v2028_v24 = vrot.slane %v2027_v33, 1  ;;  %v2011_v55 = vmax.f32 %v2009_v10, %v2010_v60  ;;  %v2052_v11 = vmax.f32 %v2050_v29, %v2051_v63 }
 0x1b7   : > { %v2045_v35 = vmax.f32 %v2043_v6, %v2044_v17  ;;  %v2020_v49 = vmax.f32 %v2018_v59, %v2019_v58  ;;  %v2037_v8 = vrot.slane %v2036_v9, 1  ;;  %vm5916_vm8 = vcmp.ge.s32.totalorder %v3244_v1, %v2086_v20 }
 0x1b8   : > { %v2029_v51 = vmax.f32 %v2027_v33, %v2028_v24  ;;  %v2061_v43 = vsel %vm5886_vm0, %v2002_v26, 0.0  ;;  %v2053_v41 = vrot.slane %v2052_v11, 2  ;;  %v2062_v3 = vsel %vm5886_vm0, %v2011_v55, 0.0 }
 0x1b9   : > { %v2046_v48 = vrot.slane %v2045_v35, 1  ;;  %v2063_v21 = vsel %vm5886_vm0, %v2020_v49, 0.0  ;;  %v2075_v25 = vsel %vm451_vm10, %v2062_v3, %v2061_v43  ;;  %v2038_v31 = vmax.f32 %v2036_v9, %v2037_v8 }
 0x1ba   : > { %v2064_v0 = vsel %vm5886_vm0, %v2029_v51, 0.0  ;;  %v2054_v62 = vmax.f32 %v2052_v11, %v2053_v41  ;;  %v2076_v52 = vsel %vm453_vm11, %v2063_v21, %v2075_v25  ;;  %vm2082_vm9 = vcmask 30720  }
 0x1bb   : > { %v2047_v44 = vmax.f32 %v2045_v35, %v2046_v48  ;;  %v2077_v19 = vsel %vm455_vm12, %v2064_v0, %v2076_v52  ;;  %vm2088_vm1 = vcmp.ge.s32.totalorder %v3258_v2, %v2086_v20  ;;  %v2089_v7 = vstv %s5878_s30 }
 0x1bc   : > { %v2055_v40 = vrot.slane %v2054_v62, 1  ;;  %v2065_v13 = vsel %vm5886_vm0, %v2038_v31, 0.0  ;;  %vm2090_vm2 = vcmp.lt.s32.totalorder %v3244_v1, %v2089_v7  ;;  %v2191_v28 = vstv %s5908_s7 }
 0x1bd   : > { %v2066_v4 = vsel %vm5886_vm0, %v2047_v44, 0.0  ;;  %v2078_v30 = vsel %vm457_vm13, %v2065_v13, %v2077_v19  ;;  %vm2091_vm3 = vcmp.lt.s32.totalorder %v3258_v2, %v2089_v7  ;;  %vm5935_vm4 = vmand %vm5916_vm8, %vm2090_vm2  ;;  %v2218_v45 = vstv %s5893_s20 }
 0x1be   : > { %v2056_v14 = vmax.f32 %v2054_v62, %v2055_v40  ;;  %v2079_v46 = vsel %vm459_vm14, %v2066_v4, %v2078_v30  ;;  %vm5941_vm6 = vmand %vm2088_vm1, %vm2091_vm3  ;;  %v2112_v57 = vsel %vm5935_vm4, %v5757_v5, -inf  ;;  %v2114_v10 = vsel %vm5935_vm4, %v5768_v18, -inf }
 0x1bf   : > { %v2113_v61 = vsel %vm5941_vm6, %v5759_v23, -inf  ;;  %v2115_v6 = vsel %vm5941_vm6, %v5770_v12, -inf  ;;  %v2116_v29 = vsel %vm5935_vm4, %v5772_v39, -inf  ;;  %v2117_v27 = vsel %vm5941_vm6, %v5778_v16, -inf }
 0x1c0   : > { %v2067_v59 = vsel %vm5886_vm0, %v2056_v14, 0.0  ;;  %v2118_v33 = vsel %vm5935_vm4, %v5780_v37, -inf  ;;  %v2119_v60 = vsel %vm5941_vm6, %v5782_v32, -inf  ;;  %v2120_v15 = vsel %vm5935_vm4, %v5795_v47, -inf }
 0x1c1   : > { %v2080_v17 = vsel %vm461_vm15, %v2067_v59, %v2079_v46  ;;  %v2121_v63 = vsel %vm5941_vm6, %v5797_v53, -inf  ;;  %v2122_v22 = vsel %vm5935_vm4, %v5805_v50, -inf  ;;  %v2123_v26 = vsel %vm5941_vm6, %v5807_v42, -inf }
 0x1c2   : > { %2083 = vst.msk [vmem:[%s5954_s11] sm:$0x7f] %vm2082_vm9, %v2080_v17  ;;  %v2124_v58 = vsel %vm5935_vm4, %v5866_v56, -inf  ;;  %v2125_v24 = vsel %vm5941_vm6, %v5871_v36, -inf  ;;  %v2126_v55 = vsel %vm270_vm5, %v2112_v57, -inf  ;;  %v2127_v9 = vsel %vm270_vm5, %v2113_v61, -inf }
 0x1c3   : > { %v2128_v35 = vmax.f32 %v2126_v55, %v2127_v9  ;;  %v2135_v11 = vsel %vm270_vm5, %v2114_v10, -inf  ;;  %v2136_v49 = vsel %vm270_vm5, %v2115_v6, -inf  ;;  %v2144_v51 = vsel %vm270_vm5, %v2116_v29, -inf }
 0x1c4   : > { %v2137_v43 = vmax.f32 %v2135_v11, %v2136_v49  ;;  %v2145_v20 = vsel %vm270_vm5, %v2117_v27, -inf  ;;  %v2153_v8 = vsel %vm270_vm5, %v2118_v33, -inf  ;;  %v2154_v48 = vsel %vm270_vm5, %v2119_v60, -inf }
 0x1c5   : > { %v2129_v41 = vrot.slane %v2128_v35, 4  ;;  %v2146_v3 = vmax.f32 %v2144_v51, %v2145_v20  ;;  %v2155_v21 = vmax.f32 %v2153_v8, %v2154_v48  ;;  %v2162_v0 = vsel %vm270_vm5, %v2120_v15, -inf }
 0x1c6   : > { %v2138_v25 = vrot.slane %v2137_v43, 4  ;;  %v2163_v34 = vsel %vm270_vm5, %v2121_v63, -inf  ;;  %v2171_v31 = vsel %vm270_vm5, %v2122_v22, -inf  ;;  %v2172_v44 = vsel %vm270_vm5, %v2123_v26, -inf }
 0x1c7   : > { %vm6009_vm7 = vcmp.eq.s32.totalorder %v2191_v28, 1  ;;  %v2130_v52 = vmax.f32 %v2128_v35, %v2129_v41  ;;  %v2147_v19 = vrot.slane %v2146_v3, 4  ;;  %v2156_v7 = vrot.slane %v2155_v21, 4 }
 0x1c8   : > { %v2164_v40 = vmax.f32 %v2162_v0, %v2163_v34  ;;  %v2139_v13 = vmax.f32 %v2137_v43, %v2138_v25  ;;  %v2173_v4 = vmax.f32 %v2171_v31, %v2172_v44  ;;  %v2180_v30 = vsel %vm270_vm5, %v2124_v58, -inf }
 0x1c9   : > { %v2181_v54 = vsel %vm270_vm5, %v2125_v24, -inf  ;;  %v2131_v14 = vrot.slane %v2130_v52, 2  ;;  %v2148_v46 = vmax.f32 %v2146_v3, %v2147_v19  ;;  %v2157_v28 = vmax.f32 %v2155_v21, %v2156_v7 }
 0x1ca   : > { %v2165_v38 = vrot.slane %v2164_v40, 4  ;;  %v2140_v57 = vrot.slane %v2139_v13, 2  ;;  %v2174_v10 = vrot.slane %v2173_v4, 4  ;;  %v2182_v61 = vmax.f32 %v2180_v30, %v2181_v54 }
 0x1cb   : > { %vm6021_vm0 = vcmp.ge.s32.totalorder %v3244_v1, %v2218_v45  ;;  %v2132_v29 = vmax.f32 %v2130_v52, %v2131_v14  ;;  %v2149_v27 = vrot.slane %v2148_v46, 2  ;;  %v2158_v59 = vrot.slane %v2157_v28, 2 }
 0x1cc   : > { %v2166_v33 = vmax.f32 %v2164_v40, %v2165_v38  ;;  %v2141_v60 = vmax.f32 %v2139_v13, %v2140_v57  ;;  %v2175_v15 = vmax.f32 %v2173_v4, %v2174_v10  ;;  %v2183_v17 = vrot.slane %v2182_v61, 4 }
 0x1cd   : > { %vm6028_vm8 = vcmp.ge.s32.totalorder %v3258_v2, %v2218_v45  ;;  %v2133_v22 = vrot.slane %v2132_v29, 1  ;;  %v2150_v26 = vmax.f32 %v2148_v46, %v2149_v27  ;;  %v2159_v58 = vmax.f32 %v2157_v28, %v2158_v59 }
 0x1ce   : > { %v2167_v24 = vrot.slane %v2166_v33, 2  ;;  %v2142_v55 = vrot.slane %v2141_v60, 1  ;;  %v2176_v9 = vrot.slane %v2175_v15, 2  ;;  %v2184_v35 = vmax.f32 %v2182_v61, %v2183_v17 }
 0x1cf   : > { %v2221_v11 = vstv %s6014_s1  ;;  %v2134_v49 = vmax.f32 %v2132_v29, %v2133_v22  ;;  %v2151_v51 = vrot.slane %v2150_v26, 1  ;;  %v2160_v43 = vrot.slane %v2159_v58, 1 }
 0x1d0   : > { %v2168_v20 = vmax.f32 %v2166_v33, %v2167_v24  ;;  %v2143_v8 = vmax.f32 %v2141_v60, %v2142_v55  ;;  %v2177_v48 = vmax.f32 %v2175_v15, %v2176_v9  ;;  %v2185_v41 = vrot.slane %v2184_v35, 2 }
 0x1d1   : > { %vm2222_vm1 = vcmp.lt.s32.totalorder %v3244_v1, %v2221_v11  ;;  %v2152_v45 = vmax.f32 %v2150_v26, %v2151_v51  ;;  %v2161_v3 = vmax.f32 %v2159_v58, %v2160_v43  ;;  %v2193_v0 = vsel %vm6009_vm7, %v2134_v49, 0.0 }
 0x1d2   : > { %v2169_v21 = vrot.slane %v2168_v20, 1  ;;  %vm6038_vm2 = vmand %vm6021_vm0, %vm2222_vm1  ;;  %v2178_v34 = vrot.slane %v2177_v48, 1  ;;  %v2186_v31 = vmax.f32 %v2184_v35, %v2185_v41  ;;  %v2194_v44 = vsel %vm6009_vm7, %v2143_v8, 0.0 }
 0x1d3   : > { %vm2223_vm3 = vcmp.lt.s32.totalorder %v3258_v2, %v2221_v11  ;;  %v2195_v19 = vsel %vm6009_vm7, %v2152_v45, 0.0  ;;  %v2196_v7 = vsel %vm6009_vm7, %v2161_v3, 0.0  ;;  %v2207_v40 = vsel %vm451_vm10, %v2194_v44, %v2193_v0 }
 0x1d4   : > { %v2170_v52 = vmax.f32 %v2168_v20, %v2169_v21  ;;  %vm6052_vm4 = vmand %vm6028_vm8, %vm2223_vm3  ;;  %v2179_v4 = vmax.f32 %v2177_v48, %v2178_v34  ;;  %v2187_v30 = vrot.slane %v2186_v31, 1  ;;  %v2208_v54 = vsel %vm453_vm11, %v2195_v19, %v2207_v40 }
 0x1d5   : > { %v2244_v14 = vsel %vm6038_vm2, %v5757_v5, -inf  ;;  %v2209_v28 = vsel %vm455_vm12, %v2196_v7, %v2208_v54  ;;  %v2245_v38 = vsel %vm6052_vm4, %v5759_v23, -inf  ;;  %v2246_v57 = vsel %vm6038_vm2, %v5768_v18, -inf }
 0x1d6   : > { %v2197_v46 = vsel %vm6009_vm7, %v2170_v52, 0.0  ;;  %v2188_v10 = vmax.f32 %v2186_v31, %v2187_v30  ;;  %v2198_v61 = vsel %vm6009_vm7, %v2179_v4, 0.0  ;;  %v2247_v29 = vsel %vm6052_vm4, %v5770_v12, -inf }
 0x1d7   : > { %v2210_v6 = vsel %vm457_vm13, %v2197_v46, %v2209_v28  ;;  %v2248_v59 = vsel %vm6038_vm2, %v5772_v39, -inf  ;;  %v2249_v33 = vsel %vm6052_vm4, %v5778_v16, -inf  ;;  %v2250_v60 = vsel %vm6038_vm2, %v5780_v37, -inf }
 0x1d8   : > { %v2211_v27 = vsel %vm459_vm14, %v2198_v61, %v2210_v6  ;;  %v2199_v15 = vsel %vm6009_vm7, %v2188_v10, 0.0  ;;  %v2251_v17 = vsel %vm6052_vm4, %v5782_v32, -inf  ;;  %v2252_v63 = vsel %vm6038_vm2, %v5795_v47, -inf }
 0x1d9   : > { %v2253_v22 = vsel %vm6052_vm4, %v5797_v53, -inf  ;;  %v2212_v26 = vsel %vm461_vm15, %v2199_v15, %v2211_v27  ;;  %v2254_v58 = vsel %vm6038_vm2, %v5805_v50, -inf  ;;  %v2255_v62 = vsel %vm6052_vm4, %v5807_v42, -inf }
 0x1da   : > { %v2256_v24 = vsel %vm6038_vm2, %v5866_v56, -inf  ;;  %2967 = vst.msk [vmem:[%s5954_s11 + $0x8] sm:$0x7f] %vm2082_vm9, %v2212_v26  ;;  %v2257_v55 = vsel %vm6052_vm4, %v5871_v36, -inf  ;;  %v2258_v9 = vsel %vm270_vm5, %v2244_v14, -inf  ;;  %v2259_v35 = vsel %vm270_vm5, %v2245_v38, -inf }
 0x1db   : > { %v2267_v11 = vsel %vm270_vm5, %v2246_v57, -inf  ;;  %v2260_v49 = vmax.f32 %v2258_v9, %v2259_v35  ;;  %v2268_v51 = vsel %vm270_vm5, %v2247_v29, -inf  ;;  %v2276_v43 = vsel %vm270_vm5, %v2248_v59, -inf }
 0x1dc   : > { %v2277_v20 = vsel %vm270_vm5, %v2249_v33, -inf  ;;  %v2269_v8 = vmax.f32 %v2267_v11, %v2268_v51  ;;  %v2285_v41 = vsel %vm270_vm5, %v2250_v60, -inf  ;;  %v2286_v45 = vsel %vm270_vm5, %v2251_v17, -inf }
 0x1dd   : > { %v2278_v48 = vmax.f32 %v2276_v43, %v2277_v20  ;;  %v2261_v3 = vrot.slane %v2260_v49, 4  ;;  %v2287_v21 = vmax.f32 %v2285_v41, %v2286_v45  ;;  %v2294_v0 = vsel %vm270_vm5, %v2252_v63, -inf }
 0x1de   : > { %v2295_v25 = vsel %vm270_vm5, %v2253_v22, -inf  ;;  %v2270_v34 = vrot.slane %v2269_v8, 4  ;;  %v2303_v52 = vsel %vm270_vm5, %v2254_v58, -inf  ;;  %v2304_v40 = vsel %vm270_vm5, %v2255_v62, -inf }
 0x1df   : > { %v2279_v31 = vrot.slane %v2278_v48, 4  ;;  %v2296_v44 = vmax.f32 %v2294_v0, %v2295_v25  ;;  %v2262_v19 = vmax.f32 %v2260_v49, %v2261_v3  ;;  %v2288_v7 = vrot.slane %v2287_v21, 4 }
 0x1e0   : > { %v2312_v13 = vsel %vm270_vm5, %v2256_v24, -inf  ;;  %v2271_v4 = vmax.f32 %v2269_v8, %v2270_v34  ;;  %v2305_v14 = vmax.f32 %v2303_v52, %v2304_v40  ;;  %v2313_v38 = vsel %vm270_vm5, %v2257_v55, -inf }
 0x1e1   : > { %v2280_v30 = vmax.f32 %v2278_v48, %v2279_v31  ;;  %v2297_v54 = vrot.slane %v2296_v44, 4  ;;  %v2263_v46 = vrot.slane %v2262_v19, 2  ;;  %v2289_v28 = vmax.f32 %v2287_v21, %v2288_v7 }
 0x1e2   : > { %v2323_v57 = vstv %s2322_s12  ;;  %v2272_v10 = vrot.slane %v2271_v4, 2  ;;  %v2306_v29 = vrot.slane %v2305_v14, 4  ;;  %v2314_v33 = vmax.f32 %v2312_v13, %v2313_v38 }
 0x1e3   : > { %v2281_v61 = vrot.slane %v2280_v30, 2  ;;  %v2298_v6 = vmax.f32 %v2296_v44, %v2297_v54  ;;  %v2264_v27 = vmax.f32 %v2262_v19, %v2263_v46  ;;  %v2290_v59 = vrot.slane %v2289_v28, 2 }
 0x1e4   : > { %vm6136_vm6 = vcmp.eq.s32.totalorder %v2323_v57, 1  ;;  %v2273_v15 = vmax.f32 %v2271_v4, %v2272_v10  ;;  %v2307_v22 = vmax.f32 %v2305_v14, %v2306_v29  ;;  %v2315_v62 = vrot.slane %v2314_v33, 4 }
 0x1e5   : > { %v2282_v17 = vmax.f32 %v2280_v30, %v2281_v61  ;;  %v2299_v63 = vrot.slane %v2298_v6, 2  ;;  %v2265_v26 = vrot.slane %v2264_v27, 1  ;;  %v2291_v58 = vmax.f32 %v2289_v28, %v2290_v59 }
 0x1e6   : > { %v2350_v24 = vstv %s6122_s28  ;;  %v2274_v55 = vrot.slane %v2273_v15, 1  ;;  %v2308_v11 = vrot.slane %v2307_v22, 2  ;;  %v2316_v43 = vmax.f32 %v2314_v33, %v2315_v62 }
 0x1e7   : > { %v2283_v9 = vrot.slane %v2282_v17, 1  ;;  %v2300_v35 = vmax.f32 %v2298_v6, %v2299_v63  ;;  %v2266_v49 = vmax.f32 %v2264_v27, %v2265_v26  ;;  %v2292_v51 = vrot.slane %v2291_v58, 1 }
 0x1e8   : > { %vm6144_vm7 = vcmp.ge.s32.totalorder %v3244_v1, %v2350_v24  ;;  %v2275_v8 = vmax.f32 %v2273_v15, %v2274_v55  ;;  %v2309_v45 = vmax.f32 %v2307_v22, %v2308_v11  ;;  %v2317_v21 = vrot.slane %v2316_v43, 2 }
 0x1e9   : > { %v2284_v48 = vmax.f32 %v2282_v17, %v2283_v9  ;;  %v2301_v41 = vrot.slane %v2300_v35, 1  ;;  %v2293_v3 = vmax.f32 %v2291_v58, %v2292_v51  ;;  %v2325_v0 = vsel %vm6136_vm6, %v2266_v49, 0.0 }
 0x1ea   : > { %vm6151_vm0 = vcmp.ge.s32.totalorder %v3258_v2, %v2350_v24  ;;  %v2310_v31 = vrot.slane %v2309_v45, 1  ;;  %v2326_v44 = vsel %vm6136_vm6, %v2275_v8, 0.0  ;;  %v2318_v19 = vmax.f32 %v2316_v43, %v2317_v21 }
 0x1eb   : > { %v2302_v34 = vmax.f32 %v2300_v35, %v2301_v41  ;;  %v2327_v52 = vsel %vm6136_vm6, %v2284_v48, 0.0  ;;  %v2328_v7 = vsel %vm6136_vm6, %v2293_v3, 0.0  ;;  %v2339_v40 = vsel %vm451_vm10, %v2326_v44, %v2325_v0 }
 0x1ec   : > { %v2353_v13 = vstv %s6133_s13  ;;  %v2311_v4 = vmax.f32 %v2309_v45, %v2310_v31  ;;  %v2340_v54 = vsel %vm453_vm11, %v2327_v52, %v2339_v40  ;;  %v2319_v14 = vrot.slane %v2318_v19, 1 }
 0x1ed   : > { %v2329_v30 = vsel %vm6136_vm6, %v2302_v34, 0.0  ;;  %vm2354_vm8 = vcmp.lt.s32.totalorder %v3244_v1, %v2353_v13  ;;  %v2341_v46 = vsel %vm455_vm12, %v2328_v7, %v2340_v54  ;;  %vm2355_vm1 = vcmp.lt.s32.totalorder %v3258_v2, %v2353_v13 }
 0x1ee   : > { %vm6176_vm2 = vmand %vm6144_vm7, %vm2354_vm8  ;;  %v2455_v38 = vstv %s6158_s8  ;;  %v2330_v57 = vsel %vm6136_vm6, %v2311_v4, 0.0  ;;  %v2342_v10 = vsel %vm457_vm13, %v2329_v30, %v2341_v46  ;;  %v2320_v27 = vmax.f32 %v2318_v19, %v2319_v14 }
 0x1ef   : > { %vm6186_vm3 = vmand %vm6151_vm0, %vm2355_vm1  ;;  %v2376_v6 = vsel %vm6176_vm2, %v5757_v5, -inf  ;;  %v2378_v29 = vsel %vm6176_vm2, %v5768_v18, -inf  ;;  %v2343_v59 = vsel %vm459_vm14, %v2330_v57, %v2342_v10  ;;  %v2380_v17 = vsel %vm6176_vm2, %v5772_v39, -inf }
 0x1f0   : > { %v2377_v33 = vsel %vm6186_vm3, %v5759_v23, -inf  ;;  %v2379_v15 = vsel %vm6186_vm3, %v5770_v12, -inf  ;;  %v2381_v63 = vsel %vm6186_vm3, %v5778_v16, -inf  ;;  %v2382_v22 = vsel %vm6176_vm2, %v5780_v37, -inf }
 0x1f1   : > { %v2383_v26 = vsel %vm6186_vm3, %v5782_v32, -inf  ;;  %v2331_v58 = vsel %vm6136_vm6, %v2320_v27, 0.0  ;;  %v2384_v62 = vsel %vm6176_vm2, %v5795_v47, -inf  ;;  %v2385_v24 = vsel %vm6186_vm3, %v5797_v53, -inf }
 0x1f2   : > { %v2386_v55 = vsel %vm6176_vm2, %v5805_v50, -inf  ;;  %v2344_v9 = vsel %vm461_vm15, %v2331_v58, %v2343_v59  ;;  %v2387_v35 = vsel %vm6186_vm3, %v5807_v42, -inf  ;;  %v2388_v60 = vsel %vm6176_vm2, %v5866_v56, -inf }
 0x1f3   : > { %v2389_v11 = vsel %vm6186_vm3, %v5871_v36, -inf  ;;  %2968 = vst.msk [vmem:[%s5954_s11 + $0x10] sm:$0x7f] %vm2082_vm9, %v2344_v9  ;;  %v2390_v49 = vsel %vm270_vm5, %v2376_v6, -inf  ;;  %v2391_v51 = vsel %vm270_vm5, %v2377_v33, -inf  ;;  %v2399_v43 = vsel %vm270_vm5, %v2378_v29, -inf }
 0x1f4   : > { %v2400_v20 = vsel %vm270_vm5, %v2379_v15, -inf  ;;  %v2392_v8 = vmax.f32 %v2390_v49, %v2391_v51  ;;  %v2408_v41 = vsel %vm270_vm5, %v2380_v17, -inf  ;;  %v2409_v45 = vsel %vm270_vm5, %v2381_v63, -inf }
 0x1f5   : > { %v2401_v48 = vmax.f32 %v2399_v43, %v2400_v20  ;;  %v2410_v3 = vmax.f32 %v2408_v41, %v2409_v45  ;;  %v2417_v21 = vsel %vm270_vm5, %v2382_v22, -inf  ;;  %v2418_v0 = vsel %vm270_vm5, %v2383_v26, -inf }
 0x1f6   : > { %v2426_v25 = vsel %vm270_vm5, %v2384_v62, -inf  ;;  %v2393_v34 = vrot.slane %v2392_v8, 4  ;;  %v2419_v44 = vmax.f32 %v2417_v21, %v2418_v0  ;;  %v2427_v52 = vsel %vm270_vm5, %v2385_v24, -inf }
 0x1f7   : > { %v2402_v31 = vrot.slane %v2401_v48, 4  ;;  %v2411_v19 = vrot.slane %v2410_v3, 4  ;;  %v2428_v7 = vmax.f32 %v2426_v25, %v2427_v52  ;;  %v2435_v40 = vsel %vm270_vm5, %v2386_v55, -inf }
 0x1f8   : > { %v2436_v13 = vsel %vm270_vm5, %v2387_v35, -inf  ;;  %v2394_v4 = vmax.f32 %v2392_v8, %v2393_v34  ;;  %v2420_v54 = vrot.slane %v2419_v44, 4  ;;  %v2444_v57 = vsel %vm270_vm5, %v2388_v60, -inf }
 0x1f9   : > { %v2403_v30 = vmax.f32 %v2401_v48, %v2402_v31  ;;  %v2437_v14 = vmax.f32 %v2435_v40, %v2436_v13  ;;  %v2412_v46 = vmax.f32 %v2410_v3, %v2411_v19  ;;  %v2429_v28 = vrot.slane %v2428_v7, 4 }
 0x1fa   : > { %v2445_v10 = vsel %vm270_vm5, %v2389_v11, -inf  ;;  %v2395_v61 = vrot.slane %v2394_v4, 2  ;;  %v2421_v29 = vmax.f32 %v2419_v44, %v2420_v54  ;;  %vm6258_vm4 = vcmp.eq.s32.totalorder %v2455_v38, 1 }
 0x1fb   : > { %v2404_v6 = vrot.slane %v2403_v30, 2  ;;  %v2438_v27 = vrot.slane %v2437_v14, 4  ;;  %v2413_v59 = vrot.slane %v2412_v46, 2  ;;  %v2430_v33 = vmax.f32 %v2428_v7, %v2429_v28 }
 0x1fc   : > { %v2446_v15 = vmax.f32 %v2444_v57, %v2445_v10  ;;  %v2396_v63 = vmax.f32 %v2394_v4, %v2395_v61  ;;  %v2422_v26 = vrot.slane %v2421_v29, 2  ;;  %v2482_v9 = vstv %s6248_s16 }
 0x1fd   : > { %v2405_v22 = vmax.f32 %v2403_v30, %v2404_v6  ;;  %v2439_v58 = vmax.f32 %v2437_v14, %v2438_v27  ;;  %v2414_v62 = vmax.f32 %v2412_v46, %v2413_v59  ;;  %v2431_v24 = vrot.slane %v2430_v33, 2 }
 0x1fe   : > { %v2447_v55 = vrot.slane %v2446_v15, 4  ;;  %v2397_v35 = vrot.slane %v2396_v63, 1  ;;  %v2423_v11 = vmax.f32 %v2421_v29, %v2422_v26  ;;  %vm6266_vm6 = vcmp.ge.s32.totalorder %v3244_v1, %v2482_v9 }
 0x1ff   : > { %v2406_v60 = vrot.slane %v2405_v22, 1  ;;  %v2440_v49 = vrot.slane %v2439_v58, 2  ;;  %v2415_v51 = vrot.slane %v2414_v62, 1  ;;  %v2432_v38 = vmax.f32 %v2430_v33, %v2431_v24 }
 0x200   : > { %v2448_v43 = vmax.f32 %v2446_v15, %v2447_v55  ;;  %v2398_v8 = vmax.f32 %v2396_v63, %v2397_v35  ;;  %v2424_v41 = vrot.slane %v2423_v11, 1  ;;  %vm6271_vm7 = vcmp.ge.s32.totalorder %v3258_v2, %v2482_v9 }
 0x201   : > { %v2407_v48 = vmax.f32 %v2405_v22, %v2406_v60  ;;  %v2441_v45 = vmax.f32 %v2439_v58, %v2440_v49  ;;  %v2416_v3 = vmax.f32 %v2414_v62, %v2415_v51  ;;  %v2433_v21 = vrot.slane %v2432_v38, 1 }
 0x202   : > { %v2449_v0 = vrot.slane %v2448_v43, 2  ;;  %v2425_v34 = vmax.f32 %v2423_v11, %v2424_v41  ;;  %v2457_v44 = vsel %vm6258_vm4, %v2398_v8, 0.0  ;;  %v2485_v14 = vstv %s6254_s18 }
 0x203   : > { %v2442_v31 = vrot.slane %v2441_v45, 1  ;;  %v2458_v52 = vsel %vm6258_vm4, %v2407_v48, 0.0  ;;  %v2434_v19 = vmax.f32 %v2432_v38, %v2433_v21  ;;  %v2459_v40 = vsel %vm6258_vm4, %v2416_v3, 0.0 }
 0x204   : > { %v2450_v7 = vmax.f32 %v2448_v43, %v2449_v0  ;;  %v2471_v13 = vsel %vm451_vm10, %v2458_v52, %v2457_v44  ;;  %v2460_v30 = vsel %vm6258_vm4, %v2425_v34, 0.0  ;;  %vm2486_vm0 = vcmp.lt.s32.totalorder %v3244_v1, %v2485_v14 }
 0x205   : > { %v2443_v4 = vmax.f32 %v2441_v45, %v2442_v31  ;;  %v2472_v54 = vsel %vm453_vm11, %v2459_v40, %v2471_v13  ;;  %v2461_v28 = vsel %vm6258_vm4, %v2434_v19, 0.0  ;;  %vm2487_vm8 = vcmp.lt.s32.totalorder %v3258_v2, %v2485_v14  ;;  %vm6301_vm1 = vmand %vm6266_vm6, %vm2486_vm0 }
 0x206   : > { %v2451_v46 = vrot.slane %v2450_v7, 1  ;;  %v2473_v57 = vsel %vm455_vm12, %v2460_v30, %v2472_v54  ;;  %v2587_v29 = vstv %s6282_s0  ;;  %vm6309_vm2 = vmand %vm6271_vm7, %vm2487_vm8  ;;  %v2508_v15 = vsel %vm6301_vm1, %v5757_v5, -inf }
 0x207   : > { %v2462_v10 = vsel %vm6258_vm4, %v2443_v4, 0.0  ;;  %v2474_v61 = vsel %vm457_vm13, %v2461_v28, %v2473_v57  ;;  %v2510_v63 = vsel %vm6301_vm1, %v5768_v18, -inf  ;;  %v2509_v22 = vsel %vm6309_vm2, %v5759_v23, -inf }
 0x208   : > { %v2452_v27 = vmax.f32 %v2450_v7, %v2451_v46  ;;  %v2475_v59 = vsel %vm459_vm14, %v2462_v10, %v2474_v61  ;;  %v2511_v26 = vsel %vm6309_vm2, %v5770_v12, -inf  ;;  %v2512_v58 = vsel %vm6301_vm1, %v5772_v39, -inf }
 0x209   : > { %v2513_v5 = vsel %vm6309_vm2, %v5778_v16, -inf  ;;  %v2514_v18 = vsel %vm6301_vm1, %v5780_v37, -inf  ;;  %v2515_v23 = vsel %vm6309_vm2, %v5782_v32, -inf  ;;  %v2516_v12 = vsel %vm6301_vm1, %v5795_v47, -inf }
 0x20a   : > { %v2463_v62 = vsel %vm6258_vm4, %v2452_v27, 0.0  ;;  %v2517_v16 = vsel %vm6309_vm2, %v5797_v53, -inf  ;;  %v2518_v17 = vsel %vm6301_vm1, %v5805_v50, -inf  ;;  %v2519_v37 = vsel %vm6309_vm2, %v5807_v42, -inf }
 0x20b   : > { %v2476_v39 = vsel %vm461_vm15, %v2463_v62, %v2475_v59  ;;  %v2520_v32 = vsel %vm6301_vm1, %v5866_v56, -inf  ;;  %v2521_v47 = vsel %vm6309_vm2, %v5871_v36, -inf  ;;  %v2522_v53 = vsel %vm270_vm5, %v2508_v15, -inf }
 0x20c   : > { %2969 = vst.msk [vmem:[%s5954_s11 + $0x18] sm:$0x7f] %vm2082_vm9, %v2476_v39  ;;  %v2523_v24 = vsel %vm270_vm5, %v2509_v22, -inf  ;;  %v2531_v50 = vsel %vm270_vm5, %v2510_v63, -inf  ;;  %v2532_v9 = vsel %vm270_vm5, %v2511_v26, -inf  ;;  %v2540_v42 = vsel %vm270_vm5, %v2512_v58, -inf }
 0x20d   : > { %v2524_v55 = vmax.f32 %v2522_v53, %v2523_v24  ;;  %v2533_v35 = vmax.f32 %v2531_v50, %v2532_v9  ;;  %v2541_v60 = vsel %vm270_vm5, %v2513_v5, -inf  ;;  %v2549_v56 = vsel %vm270_vm5, %v2514_v18, -inf  ;;  %v6407_v9 = vld [vmem:[#allocation2] sm:$0xff] }
 0x20e   : > { %v2550_v11 = vsel %vm270_vm5, %v2515_v23, -inf  ;;  %v2542_v49 = vmax.f32 %v2540_v42, %v2541_v60  ;;  %v2558_v38 = vsel %vm270_vm5, %v2516_v12, -inf  ;;  %v2559_v20 = vsel %vm270_vm5, %v2517_v16, -inf }
 0x20f   : > { %v2525_v36 = vrot.slane %v2524_v55, 4  ;;  %v2551_v51 = vmax.f32 %v2549_v56, %v2550_v11  ;;  %v2534_v43 = vrot.slane %v2533_v35, 4  ;;  %v2567_v8 = vsel %vm270_vm5, %v2518_v17, -inf  ;;  %v6414_v11 = vld [vmem:[#allocation2 + $0x8] sm:$0xff] }
 0x210   : > { %v2568_v48 = vsel %vm270_vm5, %v2519_v37, -inf  ;;  %v2543_v45 = vrot.slane %v2542_v49, 4  ;;  %v2560_v21 = vmax.f32 %v2558_v38, %v2559_v20  ;;  %v2576_v34 = vsel %vm270_vm5, %v2520_v32, -inf  ;;  %v6422_v20 = vld [vmem:[#allocation2 + $0x20] sm:$0xff] }
 0x211   : > { %v2526_v41 = vmax.f32 %v2524_v55, %v2525_v36  ;;  %v2552_v3 = vrot.slane %v2551_v51, 4  ;;  %v2535_v0 = vmax.f32 %v2533_v35, %v2534_v43  ;;  %v2569_v25 = vmax.f32 %v2567_v8, %v2568_v48  ;;  %v6416_v36 = vld [vmem:[#allocation2 + $0x10] sm:$0xff]  ;;  %v6424_v8 = vld [vmem:[#allocation2 + $0x28] sm:$0xff] }
 0x212   : > { %v2577_v31 = vsel %vm270_vm5, %v2521_v47, -inf  ;;  %v2544_v52 = vmax.f32 %v2542_v49, %v2543_v45  ;;  %v2561_v7 = vrot.slane %v2560_v21, 4  ;;  %vm6380_vm3 = vcmp.eq.s32.totalorder %v2587_v29, 1  ;;  %v6418_v49 = vld [vmem:[#allocation2 + $0x18] sm:$0xff]  ;;  %v6426_v48 = vld [vmem:[#allocation2 + $0x30] sm:$0xff] }
 0x213   : > { %v2527_v44 = vrot.slane %v2526_v41, 2  ;;  %v2553_v19 = vmax.f32 %v2551_v51, %v2552_v3  ;;  %v2536_v40 = vrot.slane %v2535_v0, 2  ;;  %v2570_v13 = vrot.slane %v2569_v25, 4 }
 0x214   : > { %v2578_v4 = vmax.f32 %v2576_v34, %v2577_v31  ;;  %v2545_v14 = vrot.slane %v2544_v52, 2  ;;  %v2562_v28 = vmax.f32 %v2560_v21, %v2561_v7  ;;  %v2614_v6 = vstv %s6369_s19  ;;  %v6438_v21 = vld [vmem:[#allocation2 + $0x38] sm:$0xff]  ;;  %v6454_v7 = vld [vmem:[#allocation2 + $0x50] sm:$0xff] }
 0x215   : > { %v2528_v54 = vmax.f32 %v2526_v41, %v2527_v44  ;;  %v2554_v46 = vrot.slane %v2553_v19, 2  ;;  %v2537_v57 = vmax.f32 %v2535_v0, %v2536_v40  ;;  %v2571_v10 = vmax.f32 %v2569_v25, %v2570_v13  ;;  %v6440_v0 = vld [vmem:[#allocation2 + $0x40] sm:$0xff] }
 0x216   : > { %v2579_v61 = vrot.slane %v2578_v4, 4  ;;  %v2546_v59 = vmax.f32 %v2544_v52, %v2545_v14  ;;  %v2563_v15 = vrot.slane %v2562_v28, 2  ;;  %vm6388_vm4 = vcmp.ge.s32.totalorder %v3244_v1, %v2614_v6  ;;  %v6464_v14 = vld [vmem:[#allocation2 + $0x68] sm:$0xff] }
 0x217   : > { %v2529_v27 = vrot.slane %v2528_v54, 1  ;;  %v2555_v33 = vmax.f32 %v2553_v19, %v2554_v46  ;;  %v2538_v63 = vrot.slane %v2537_v57, 1  ;;  %v2572_v29 = vrot.slane %v2571_v10, 2  ;;  %v6452_v19 = vld [vmem:[#allocation2 + $0x48] sm:$0xff] }
 0x218   : > { %v2580_v22 = vmax.f32 %v2578_v4, %v2579_v61  ;;  %v2547_v5 = vrot.slane %v2546_v59, 1  ;;  %v2564_v18 = vmax.f32 %v2562_v28, %v2563_v15  ;;  %vm6393_vm6 = vcmp.ge.s32.totalorder %v3258_v2, %v2614_v6  ;;  %v6460_v4 = vld [vmem:[#allocation2 + $0x58] sm:$0xff] }
 0x219   : > { %v2530_v58 = vmax.f32 %v2528_v54, %v2529_v27  ;;  %v2556_v62 = vrot.slane %v2555_v33, 1  ;;  %v2539_v23 = vmax.f32 %v2537_v57, %v2538_v63  ;;  %v2573_v12 = vmax.f32 %v2571_v10, %v2572_v29  ;;  %v6462_v54 = vld [vmem:[#allocation2 + $0x60] sm:$0xff] }
 0x21a   : > { %v2581_v39 = vrot.slane %v2580_v22, 2  ;;  %v2548_v17 = vmax.f32 %v2546_v59, %v2547_v5  ;;  %v2565_v32 = vrot.slane %v2564_v18, 1  ;;  %v2617_v50 = vstv %s6376_s22 }
 0x21b   : > { %v2557_v37 = vmax.f32 %v2555_v33, %v2556_v62  ;;  %v2589_v47 = vsel %vm6380_vm3, %v2530_v58, 0.0  ;;  %v2574_v53 = vrot.slane %v2573_v12, 1  ;;  %v2590_v55 = vsel %vm6380_vm3, %v2539_v23, 0.0 }
 0x21c   : > { %v2582_v24 = vmax.f32 %v2580_v22, %v2581_v39  ;;  %v2566_v42 = vmax.f32 %v2564_v18, %v2565_v32  ;;  %v2591_v35 = vsel %vm6380_vm3, %v2548_v17, 0.0  ;;  %v2603_v56 = vsel %vm451_vm10, %v2590_v55, %v2589_v47 }
 0x21d   : > { %v2592_v60 = vsel %vm6380_vm3, %v2557_v37, 0.0  ;;  %v2575_v51 = vmax.f32 %v2573_v12, %v2574_v53  ;;  %v2604_v43 = vsel %vm453_vm11, %v2591_v35, %v2603_v56  ;;  %vm2618_vm7 = vcmp.lt.s32.totalorder %v3244_v1, %v2617_v50 }
 0x21e   : > { %v2583_v38 = vrot.slane %v2582_v24, 1  ;;  %v2593_v41 = vsel %vm6380_vm3, %v2566_v42, 0.0  ;;  %v2605_v45 = vsel %vm455_vm12, %v2592_v60, %v2604_v43  ;;  %vm2619_vm0 = vcmp.lt.s32.totalorder %v3258_v2, %v2617_v50  ;;  %vm6434_vm8 = vmand %vm6388_vm4, %vm2618_vm7 }
 0x21f   : > { %v2719_v25 = vstv %s6402_s14  ;;  %v2594_v31 = vsel %vm6380_vm3, %v2575_v51, 0.0  ;;  %v2606_v44 = vsel %vm457_vm13, %v2593_v41, %v2605_v45  ;;  %vm6448_vm1 = vmand %vm6393_vm6, %vm2619_vm0  ;;  %v2640_v40 = vsel %vm6434_vm8, %v6407_v9, -inf }
 0x220   : > { %v2584_v34 = vmax.f32 %v2582_v24, %v2583_v38  ;;  %v2607_v13 = vsel %vm459_vm14, %v2594_v31, %v2606_v44  ;;  %v2641_v46 = vsel %vm6448_vm1, %v6414_v11, -inf  ;;  %v2642_v28 = vsel %vm6434_vm8, %v6416_v36, -inf }
 0x221   : > { %v2643_v57 = vsel %vm6448_vm1, %v6418_v49, -inf  ;;  %v2644_v61 = vsel %vm6434_vm8, %v6422_v20, -inf  ;;  %v2645_v6 = vsel %vm6448_vm1, %v6424_v8, -inf  ;;  %v2646_v27 = vsel %vm6434_vm8, %v6426_v48, -inf }
 0x222   : > { %v2595_v10 = vsel %vm6380_vm3, %v2584_v34, 0.0  ;;  %v2647_v33 = vsel %vm6448_vm1, %v6438_v21, -inf  ;;  %v2648_v30 = vsel %vm6434_vm8, %v6440_v0, -inf  ;;  %v2649_v15 = vsel %vm6448_vm1, %v6452_v19, -inf }
 0x223   : > { %v2608_v59 = vsel %vm461_vm15, %v2595_v10, %v2607_v13  ;;  %v2650_v63 = vsel %vm6434_vm8, %v6454_v7, -inf  ;;  %v2651_v29 = vsel %vm6448_vm1, %v6460_v4, -inf  ;;  %v2652_v22 = vsel %vm6434_vm8, %v6462_v54, -inf }
 0x224   : > { %2970 = vst.msk [vmem:[%s5954_s11 + $0x20] sm:$0x7f] %vm2082_vm9, %v2608_v59  ;;  %v2653_v26 = vsel %vm6448_vm1, %v6464_v14, -inf  ;;  %v2654_v58 = vsel %vm270_vm5, %v2640_v40, -inf  ;;  %v2655_v5 = vsel %vm270_vm5, %v2641_v46, -inf  ;;  %v2663_v62 = vsel %vm270_vm5, %v2642_v28, -inf }
 0x225   : > { %v2664_v18 = vsel %vm270_vm5, %v2643_v57, -inf  ;;  %v2656_v23 = vmax.f32 %v2654_v58, %v2655_v5  ;;  %v2672_v39 = vsel %vm270_vm5, %v2644_v61, -inf  ;;  %v2673_v16 = vsel %vm270_vm5, %v2645_v6, -inf }
 0x226   : > { %v2665_v12 = vmax.f32 %v2663_v62, %v2664_v18  ;;  %v2674_v17 = vmax.f32 %v2672_v39, %v2673_v16  ;;  %v2681_v37 = vsel %vm270_vm5, %v2646_v27, -inf  ;;  %v2682_v32 = vsel %vm270_vm5, %v2647_v33, -inf }
 0x227   : > { %v2690_v47 = vsel %vm270_vm5, %v2648_v30, -inf  ;;  %v2657_v53 = vrot.slane %v2656_v23, 4  ;;  %v2683_v55 = vmax.f32 %v2681_v37, %v2682_v32  ;;  %v2691_v50 = vsel %vm270_vm5, %v2649_v15, -inf }
 0x228   : > { %v2666_v24 = vrot.slane %v2665_v12, 4  ;;  %v2675_v42 = vrot.slane %v2674_v17, 4  ;;  %v2692_v35 = vmax.f32 %v2690_v47, %v2691_v50  ;;  %v2699_v60 = vsel %vm270_vm5, %v2650_v63, -inf }
 0x229   : > { %v2700_v56 = vsel %vm270_vm5, %v2651_v29, -inf  ;;  %v2658_v51 = vmax.f32 %v2656_v23, %v2657_v53  ;;  %v2684_v43 = vrot.slane %v2683_v55, 4  ;;  %v2708_v34 = vsel %vm270_vm5, %v2652_v22, -inf }
 0x22a   : > { %v2667_v38 = vmax.f32 %v2665_v12, %v2666_v24  ;;  %v2701_v41 = vmax.f32 %v2699_v60, %v2700_v56  ;;  %v2676_v45 = vmax.f32 %v2674_v17, %v2675_v42  ;;  %v2693_v3 = vrot.slane %v2692_v35, 4 }
 0x22b   : > { %v2709_v31 = vsel %vm270_vm5, %v2653_v26, -inf  ;;  %v2659_v44 = vrot.slane %v2658_v51, 2  ;;  %v2685_v40 = vmax.f32 %v2683_v55, %v2684_v43  ;;  %vm6529_vm2 = vcmp.eq.s32.totalorder %v2719_v25, 1 }
 0x22c   : > { %v2668_v52 = vrot.slane %v2667_v38, 2  ;;  %v2702_v13 = vrot.slane %v2701_v41, 4  ;;  %v2677_v46 = vrot.slane %v2676_v45, 2  ;;  %v2694_v28 = vmax.f32 %v2692_v35, %v2693_v3 }
 0x22d   : > { %v2710_v57 = vmax.f32 %v2708_v34, %v2709_v31  ;;  %v2660_v61 = vmax.f32 %v2658_v51, %v2659_v44  ;;  %v2686_v27 = vrot.slane %v2685_v40, 2  ;;  %v2746_v63 = vstv %s6520_s23 }
 0x22e   : > { %v2669_v6 = vmax.f32 %v2667_v38, %v2668_v52  ;;  %v2703_v59 = vmax.f32 %v2701_v41, %v2702_v13  ;;  %v2678_v33 = vmax.f32 %v2676_v45, %v2677_v46  ;;  %v2695_v30 = vrot.slane %v2694_v28, 2 }
 0x22f   : > { %v2711_v15 = vrot.slane %v2710_v57, 4  ;;  %v2661_v29 = vrot.slane %v2660_v61, 1  ;;  %v2687_v26 = vmax.f32 %v2685_v40, %v2686_v27  ;;  %vm6538_vm3 = vcmp.ge.s32.totalorder %v3244_v1, %v2746_v63 }
 0x230   : > { %v2670_v22 = vrot.slane %v2669_v6, 1  ;;  %v2704_v58 = vrot.slane %v2703_v59, 2  ;;  %v2679_v5 = vrot.slane %v2678_v33, 1  ;;  %v2696_v62 = vmax.f32 %v2694_v28, %v2695_v30 }
 0x231   : > { %v2712_v25 = vmax.f32 %v2710_v57, %v2711_v15  ;;  %v2662_v23 = vmax.f32 %v2660_v61, %v2661_v29  ;;  %v2688_v39 = vrot.slane %v2687_v26, 1  ;;  %vm6543_vm4 = vcmp.ge.s32.totalorder %v3258_v2, %v2746_v63 }
 0x232   : > { %v2671_v12 = vmax.f32 %v2669_v6, %v2670_v22  ;;  %v2705_v16 = vmax.f32 %v2703_v59, %v2704_v58  ;;  %v2680_v17 = vmax.f32 %v2678_v33, %v2679_v5  ;;  %v2697_v37 = vrot.slane %v2696_v62, 1 }
 0x233   : > { %v2713_v32 = vrot.slane %v2712_v25, 2  ;;  %v2689_v53 = vmax.f32 %v2687_v26, %v2688_v39  ;;  %v2721_v55 = vsel %vm6529_vm2, %v2662_v23, 0.0  ;;  %v2749_v41 = vstv %s6534_s24 }
 0x234   : > { %v2706_v24 = vrot.slane %v2705_v16, 1  ;;  %v2722_v50 = vsel %vm6529_vm2, %v2671_v12, 0.0  ;;  %v2698_v42 = vmax.f32 %v2696_v62, %v2697_v37  ;;  %v2723_v60 = vsel %vm6529_vm2, %v2680_v17, 0.0 }
 0x235   : > { %v2714_v35 = vmax.f32 %v2712_v25, %v2713_v32  ;;  %v2735_v56 = vsel %vm451_vm10, %v2722_v50, %v2721_v55  ;;  %v2724_v38 = vsel %vm6529_vm2, %v2689_v53, 0.0  ;;  %vm2750_vm6 = vcmp.lt.s32.totalorder %v3244_v1, %v2749_v41 }
 0x236   : > { %v2707_v51 = vmax.f32 %v2705_v16, %v2706_v24  ;;  %v2736_v43 = vsel %vm453_vm11, %v2723_v60, %v2735_v56  ;;  %v2725_v3 = vsel %vm6529_vm2, %v2698_v42, 0.0  ;;  %vm2751_vm7 = vcmp.lt.s32.totalorder %v3258_v2, %v2749_v41  ;;  %vm6568_vm0 = vmand %vm6538_vm3, %vm2750_vm6 }
 0x237   : > { %v2715_v45 = vrot.slane %v2714_v35, 1  ;;  %v2737_v34 = vsel %vm455_vm12, %v2724_v38, %v2736_v43  ;;  %vm6575_vm8 = vmand %vm6543_vm4, %vm2751_vm7  ;;  %v2772_v2 = vsel %vm6568_vm0, %v6407_v9, -inf  ;;  %v2774_v46 = vsel %vm6568_vm0, %v6416_v36, -inf }
 0x238   : > { %v2726_v31 = vsel %vm6529_vm2, %v2707_v51, 0.0  ;;  %v2738_v44 = vsel %vm457_vm13, %v2725_v3, %v2737_v34  ;;  %v2773_v28 = vsel %vm6575_vm8, %v6414_v11, -inf  ;;  %v2775_v57 = vsel %vm6575_vm8, %v6418_v49, -inf }
 0x239   : > { %v2716_v40 = vmax.f32 %v2714_v35, %v2715_v45  ;;  %v2739_v13 = vsel %vm459_vm14, %v2726_v31, %v2738_v44  ;;  %v2776_v61 = vsel %vm6568_vm0, %v6422_v20, -inf  ;;  %v2777_v9 = vsel %vm6575_vm8, %v6424_v8, -inf }
 0x23a   : > { %v2778_v11 = vsel %vm6568_vm0, %v6426_v48, -inf  ;;  %v2779_v49 = vsel %vm6575_vm8, %v6438_v21, -inf  ;;  %v2780_v6 = vsel %vm6568_vm0, %v6440_v0, -inf  ;;  %v2781_v8 = vsel %vm6575_vm8, %v6452_v19, -inf }
 0x23b   : > { %v2727_v36 = vsel %vm6529_vm2, %v2716_v40, 0.0  ;;  %v2782_v10 = vsel %vm6568_vm0, %v6454_v7, -inf  ;;  %v2783_v48 = vsel %vm6575_vm8, %v6460_v4, -inf  ;;  %v2784_v21 = vsel %vm6568_vm0, %v6462_v54, -inf }
 0x23c   : > { %v2740_v20 = vsel %vm461_vm15, %v2727_v36, %v2739_v13  ;;  %v2785_v0 = vsel %vm6575_vm8, %v6464_v14, -inf  ;;  %v2786_v19 = vsel %vm270_vm5, %v2772_v2, -inf  ;;  %v2787_v27 = vsel %vm270_vm5, %v2773_v28, -inf }
 0x23d   : > { %2971 = vst.msk [vmem:[%s5954_s11 + $0x28] sm:$0x7f] %vm2082_vm9, %v2740_v20  ;;  %v2788_v7 = vmax.f32 %v2786_v19, %v2787_v27  ;;  %v2795_v4 = vsel %vm270_vm5, %v2774_v46, -inf  ;;  %v2796_v59 = vsel %vm270_vm5, %v2775_v57, -inf  ;;  %v2804_v33 = vsel %vm270_vm5, %v2776_v61, -inf }
 0x23e   : > { %v2797_v30 = vmax.f32 %v2795_v4, %v2796_v59  ;;  %v2805_v54 = vsel %vm270_vm5, %v2777_v9, -inf  ;;  %v2813_v15 = vsel %vm270_vm5, %v2778_v11, -inf  ;;  %v2814_v14 = vsel %vm270_vm5, %v2779_v49, -inf }
 0x23f   : > { %v2789_v63 = vrot.slane %v2788_v7, 4  ;;  %v2806_v29 = vmax.f32 %v2804_v33, %v2805_v54  ;;  %v2815_v22 = vmax.f32 %v2813_v15, %v2814_v14  ;;  %v2822_v26 = vsel %vm270_vm5, %v2780_v6, -inf }
 0x240   : > { %v2798_v58 = vrot.slane %v2797_v30, 4  ;;  %v2823_v5 = vsel %vm270_vm5, %v2781_v8, -inf  ;;  %v2831_v62 = vsel %vm270_vm5, %v2782_v10, -inf  ;;  %v2832_v25 = vsel %vm270_vm5, %v2783_v48, -inf }
 0x241   : > { %v2790_v18 = vmax.f32 %v2788_v7, %v2789_v63  ;;  %v2807_v23 = vrot.slane %v2806_v29, 4  ;;  %v2816_v12 = vrot.slane %v2815_v22, 4  ;;  %v2824_v39 = vmax.f32 %v2822_v26, %v2823_v5 }
 0x242   : > { %v2799_v16 = vmax.f32 %v2797_v30, %v2798_v58  ;;  %v2833_v17 = vmax.f32 %v2831_v62, %v2832_v25  ;;  %v2840_v37 = vsel %vm270_vm5, %v2784_v21, -inf  ;;  %v2841_v32 = vsel %vm270_vm5, %v2785_v0, -inf }
 0x243   : > { %v2791_v47 = vrot.slane %v2790_v18, 2  ;;  %v2808_v53 = vmax.f32 %v2806_v29, %v2807_v23  ;;  %v2817_v24 = vmax.f32 %v2815_v22, %v2816_v12  ;;  %v2825_v55 = vrot.slane %v2824_v39, 4 }
 0x244   : > { %v2800_v50 = vrot.slane %v2799_v16, 2  ;;  %v2834_v42 = vrot.slane %v2833_v17, 4  ;;  %v2842_v35 = vmax.f32 %v2840_v37, %v2841_v32  ;;  %v2851_v60 = vstv %s6643_s21 }
 0x245   : > { %v2792_v56 = vmax.f32 %v2790_v18, %v2791_v47  ;;  %v2809_v51 = vrot.slane %v2808_v53, 2  ;;  %v2818_v38 = vrot.slane %v2817_v24, 2  ;;  %v2826_v43 = vmax.f32 %v2824_v39, %v2825_v55 }
 0x246   : > { %v2801_v41 = vmax.f32 %v2799_v16, %v2800_v50  ;;  %v2835_v45 = vmax.f32 %v2833_v17, %v2834_v42  ;;  %v2843_v3 = vrot.slane %v2842_v35, 4  ;;  %vm6648_vm5 = vcmp.eq.s32.totalorder %v2851_v60, 1 }
 0x247   : > { %v2793_v34 = vrot.slane %v2792_v56, 1  ;;  %v2810_v31 = vmax.f32 %v2808_v53, %v2809_v51  ;;  %v2819_v44 = vmax.f32 %v2817_v24, %v2818_v38  ;;  %v2827_v52 = vrot.slane %v2826_v43, 2 }
 0x248   : > { %v2802_v40 = vrot.slane %v2801_v41, 1  ;;  %v2836_v13 = vrot.slane %v2835_v45, 2  ;;  %v2844_v1 = vmax.f32 %v2842_v35, %v2843_v3 }
 0x249   : > { %v2794_v46 = vmax.f32 %v2792_v56, %v2793_v34  ;;  %v2811_v28 = vrot.slane %v2810_v31, 1  ;;  %v2820_v57 = vrot.slane %v2819_v44, 1  ;;  %v2828_v61 = vmax.f32 %v2826_v43, %v2827_v52 }
 0x24a   : > { %v2803_v9 = vmax.f32 %v2801_v41, %v2802_v40  ;;  %v2837_v36 = vmax.f32 %v2835_v45, %v2836_v13  ;;  %v2845_v11 = vrot.slane %v2844_v1, 2 }
 0x24b   : > { %v2812_v49 = vmax.f32 %v2810_v31, %v2811_v28  ;;  %v2821_v6 = vmax.f32 %v2819_v44, %v2820_v57  ;;  %v2829_v20 = vrot.slane %v2828_v61, 1  ;;  %v2853_v8 = vsel %vm6648_vm5, %v2794_v46, 0.0 }
 0x24c   : > { %v2838_v10 = vrot.slane %v2837_v36, 1  ;;  %v2846_v48 = vmax.f32 %v2844_v1, %v2845_v11  ;;  %v2854_v21 = vsel %vm6648_vm5, %v2803_v9, 0.0 }
 0x24d   : > { %v2830_v0 = vmax.f32 %v2828_v61, %v2829_v20  ;;  %v2855_v19 = vsel %vm6648_vm5, %v2812_v49, 0.0  ;;  %v2867_v27 = vsel %vm451_vm10, %v2854_v21, %v2853_v8  ;;  %v2856_v59 = vsel %vm6648_vm5, %v2821_v6, 0.0 }
 0x24e   : > { %v2839_v7 = vmax.f32 %v2837_v36, %v2838_v10  ;;  %v2847_v4 = vrot.slane %v2846_v48, 1  ;;  %v2868_v33 = vsel %vm453_vm11, %v2855_v19, %v2867_v27 }
 0x24f   : > { %v2857_v30 = vsel %vm6648_vm5, %v2830_v0, 0.0  ;;  %v2869_v54 = vsel %vm455_vm12, %v2856_v59, %v2868_v33 }
 0x250   : > { %v2848_v15 = vmax.f32 %v2846_v48, %v2847_v4  ;;  %v2858_v14 = vsel %vm6648_vm5, %v2839_v7, 0.0  ;;  %v2870_v63 = vsel %vm457_vm13, %v2857_v30, %v2869_v54 }
 0x251   : > { %v2871_v29 = vsel %vm459_vm14, %v2858_v14, %v2870_v63 }
 0x252   : > { %v2859_v22 = vsel %vm6648_vm5, %v2848_v15, 0.0 }
 0x253   : > { %v2872_v26 = vsel %vm461_vm15, %v2859_v22, %v2871_v29 }
 0x254   : > { %2972 = vst.msk [vmem:[%s5954_s11 + $0x30] sm:$0x7f] %vm2082_vm9, %v2872_v26 }
 0x255 PF: > { %s44_s3 = sadd.s32 1, %s3154_s3   ;;  %s6985_s2 = smov %s3150_s15 }
 0x256   : > { %p41_p6 = scmp.ge.s32.totalorder %s44_s3, 7   ;;  %s6986_s15 = smov %s6988_s4 }
 0x258   :  { %43 = sbr.rel (!%p41_p6) target bundleno = 15 (0xf), region = 66 }

</bundles_post_ra>
